<compile_context>
chip_gen: v6e
topology: v6e:2x2x1
jax: 0.10.0
libtpu: 0.0.40
codegen_flags: <defaults>
</compile_context>

<pallas_src>
import functools

import numpy as np

import jax
import jax.numpy as jnp
from jax.experimental import pallas as pl
from jax.experimental.pallas import tpu as pltpu

OUT_DIM = {2: 39, 4: 35, 6: 31}

_S1_OFFSETS = tuple((dy, dx) for dy in range(3) for dx in range(3))   # 3x3 full-conv taps
_S2_OFFSETS = tuple((dy, dx) for dy in range(2) for dx in range(2))   # 2x2 phase-window taps
# (output sub-pixel phase parity, window offset) -> original ConvTranspose kernel tap
_K_OF_PHASE_TAP = {(0, 0): 2, (0, 1): 0, (1, 1): 1}

_VMEM_LIMIT = 48 * 1024 * 1024   # explicit cap (< v7x 64 MiB); per-step working set ~1.5 MB


# ------------------------------ Pallas kernels ------------------------------

def _fc_relu_kernel(h_ref, w_ref, b_ref, o_ref):
    # o = relu(h @ w + b) for one TILE_O-wide slice of the output columns (MXU).
    y = jnp.dot(h_ref[...], w_ref[...], preferred_element_type=jnp.float32)
    o_ref[...] = jnp.maximum(y + b_ref[...], 0.0)


def _make_conv_mm_kernel(act_fn):
    """act( W (M, K) @ patches (K, TILE_P) + b (M, 1) ) -> one (M, TILE_P) output tile."""
    def kernel(w_ref, b_ref, p_ref, o_ref):
        acc = jnp.dot(w_ref[...], p_ref[0], preferred_element_type=jnp.float32)
        o_ref[0] = act_fn(acc + b_ref[...])
    return kernel


def _relu(v):
    return jnp.maximum(v, 0.0)


# ------------------------------ host wrappers --------------------------------

def fc_relu(h, w, b, *, tile_o=2048):
    """relu(h @ w + b); w is (F, O) (pre-transposed), tiled over the wide O axis."""
    B, F = h.shape
    O = w.shape[1]
    to = tile_o if O > tile_o else O          # multiple of 128, or the full dim
    return pl.pallas_call(
        _fc_relu_kernel,
        out_shape=jax.ShapeDtypeStruct((B, O), jnp.float32),
        grid=(pl.cdiv(O, to),),
        in_specs=[pl.BlockSpec((B, F), lambda j: (0, 0)),
                  pl.BlockSpec((F, to), lambda j: (0, j)),
                  pl.BlockSpec((1, to), lambda j: (0, j))],
        out_specs=pl.BlockSpec((B, to), lambda j: (0, j)),
        compiler_params=pltpu.CompilerParams(
            dimension_semantics=("parallel",),
            vmem_limit_bytes=_VMEM_LIMIT),
    )(h, w, b)


def conv_matmul(w2, b2, patches, act_fn, *, tile_p=512):
    """act(w2 @ patches[n] + b2) per sample, tiled over pixel columns.

    w2: (M, K), b2: (M, 1), patches: (N, K, P) -> (N, M, P) float32.
    The pixel axis P (>= 1369 wide) sits on lanes -> dense, unmasked stores.
    """
    N, K, P = patches.shape
    M = w2.shape[0]
    tp = tile_p if P > tile_p else P          # multiple of 128, or the full dim
    return pl.pallas_call(
        _make_conv_mm_kernel(act_fn),
        out_shape=jax.ShapeDtypeStruct((N, M, P), jnp.float32),
        grid=(N, pl.cdiv(P, tp)),
        in_specs=[pl.BlockSpec((M, K), lambda n, p: (0, 0)),
                  pl.BlockSpec((M, 1), lambda n, p: (0, 0)),
                  pl.BlockSpec((1, K, tp), lambda n, p: (n, 0, p))],
        out_specs=pl.BlockSpec((1, M, tp), lambda n, p: (n, 0, p)),
        compiler_params=pltpu.CompilerParams(
            dimension_semantics=("parallel", "parallel"),
            vmem_limit_bytes=_VMEM_LIMIT),
    )(w2, b2, patches)


# --------------------------- im2col / phase glue ------------------------------

def _im2col_patches(x, pad, offsets, win_h, win_w):
    """x: (N, C, H, W) -> (N, T*C, win_h*win_w); row t*C+c is x_pad[c] shifted by offsets[t].

    Pure data movement (XLA pad/slice/concat); zero FLOPs.
    """
    N, C, _, _ = x.shape
    xp = jnp.pad(x, ((0, 0), (0, 0), (pad, pad), (pad, pad)))
    cols = [xp[:, :, dy:dy + win_h, dx:dx + win_w] for dy, dx in offsets]
    return jnp.concatenate(cols, axis=1).reshape(N, len(offsets) * C, win_h * win_w)


# --------------------------- parameter preparation ----------------------------

def init_pixel_decoder(key, obs_shape, feature_dim, num_layers=4, num_filters=32):
    """Random parameters in the PyTorch layout (fc weight (O, F); deconv (Cin, Cout, 3, 3))."""
    out_dim = OUT_DIM[num_layers]
    keys = jax.random.split(key, 2 + 2 * num_layers)
    fc_out = num_filters * out_dim * out_dim
    params = {
        "fc_w": 0.05 * jax.random.normal(keys[0], (fc_out, feature_dim), jnp.float32),
        "fc_b": 0.05 * jax.random.normal(keys[1], (fc_out,), jnp.float32),
        "deconvs": [],
    }
    for i in range(num_layers):
        c_out = num_filters if i < num_layers - 1 else obs_shape[2]
        w = 0.1 * jax.random.normal(keys[2 + 2 * i], (num_filters, c_out, 3, 3), jnp.float32)
        b = 0.1 * jax.random.normal(keys[3 + 2 * i], (c_out,), jnp.float32)
        params["deconvs"].append((w, b))
    return params


def _stride2_phase_weight(w):
    """(Cin, Cout, 3, 3) stride-2 ConvTranspose weight -> (4*Cout, 4*Cin) phase matrix.

    Row m = (py*2+px)*Cout + co ; col k = (dy*2+dx)*Cin + ci, where (dy, dx) indexes the
    2x2 window on the 1-padded (UNdilated) input and (py, px) the output sub-pixel phase.
    Taps a phase does not use stay zero (7/16 blocks) -- still ~2.25x fewer MACs than
    running the 3x3 kernel over a zero-dilated input.
    """
    cin, cout = w.shape[0], w.shape[1]
    w_np = np.asarray(w)
    wp = np.zeros((2, 2, cout, 2, 2, cin), np.float32)
    for py in (0, 1):
        for dy in (0, 1):
            ky = _K_OF_PHASE_TAP.get((py, dy))
            if ky is None:
                continue
            for px in (0, 1):
                for dx in (0, 1):
                    kx = _K_OF_PHASE_TAP.get((px, dx))
                    if kx is None:
                        continue
                    wp[py, px, :, dy, dx, :] = w_np[:, :, ky, kx].T
    return jnp.asarray(wp.reshape(4 * cout, 4 * cin))


def prepare_params(raw, num_layers=4):
    """One-time conversion to kernel-ready layouts (no per-forward transposes/flips)."""
    kp = {
        "fc_w": jnp.transpose(raw["fc_w"]),              # (F, O)
        "fc_b": raw["fc_b"].reshape(1, -1),              # (1, O)
        "deconvs": [],
    }
    for i in range(num_layers - 1):                      # stride-1 layers: full-conv matrix
        w, b = raw["deconvs"][i]
        cin, cout = w.shape[0], w.shape[1]
        wf = jnp.flip(w, (2, 3))                         # conv-transpose == conv w/ flipped taps
        w2 = jnp.transpose(wf, (1, 2, 3, 0)).reshape(cout, 9 * cin)   # (Cout, 9*Cin)
        kp["deconvs"].append((w2, b.reshape(cout, 1)))
    w, b = raw["deconvs"][-1]                            # stride-2 layer: phase matrix
    cout = w.shape[1]
    kp["deconvs"].append((_stride2_phase_weight(w), jnp.tile(b, 4).reshape(4 * cout, 1)))
    return kp


# --------------------------- PixelDecoder forward -----------------------------

def pixel_decoder_forward(kparams, h, *, num_layers=4, num_filters=32):
    out_dim = OUT_DIM[num_layers]
    B = h.shape[0]
    # fc + relu (MXU matmul tiled over the wide output dim)
    x = fc_relu(h, kparams["fc_w"], kparams["fc_b"])
    # h.view(-1, num_filters, out_dim, out_dim): NCHW natively, no transpose needed
    x = x.reshape(B, num_filters, out_dim, out_dim)
    # stride-1 ConvTranspose2d + relu: one im2col MXU matmul per layer
    for i in range(num_layers - 1):
        w2, b2 = kparams["deconvs"][i]
        N, _, H, W = x.shape
        ho, wo = H + 2, W + 2
        patches = _im2col_patches(x, pad=2, offsets=_S1_OFFSETS, win_h=ho, win_w=wo)
        x = conv_matmul(w2, b2, patches, _relu).reshape(N, w2.shape[0], ho, wo)
    # final stride-2 ConvTranspose2d (output_padding=1) + tanh via 2x2 phase decomposition
    wp, bp = kparams["deconvs"][-1]
    cout = wp.shape[0] // 4
    N, _, H, W = x.shape
    ph, pw = H + 1, W + 1
    patches = _im2col_patches(x, pad=1, offsets=_S2_OFFSETS, win_h=ph, win_w=pw)
    y = conv_matmul(wp, bp, patches, jnp.tanh).reshape(N, 2, 2, cout, ph, pw)
    # interleave phases: obs[n, co, 2*oy+py, 2*ox+px] = y[n, py, px, co, oy, ox]
    obs = jnp.transpose(y, (0, 3, 4, 1, 5, 2)).reshape(N, cout, 2 * ph, 2 * pw)
    return obs
    # TODO(synk): the PyTorch module also stashes intermediates in self.outputs
    # (debug-only bookkeeping); not reproduced here.


# ------------------------------ pure-XLA reference ----------------------------

def _ref_deconv(x, w, b, stride, output_padding):
    k = w.shape[2]
    wf = jnp.transpose(jnp.flip(w, (2, 3)), (1, 0, 2, 3))     # (Cout, Cin, k, k)
    y = jax.lax.conv_general_dilated(
        x, wf, window_strides=(1, 1),
        padding=[(k - 1, k - 1 + output_padding)] * 2,
        lhs_dilation=(stride, stride),
        dimension_numbers=("NCHW", "OIHW", "NCHW"))
    return y + b.reshape(1, -1, 1, 1)


def reference_forward(raw, h, *, num_layers=4, num_filters=32):
    out_dim = OUT_DIM[num_layers]
    x = jnp.maximum(h @ raw["fc_w"].T + raw["fc_b"], 0.0)
    x = x.reshape(h.shape[0], num_filters, out_dim, out_dim)
    for i in range(num_layers - 1):
        w, b = raw["deconvs"][i]
        x = jnp.maximum(_ref_deconv(x, w, b, 1, 0), 0.0)
    w, b = raw["deconvs"][-1]
    return jnp.tanh(_ref_deconv(x, w, b, 2, 1))


if __name__ == "__main__":
    key = jax.random.PRNGKey(0)
    batch, feature_dim = 2, 32
    num_layers, num_filters = 4, 8            # out_dim = 35 -> 37 -> 39 -> 41 -> 84
    obs_shape = (84, 84, 3)                    # module indexes obs_shape[2] for channels

    pkey, hkey = jax.random.split(key)
    raw = init_pixel_decoder(pkey, obs_shape, feature_dim,
                             num_layers=num_layers, num_filters=num_filters)
    kparams = prepare_params(raw, num_layers=num_layers)
    h = jax.random.normal(hkey, (batch, feature_dim), jnp.float32)

    fwd = jax.jit(functools.partial(pixel_decoder_forward,
                                    num_layers=num_layers, num_filters=num_filters))
    obs = jax.block_until_ready(fwd(kparams, h))
    assert obs.shape == (batch, obs_shape[2], 84, 84), obs.shape
    assert bool(jnp.all(jnp.isfinite(obs)))

    # correctness vs. a pure-XLA reference of the PyTorch module
    ref = jax.block_until_ready(
        reference_forward(raw, h, num_layers=num_layers, num_filters=num_filters))
    np.testing.assert_allclose(np.asarray(obs), np.asarray(ref), atol=2e-2, rtol=2e-2)

    print("KERNEL_OK")
</pallas_src>

<mosaic_0001>
module attributes {stable_mosaic.version = 11 : i64} {
  func.func @_fc_relu_kernel(%arg0: i32, %arg1: memref<2x32xf32, #tpu.memory_space<vmem>>, %arg2: memref<32x2048xf32, #tpu.memory_space<vmem>>, %arg3: memref<1x2048xf32, #tpu.memory_space<vmem>>, %arg4: memref<2x2048xf32, #tpu.memory_space<vmem>>) attributes {dimension_semantics = [#tpu.dimension_semantics<parallel>], iteration_bounds = array<i64: 5>, scalar_prefetch = 0 : i64, scratch_operands = 0 : i64, tpu.core_type = #tpu.core_type<tc>, window_params = [{pipeline_mode = #tpu.pipeline_mode<synchronous>, transform_indices = @transform_0, window_bounds = array<i64: 2, 32>}, {transform_indices = @transform_1, window_bounds = array<i64: 32, 2048>}, {transform_indices = @transform_2, window_bounds = array<i64: 1, 2048>}, {transform_indices = @transform_3, window_bounds = array<i64: 2, 2048>}]} {
    %c0 = arith.constant 0 : index
    %c0_0 = arith.constant 0 : index
    %0 = vector.load %arg1[%c0, %c0_0] : memref<2x32xf32, #tpu.memory_space<vmem>>, vector<2x32xf32>
    %c0_1 = arith.constant 0 : index
    %c0_2 = arith.constant 0 : index
    %1 = vector.load %arg2[%c0_1, %c0_2] : memref<32x2048xf32, #tpu.memory_space<vmem>>, vector<32x2048xf32>
    %cst = arith.constant dense<0.000000e+00> : vector<2x2048xf32>
    %2 = tpu.matmul %0, %1, %cst {dimension_numbers = #tpu.dot_dimension_numbers<[1], [0], [0], [1], [0, 0, 1, 1], [], []>} : vector<2x32xf32>, vector<32x2048xf32>, vector<2x2048xf32> -> vector<2x2048xf32>
    %c0_3 = arith.constant 0 : index
    %c0_4 = arith.constant 0 : index
    %3 = vector.load %arg3[%c0_3, %c0_4] : memref<1x2048xf32, #tpu.memory_space<vmem>>, vector<1x2048xf32>
    %4 = vector.broadcast %3 : vector<1x2048xf32> to vector<2x2048xf32>
    %5 = arith.addf %2, %4 : vector<2x2048xf32>
    %cst_5 = arith.constant 0.000000e+00 : f32
    %6 = vector.broadcast %cst_5 : f32 to vector<2x2048xf32>
    %7 = arith.maximumf %5, %6 : vector<2x2048xf32>
    %c0_6 = arith.constant 0 : index
    %c0_7 = arith.constant 0 : index
    %8 = vector.load %arg4[%c0_6, %c0_7] : memref<2x2048xf32, #tpu.memory_space<vmem>>, vector<2x2048xf32>
    tpu.vector_store %arg4[%c0_6, %c0_7], %7 {strides = array<i32>} : memref<2x2048xf32, #tpu.memory_space<vmem>>, vector<2x2048xf32>,
    return
  }
  func.func @transform_0(%arg0: i32) -> (i32, i32) {
    %c0_i32 = arith.constant 0 : i32
    %c0_i32_0 = arith.constant 0 : i32
    %c0_i32_1 = arith.constant 0 : i32
    return %c0_i32, %c0_i32_0 : i32, i32
  }
  func.func @transform_1(%arg0: i32) -> (i32, i32) {
    %c0_i32 = arith.constant 0 : i32
    %c0_i32_0 = arith.constant 0 : i32
    return %c0_i32, %arg0 : i32, i32
  }
  func.func @transform_2(%arg0: i32) -> (i32, i32) {
    %c0_i32 = arith.constant 0 : i32
    %c0_i32_0 = arith.constant 0 : i32
    return %c0_i32, %arg0 : i32, i32
  }
  func.func @transform_3(%arg0: i32) -> (i32, i32) {
    %c0_i32 = arith.constant 0 : i32
    %c0_i32_0 = arith.constant 0 : i32
    return %c0_i32, %arg0 : i32, i32
  }
}

module attributes {stable_mosaic.version = 11 : i64} {
  func.func @kernel(%arg0: i32, %arg1: i32, %arg2: memref<8x72xf32, #tpu.memory_space<vmem>>, %arg3: memref<8x1xf32, #tpu.memory_space<vmem>>, %arg4: memref<1x72x512xf32, #tpu.memory_space<vmem>>, %arg5: memref<1x8x512xf32, #tpu.memory_space<vmem>>) attributes {dimension_semantics = [#tpu.dimension_semantics<parallel>, #tpu.dimension_semantics<parallel>], iteration_bounds = array<i64: 2, 3>, scalar_prefetch = 0 : i64, scratch_operands = 0 : i64, tpu.core_type = #tpu.core_type<tc>, window_params = [{pipeline_mode = #tpu.pipeline_mode<synchronous>, transform_indices = @transform_0, window_bounds = array<i64: 8, 72>}, {pipeline_mode = #tpu.pipeline_mode<synchronous>, transform_indices = @transform_1, window_bounds = array<i64: 8, 1>}, {transform_indices = @transform_2, window_bounds = array<i64: 1, 72, 512>}, {transform_indices = @transform_3, window_bounds = array<i64: 1, 8, 512>}]} {
    %c0 = arith.constant 0 : index
    %c0_0 = arith.constant 0 : index
    %0 = vector.load %arg2[%c0, %c0_0] : memref<8x72xf32, #tpu.memory_space<vmem>>, vector<8x72xf32>
    %c0_1 = arith.constant 0 : index
    %c0_2 = arith.constant 0 : index
    %c0_3 = arith.constant 0 : index
    %1 = vector.load %arg4[%c0_1, %c0_2, %c0_3] : memref<1x72x512xf32, #tpu.memory_space<vmem>>, vector<1x72x512xf32>
    %2 = vector.shape_cast %1 : vector<1x72x512xf32> to vector<72x512xf32>
    %cst = arith.constant dense<0.000000e+00> : vector<8x512xf32>
    %3 = tpu.matmul %0, %2, %cst {dimension_numbers = #tpu.dot_dimension_numbers<[1], [0], [0], [1], [0, 0, 1, 1], [], []>} : vector<8x72xf32>, vector<72x512xf32>, vector<8x512xf32> -> vector<8x512xf32>
    %c0_4 = arith.constant 0 : index
    %c0_5 = arith.constant 0 : index
    %4 = vector.load %arg3[%c0_4, %c0_5] : memref<8x1xf32, #tpu.memory_space<vmem>>, vector<8x1xf32>
    %5 = vector.broadcast %4 : vector<8x1xf32> to vector<8x512xf32>
    %6 = arith.addf %3, %5 : vector<8x512xf32>
    %cst_6 = arith.constant 0.000000e+00 : f32
    %7 = vector.broadcast %cst_6 : f32 to vector<8x512xf32>
    %8 = arith.maximumf %6, %7 : vector<8x512xf32>
    %c0_7 = arith.constant 0 : index
    %c0_8 = arith.constant 0 : index
    %c0_9 = arith.constant 0 : index
    %9 = vector.load %arg5[%c0_7, %c0_8, %c0_9] : memref<1x8x512xf32, #tpu.memory_space<vmem>>, vector<1x8x512xf32>
    %10 = vector.shape_cast %9 : vector<1x8x512xf32> to vector<8x512xf32>
    %11 = vector.shape_cast %8 : vector<8x512xf32> to vector<1x8x512xf32>
    tpu.vector_store %arg5[%c0_7, %c0_8, %c0_9], %11 {strides = array<i32>} : memref<1x8x512xf32, #tpu.memory_space<vmem>>, vector<1x8x512xf32>,
    return
  }
  func.func @transform_0(%arg0: i32, %arg1: i32) -> (i32, i32) {
    %c0_i32 = arith.constant 0 : i32
    %c0_i32_0 = arith.constant 0 : i32
    %c0_i32_1 = arith.constant 0 : i32
    return %c0_i32, %c0_i32_0 : i32, i32
  }
  func.func @transform_1(%arg0: i32, %arg1: i32) -> (i32, i32) {
    %c0_i32 = arith.constant 0 : i32
    %c0_i32_0 = arith.constant 0 : i32
    %c0_i32_1 = arith.constant 0 : i32
    return %c0_i32, %c0_i32_0 : i32, i32
  }
  func.func @transform_2(%arg0: i32, %arg1: i32) -> (i32, i32, i32) {
    %c0_i32 = arith.constant 0 : i32
    %c0_i32_0 = arith.constant 0 : i32
    return %arg0, %c0_i32, %arg1 : i32, i32, i32
  }
  func.func @transform_3(%arg0: i32, %arg1: i32) -> (i32, i32, i32) {
    %c0_i32 = arith.constant 0 : i32
    %c0_i32_0 = arith.constant 0 : i32
    return %arg0, %c0_i32, %arg1 : i32, i32, i32
  }
}

module attributes {stable_mosaic.version = 11 : i64} {
  func.func @kernel(%arg0: i32, %arg1: i32, %arg2: memref<8x72xf32, #tpu.memory_space<vmem>>, %arg3: memref<8x1xf32, #tpu.memory_space<vmem>>, %arg4: memref<1x72x512xf32, #tpu.memory_space<vmem>>, %arg5: memref<1x8x512xf32, #tpu.memory_space<vmem>>) attributes {dimension_semantics = [#tpu.dimension_semantics<parallel>, #tpu.dimension_semantics<parallel>], iteration_bounds = array<i64: 2, 3>, scalar_prefetch = 0 : i64, scratch_operands = 0 : i64, tpu.core_type = #tpu.core_type<tc>, window_params = [{pipeline_mode = #tpu.pipeline_mode<synchronous>, transform_indices = @transform_0, window_bounds = array<i64: 8, 72>}, {pipeline_mode = #tpu.pipeline_mode<synchronous>, transform_indices = @transform_1, window_bounds = array<i64: 8, 1>}, {transform_indices = @transform_2, window_bounds = array<i64: 1, 72, 512>}, {transform_indices = @transform_3, window_bounds = array<i64: 1, 8, 512>}]} {
    %c0 = arith.constant 0 : index
    %c0_0 = arith.constant 0 : index
    %0 = vector.load %arg2[%c0, %c0_0] : memref<8x72xf32, #tpu.memory_space<vmem>>, vector<8x72xf32>
    %c0_1 = arith.constant 0 : index
    %c0_2 = arith.constant 0 : index
    %c0_3 = arith.constant 0 : index
    %1 = vector.load %arg4[%c0_1, %c0_2, %c0_3] : memref<1x72x512xf32, #tpu.memory_space<vmem>>, vector<1x72x512xf32>
    %2 = vector.shape_cast %1 : vector<1x72x512xf32> to vector<72x512xf32>
    %cst = arith.constant dense<0.000000e+00> : vector<8x512xf32>
    %3 = tpu.matmul %0, %2, %cst {dimension_numbers = #tpu.dot_dimension_numbers<[1], [0], [0], [1], [0, 0, 1, 1], [], []>} : vector<8x72xf32>, vector<72x512xf32>, vector<8x512xf32> -> vector<8x512xf32>
    %c0_4 = arith.constant 0 : index
    %c0_5 = arith.constant 0 : index
    %4 = vector.load %arg3[%c0_4, %c0_5] : memref<8x1xf32, #tpu.memory_space<vmem>>, vector<8x1xf32>
    %5 = vector.broadcast %4 : vector<8x1xf32> to vector<8x512xf32>
    %6 = arith.addf %3, %5 : vector<8x512xf32>
    %cst_6 = arith.constant 0.000000e+00 : f32
    %7 = vector.broadcast %cst_6 : f32 to vector<8x512xf32>
    %8 = arith.maximumf %6, %7 : vector<8x512xf32>
    %c0_7 = arith.constant 0 : index
    %c0_8 = arith.constant 0 : index
    %c0_9 = arith.constant 0 : index
    %9 = vector.load %arg5[%c0_7, %c0_8, %c0_9] : memref<1x8x512xf32, #tpu.memory_space<vmem>>, vector<1x8x512xf32>
    %10 = vector.shape_cast %9 : vector<1x8x512xf32> to vector<8x512xf32>
    %11 = vector.shape_cast %8 : vector<8x512xf32> to vector<1x8x512xf32>
    tpu.vector_store %arg5[%c0_7, %c0_8, %c0_9], %11 {strides = array<i32>} : memref<1x8x512xf32, #tpu.memory_space<vmem>>, vector<1x8x512xf32>,
    return
  }
  func.func @transform_0(%arg0: i32, %arg1: i32) -> (i32, i32) {
    %c0_i32 = arith.constant 0 : i32
    %c0_i32_0 = arith.constant 0 : i32
    %c0_i32_1 = arith.constant 0 : i32
    return %c0_i32, %c0_i32_0 : i32, i32
  }
  func.func @transform_1(%arg0: i32, %arg1: i32) -> (i32, i32) {
    %c0_i32 = arith.constant 0 : i32
    %c0_i32_0 = arith.constant 0 : i32
    %c0_i32_1 = arith.constant 0 : i32
    return %c0_i32, %c0_i32_0 : i32, i32
  }
  func.func @transform_2(%arg0: i32, %arg1: i32) -> (i32, i32, i32) {
    %c0_i32 = arith.constant 0 : i32
    %c0_i32_0 = arith.constant 0 : i32
    return %arg0, %c0_i32, %arg1 : i32, i32, i32
  }
  func.func @transform_3(%arg0: i32, %arg1: i32) -> (i32, i32, i32) {
    %c0_i32 = arith.constant 0 : i32
    %c0_i32_0 = arith.constant 0 : i32
    return %arg0, %c0_i32, %arg1 : i32, i32, i32
  }
}

module attributes {stable_mosaic.version = 11 : i64} {
  func.func @kernel(%arg0: i32, %arg1: i32, %arg2: memref<8x72xf32, #tpu.memory_space<vmem>>, %arg3: memref<8x1xf32, #tpu.memory_space<vmem>>, %arg4: memref<1x72x512xf32, #tpu.memory_space<vmem>>, %arg5: memref<1x8x512xf32, #tpu.memory_space<vmem>>) attributes {dimension_semantics = [#tpu.dimension_semantics<parallel>, #tpu.dimension_semantics<parallel>], iteration_bounds = array<i64: 2, 4>, scalar_prefetch = 0 : i64, scratch_operands = 0 : i64, tpu.core_type = #tpu.core_type<tc>, window_params = [{pipeline_mode = #tpu.pipeline_mode<synchronous>, transform_indices = @transform_0, window_bounds = array<i64: 8, 72>}, {pipeline_mode = #tpu.pipeline_mode<synchronous>, transform_indices = @transform_1, window_bounds = array<i64: 8, 1>}, {transform_indices = @transform_2, window_bounds = array<i64: 1, 72, 512>}, {transform_indices = @transform_3, window_bounds = array<i64: 1, 8, 512>}]} {
    %c0 = arith.constant 0 : index
    %c0_0 = arith.constant 0 : index
    %0 = vector.load %arg2[%c0, %c0_0] : memref<8x72xf32, #tpu.memory_space<vmem>>, vector<8x72xf32>
    %c0_1 = arith.constant 0 : index
    %c0_2 = arith.constant 0 : index
    %c0_3 = arith.constant 0 : index
    %1 = vector.load %arg4[%c0_1, %c0_2, %c0_3] : memref<1x72x512xf32, #tpu.memory_space<vmem>>, vector<1x72x512xf32>
    %2 = vector.shape_cast %1 : vector<1x72x512xf32> to vector<72x512xf32>
    %cst = arith.constant dense<0.000000e+00> : vector<8x512xf32>
    %3 = tpu.matmul %0, %2, %cst {dimension_numbers = #tpu.dot_dimension_numbers<[1], [0], [0], [1], [0, 0, 1, 1], [], []>} : vector<8x72xf32>, vector<72x512xf32>, vector<8x512xf32> -> vector<8x512xf32>
    %c0_4 = arith.constant 0 : index
    %c0_5 = arith.constant 0 : index
    %4 = vector.load %arg3[%c0_4, %c0_5] : memref<8x1xf32, #tpu.memory_space<vmem>>, vector<8x1xf32>
    %5 = vector.broadcast %4 : vector<8x1xf32> to vector<8x512xf32>
    %6 = arith.addf %3, %5 : vector<8x512xf32>
    %cst_6 = arith.constant 0.000000e+00 : f32
    %7 = vector.broadcast %cst_6 : f32 to vector<8x512xf32>
    %8 = arith.maximumf %6, %7 : vector<8x512xf32>
    %c0_7 = arith.constant 0 : index
    %c0_8 = arith.constant 0 : index
    %c0_9 = arith.constant 0 : index
    %9 = vector.load %arg5[%c0_7, %c0_8, %c0_9] : memref<1x8x512xf32, #tpu.memory_space<vmem>>, vector<1x8x512xf32>
    %10 = vector.shape_cast %9 : vector<1x8x512xf32> to vector<8x512xf32>
    %11 = vector.shape_cast %8 : vector<8x512xf32> to vector<1x8x512xf32>
    tpu.vector_store %arg5[%c0_7, %c0_8, %c0_9], %11 {strides = array<i32>} : memref<1x8x512xf32, #tpu.memory_space<vmem>>, vector<1x8x512xf32>,
    return
  }
  func.func @transform_0(%arg0: i32, %arg1: i32) -> (i32, i32) {
    %c0_i32 = arith.constant 0 : i32
    %c0_i32_0 = arith.constant 0 : i32
    %c0_i32_1 = arith.constant 0 : i32
    return %c0_i32, %c0_i32_0 : i32, i32
  }
  func.func @transform_1(%arg0: i32, %arg1: i32) -> (i32, i32) {
    %c0_i32 = arith.constant 0 : i32
    %c0_i32_0 = arith.constant 0 : i32
    %c0_i32_1 = arith.constant 0 : i32
    return %c0_i32, %c0_i32_0 : i32, i32
  }
  func.func @transform_2(%arg0: i32, %arg1: i32) -> (i32, i32, i32) {
    %c0_i32 = arith.constant 0 : i32
    %c0_i32_0 = arith.constant 0 : i32
    return %arg0, %c0_i32, %arg1 : i32, i32, i32
  }
  func.func @transform_3(%arg0: i32, %arg1: i32) -> (i32, i32, i32) {
    %c0_i32 = arith.constant 0 : i32
    %c0_i32_0 = arith.constant 0 : i32
    return %arg0, %c0_i32, %arg1 : i32, i32, i32
  }
}

module attributes {stable_mosaic.version = 11 : i64} {
  func.func @kernel(%arg0: i32, %arg1: i32, %arg2: memref<12x32xf32, #tpu.memory_space<vmem>>, %arg3: memref<12x1xf32, #tpu.memory_space<vmem>>, %arg4: memref<1x32x512xf32, #tpu.memory_space<vmem>>, %arg5: memref<1x12x512xf32, #tpu.memory_space<vmem>>) attributes {dimension_semantics = [#tpu.dimension_semantics<parallel>, #tpu.dimension_semantics<parallel>], iteration_bounds = array<i64: 2, 4>, scalar_prefetch = 0 : i64, scratch_operands = 0 : i64, tpu.core_type = #tpu.core_type<tc>, window_params = [{pipeline_mode = #tpu.pipeline_mode<synchronous>, transform_indices = @transform_0, window_bounds = array<i64: 12, 32>}, {pipeline_mode = #tpu.pipeline_mode<synchronous>, transform_indices = @transform_1, window_bounds = array<i64: 12, 1>}, {transform_indices = @transform_2, window_bounds = array<i64: 1, 32, 512>}, {transform_indices = @transform_3, window_bounds = array<i64: 1, 12, 512>}]} {
    %c0 = arith.constant 0 : index
    %c0_0 = arith.constant 0 : index
    %0 = vector.load %arg2[%c0, %c0_0] : memref<12x32xf32, #tpu.memory_space<vmem>>, vector<12x32xf32>
    %c0_1 = arith.constant 0 : index
    %c0_2 = arith.constant 0 : index
    %c0_3 = arith.constant 0 : index
    %1 = vector.load %arg4[%c0_1, %c0_2, %c0_3] : memref<1x32x512xf32, #tpu.memory_space<vmem>>, vector<1x32x512xf32>
    %2 = vector.shape_cast %1 : vector<1x32x512xf32> to vector<32x512xf32>
    %cst = arith.constant dense<0.000000e+00> : vector<12x512xf32>
    %3 = tpu.matmul %0, %2, %cst {dimension_numbers = #tpu.dot_dimension_numbers<[1], [0], [0], [1], [0, 0, 1, 1], [], []>} : vector<12x32xf32>, vector<32x512xf32>, vector<12x512xf32> -> vector<12x512xf32>
    %c0_4 = arith.constant 0 : index
    %c0_5 = arith.constant 0 : index
    %4 = vector.load %arg3[%c0_4, %c0_5] : memref<12x1xf32, #tpu.memory_space<vmem>>, vector<12x1xf32>
    %5 = vector.broadcast %4 : vector<12x1xf32> to vector<12x512xf32>
    %6 = arith.addf %3, %5 : vector<12x512xf32>
    %7 = math.tanh %6 : vector<12x512xf32>
    %c0_6 = arith.constant 0 : index
    %c0_7 = arith.constant 0 : index
    %c0_8 = arith.constant 0 : index
    %8 = vector.load %arg5[%c0_6, %c0_7, %c0_8] : memref<1x12x512xf32, #tpu.memory_space<vmem>>, vector<1x12x512xf32>
    %9 = vector.shape_cast %8 : vector<1x12x512xf32> to vector<12x512xf32>
    %10 = vector.shape_cast %7 : vector<12x512xf32> to vector<1x12x512xf32>
    tpu.vector_store %arg5[%c0_6, %c0_7, %c0_8], %10 {strides = array<i32>} : memref<1x12x512xf32, #tpu.memory_space<vmem>>, vector<1x12x512xf32>,
    return
  }
  func.func @transform_0(%arg0: i32, %arg1: i32) -> (i32, i32) {
    %c0_i32 = arith.constant 0 : i32
    %c0_i32_0 = arith.constant 0 : i32
    %c0_i32_1 = arith.constant 0 : i32
    return %c0_i32, %c0_i32_0 : i32, i32
  }
  func.func @transform_1(%arg0: i32, %arg1: i32) -> (i32, i32) {
    %c0_i32 = arith.constant 0 : i32
    %c0_i32_0 = arith.constant 0 : i32
    %c0_i32_1 = arith.constant 0 : i32
    return %c0_i32, %c0_i32_0 : i32, i32
  }
  func.func @transform_2(%arg0: i32, %arg1: i32) -> (i32, i32, i32) {
    %c0_i32 = arith.constant 0 : i32
    %c0_i32_0 = arith.constant 0 : i32
    return %arg0, %c0_i32, %arg1 : i32, i32, i32
  }
  func.func @transform_3(%arg0: i32, %arg1: i32) -> (i32, i32, i32) {
    %c0_i32 = arith.constant 0 : i32
    %c0_i32_0 = arith.constant 0 : i32
    return %arg0, %c0_i32, %arg1 : i32, i32, i32
  }
}

</mosaic_0001>

<bundles_post_ra>
// kernel: pixel_decoder_forward.5
= control target key start
LH: loop header
LB: loop body
LE: loop exit
PB: predicated region body
PF: predicated region fallthrough
CT: control target
= control target key end

     0   :  { %8 = vsyncpa [#allocation3], 0  ;;  %s2918_s0 = inlined_call_operand.hbm [shape: f32[2,32], index: 0, kind: input, shape index: {}]   ;;  %s2919_s1 = inlined_call_operand.hbm [shape: f32[32,9800], index: 1, kind: input, shape index: {}]   ;;  %s2920_s2 = inlined_call_operand.hbm [shape: f32[1,9800], index: 2, kind: input, shape index: {}]   ;;  %s2921_s3 = inlined_call_operand.vmem [shape: f32[2,9800], index: 3, kind: output, shape index: {}]  }
   0x1   :  { %9 = vsyncpa [#allocation5], 0 }
   0x2   :  { %11 = vsyncpa [#allocation5 + $0x1], 0  ;;  %s2207_s12 = smov 0   ;;  %s2209_s13 = smov 0  }
   0x3   :  { %s2211_s14 = smov 0   ;;  %s2213_s15 = smov 0  }
   0x4 LB: > { %s2226_s16 = sadd.s32 4294967295, %s2112_s15   ;;  %s2229_s17 = sadd.s32 1, %s2112_s15   ;;  %s2112_s15 = sphi %s2213_s15, %s2945_s15   ;;  %s2108_s14 = sphi %s2211_s14, %s2944_s14   ;;  %s2104_s13 = sphi %s2209_s13, %s2943_s13   ;;  %s2100_s12 = sphi %s2207_s12, %s2942_s12  }
   0x5   : > { %s42_s18 = ssub.s32 %s2112_s15, %s2229_s17  ;;  %s45_s19 = sadd.s32 1, %s2108_s14 }
   0x6   : > { %p43_p0 = scmp.eq.s32.totalorder %s42_s18, 0  ;;  %p52_p1 = scmp.ne.s32.totalorder %s2108_s14, %s2104_s13 }
   0x7   : > { %p53_p2 = scmp.eq.s32.totalorder %s2112_s15, 0  ;;  %p58_p3 = scmp.ne.s32.totalorder %s2104_s13, %s2100_s12 }
   0x8   : > { %s2239_s20 = scalar_select %p43_p0, %s2108_s14, %s45_s19  }
   0x9   : > { %p2241_p4 = por %p53_p2, %p52_p1  ;;  %p2923_p5 = scmp.eq.s32.totalorder %s2226_s16, 0 }
   0xa   : > { %p108_p6 = scmp.eq.s32.totalorder %s2226_s16, 4  ;;  %p1684_p7 = scmp.ge.s32.totalorder %s2112_s15, 1 }
   0xb   : > { %p2250_p8 = por %p2923_p5, %p58_p3  ;;  %p121_p9 = scmp.lt.s32.totalorder %s2112_s15, 6 }
   0xc   : > { %p2255_p10 = por %p108_p6, %p52_p1  ;;  %s2178_s25 = smov [#allocation2]  }
   0xd   : > { %s2925_s22 = scalar_select %p2250_p8, 1, 0 }
   0xe   : > { %s2926_s23 = scalar_select %p2255_p10, 1, 0 }
   0xf   : > { %p2259_p11 = pnand %p1684_p7, %p121_p9  ;;  %s134_s26 = sshll.u32 %s2178_s25, 4  ;;  %s135_s26 = int_to_ptr.vmem [resolvable:$true] %s134_s26 }
  0x10   : > { %s1943_s27 = scalar_lea.vmem %s135_s26, 32  ;;  %p1951_p6 = scmp.lt.s32.totalorder %s135_s26, %s135_s26 }
  0x11   : > { %p1759_p12 = pneg %p2259_p11  ;;  %p1944_p2 = scmp.ne.s32.totalorder %s135_s26, %s1943_s27 }
  0x12   : > { %p1952_p8 = scmp.lt.s32.totalorder %s1943_s27, %s1943_s27 }
  0x13   : > { %p1760_p13 = pnand %p1759_p12, %p2923_p5 }
  0x14   : > { %p1953_p10 = por %p1952_p8, %p1951_p6 }
  0x15   : > { %p1934_p0 = pneg %p1760_p13 }
  0x17   : > { %p1946_p3 = pnand %p1944_p2, %p1934_p0 }
  0x19   : > { %p1947_p1 = pneg %p1946_p3 }
  0x1b   : > { %p1954_p7 = pnand %p1953_p10, %p1947_p1 }
  0x1d   : > { %1957 = shalt.err (!%p1954_p7)
}
  0x1e   : > { %1762 = dma.hbm_to_vmem [thread:$0]  (!%p1760_p13), %s2918_s0, 32, %s135_s26, [#allocation3]  }
  0x1f   : > { %p1686_p9 = scmp.ge.s32.totalorder %s2112_s15, 5 }
  0x21   : > { %141 = sbr.rel (%p1686_p9) target bundleno = 101 (0x65), region = 20 }
  0x26   : > { %144 = sbr.rel (!%p2241_p4) target bundleno = 70 (0x46), region = 24  ;;  %s145_s30 = sand.u32 (%p2241_p4), 1, %s2112_s15  }
  0x27   : > { %s147_s4 = sand.u32 (%p2241_p4), 1, %s2108_s14   ;;  %s1688_s6 = sshll.u32 (%p2241_p4), %s2112_s15, 4 }
  0x28   : > { %s1687_s5 = sshll.u32 (%p2241_p4), %s147_s4, 9  ;;  %s151_s7 = ssub.s32 (%p2241_p4), 77, %s1688_s6 }
  0x29   : > { %p152_p8 = scmp.lt.s32.totalorder (%p2241_p4), %s151_s7, 16  ;;  %s2282_s10 = scalar_lea.sflag (%p2241_p4), [#allocation5], %s145_s30 }
  0x2a   : > { %s149_s11 = scalar_lea.vmem (%p2241_p4), [#allocation4], %s1687_s5 }
  0x2b   : > { %s2947_s7 = smov (!%p152_p8, %s151_s7), 16 }
  0x2c   : > { %s2279_s8 = sshll.u32 %s2947_s7, 9 }
  0x2d   : > { %s156_s9 = ssub.s32 8192, %s2279_s8 }
  0x2e   : > { %157 = vsyncadd %s2282_s10, %s156_s9  ;;  %p1690_p10 = scmp.ne.s32.totalorder %s2279_s8, 0  ;;  %s1744_s12 = sshll.u32 %s2112_s15, 11 }
  0x2f   : > { %s2290_s25 = scalar_lea.hbm %s2919_s1, %s1744_s12  ;;  %s1692_s26 = sshll.u32 %s2947_s7, 3 }
  0x30   : > { %s163_s27 = sshll.u32 %s149_s11, 4  ;;  %s1958_s28 = scalar_lea.hbm %s2290_s25, %s2279_s8  ;;  %s2293_s27 = int_to_ptr.vmem [resolvable:$true] %s163_s27 }
  0x31   : > { %p1959_p12 = scmp.ne.s32.totalorder %s2290_s25, %s1958_s28  ;;  %s1962_s4 = scalar_lea.hbm %s2919_s1, 39424 }
  0x32   : > { %p1963_p2 = scmp.lt.s32.totalorder %s2290_s25, %s2919_s1  ;;  %p1964_p3 = scmp.lt.s32.totalorder %s1962_s4, %s1958_s28 }
  0x33   : > { %p1960_p13 = pnand %p1959_p12, %p1690_p10 }
  0x34   : > { %p1965_p1 = por %p1964_p3, %p1963_p2 }
  0x35   : > { %p1961_p0 = pneg %p1960_p13 }
  0x37   : > { %p1966_p6 = pnand %p1965_p1, %p1961_p0 }
  0x39   : > { %1969 = shalt.err (!%p1966_p6)
}
  0x3a   : > { %s1970_s9 = scalar_lea.vmem %s2293_s27, %s2279_s8  ;;  %s2179_s11 = smov [#allocation4]  }
  0x3b   : > { %p1971_p7 = scmp.ne.s32.totalorder %s2293_s27, %s1970_s9  ;;  %s1974_s12 = sshll.u32 %s2179_s11, 4  ;;  %s1975_s12 = int_to_ptr.vmem [resolvable:$false] %s1974_s12 }
  0x3c   : > { %s1976_s18 = scalar_lea.vmem %s1975_s12, 16384  ;;  %p1977_p12 = scmp.lt.s32.totalorder %s2293_s27, %s1975_s12 }
  0x3d   : > { %p1972_p9 = pnand %p1971_p7, %p1690_p10  ;;  %p1978_p13 = scmp.lt.s32.totalorder %s1976_s18, %s1970_s9 }
  0x3f   : > { %p1973_p8 = pneg %p1972_p9  ;;  %p1979_p5 = por %p1978_p13, %p1977_p12 }
  0x41   : > { %p1980_p2 = pnand %p1979_p5, %p1973_p8 }
  0x43   : > { %1983 = shalt.err (!%p1980_p2)
}
  0x44   : > { %s2180_s19 = smov 9856   ;;  %s2181_s28 = smov 2048  }
  0x45   : > { %169 = dma.hbm_to_vmem [thread:$0]  (%p1690_p10), %s2290_s25, %s2279_s8, %s2293_s27, %s2282_s10, %s2180_s19, %s2181_s28, %s1692_s26  }
  0x46 PF: > { %172 = sbr.rel (!%p2241_p4) target bundleno = 101 (0x65), region = 28  ;;  %s173_s29 = sand.u32 (%p2241_p4), 1, %s2112_s15  }
  0x47   : > { %s175_s30 = sand.u32 (%p2241_p4), 1, %s2108_s14   ;;  %s1696_s5 = sshll.u32 (%p2241_p4), %s2112_s15, 4 }
  0x48   : > { %s1695_s4 = sshll.u32 (%p2241_p4), %s175_s30, 4  ;;  %s179_s6 = ssub.s32 (%p2241_p4), 77, %s1696_s5 }
  0x49   : > { %p180_p5 = scmp.lt.s32.totalorder (%p2241_p4), %s179_s6, 16  ;;  %s2329_s7 = scalar_lea.sflag (%p2241_p4), [#allocation5], %s173_s29 }
  0x4a   : > { %s177_s8 = scalar_lea.vmem (%p2241_p4), [#allocation6], %s1695_s4 }
  0x4b   : > { %s2949_s6 = smov (!%p180_p5, %s179_s6), 16 }
  0x4c   : > { %s2326_s9 = sshll.u32 %s2949_s6, 4 }
  0x4d   : > { %s184_s11 = ssub.s32 256, %s2326_s9 }
  0x4e   : > { %185 = vsyncadd %s2329_s7, %s184_s11  ;;  %p1698_p4 = scmp.ne.s32.totalorder %s2326_s9, 0  ;;  %s1747_s21 = sshll.u32 %s2112_s15, 8 }
  0x4f   : > { %s188_s26 = scalar_lea.hbm %s2920_s2, %s1747_s21  ;;  %s190_s27 = sshll.u32 %s177_s8, 4  ;;  %s191_s27 = int_to_ptr.vmem [resolvable:$true] %s190_s27 }
  0x50   : > { %s1984_s12 = scalar_lea.hbm %s188_s26, %s2326_s9  ;;  %s1988_s28 = scalar_lea.hbm %s2920_s2, 1232 }
  0x51   : > { %p1985_p10 = scmp.ne.s32.totalorder %s188_s26, %s1984_s12  ;;  %p1989_p1 = scmp.lt.s32.totalorder %s188_s26, %s2920_s2 }
  0x52   : > { %p1990_p6 = scmp.lt.s32.totalorder %s1988_s28, %s1984_s12 }
  0x53   : > { %p1986_p0 = pnand %p1985_p10, %p1698_p4 }
  0x54   : > { %p1991_p7 = por %p1990_p6, %p1989_p1 }
  0x55   : > { %p1987_p3 = pneg %p1986_p0 }
  0x57   : > { %p1992_p9 = pnand %p1991_p7, %p1987_p3 }
  0x59   : > { %1995 = shalt.err (!%p1992_p9)
}
  0x5a   : > { %s1996_s15 = scalar_lea.vmem %s191_s27, %s2326_s9  ;;  %s2182_s4 = smov [#allocation6]  }
  0x5b   : > { %p1997_p8 = scmp.ne.s32.totalorder %s191_s27, %s1996_s15  ;;  %s2000_s5 = sshll.u32 %s2182_s4, 4  ;;  %s2001_s5 = int_to_ptr.vmem [resolvable:$false] %s2000_s5 }
  0x5c   : > { %s2002_s6 = scalar_lea.vmem %s2001_s5, 512  ;;  %p2003_p2 = scmp.lt.s32.totalorder %s191_s27, %s2001_s5 }
  0x5d   : > { %p1998_p12 = pnand %p1997_p8, %p1698_p4  ;;  %p2004_p5 = scmp.lt.s32.totalorder %s2002_s6, %s1996_s15 }
  0x5f   : > { %p1999_p13 = pneg %p1998_p12  ;;  %p2005_p10 = por %p2004_p5, %p2003_p2 }
  0x61   : > { %p2006_p0 = pnand %p2005_p10, %p1999_p13 }
  0x63   : > { %2009 = shalt.err (!%p2006_p0)
}
  0x64   : > { %193 = dma.hbm_to_vmem [thread:$0]  (%p1698_p4), %s188_s26, %s2326_s9, %s191_s27, %s2329_s7  }
  0x65 PF: > { %199 = sbr.rel (%p2259_p11) target bundleno = 504 (0x1f8), region = 32  ;;  %p2928_p3 = scmp.eq.s32.totalorder (!%p2259_p11), %s2226_s16, 0 }
  0x6a   : > { %2091 = dma.done.wait (%p2928_p3), [#allocation3], 32   ;;  %p2929_p1 = pmov %p2928_p3 }
  0x6b   : > { %s205_s11 = sand.u32 1, %s2226_s16   ;;  %s2361_s8 = sand.u32 1, %s2104_s13  }
  0x6c   : > { %2093 = vsyncadd (%p2929_p1), [#allocation3], 4294967264  ;;  %s1702_s21 = sshll.u32 %s2361_s8, 9  ;;  %s206_s9 = scalar_lea.sflag [#allocation5], %s205_s11 }
  0x6d   : > { %s2364_s7 = scalar_lea.vmem [#allocation4], %s1702_s21  ;;  %p2930_p4 = scmp.ne.s32.totalorder %s2925_s22, 0 }
  0x6f   : > { %2095 = dma.done.wait (%p2930_p4), %s206_s9, 8448  }
  0x70   : > { %2097 = vsyncadd (%p2930_p4), %s206_s9, 4294958848  ;;  %v2183_v0 = vmov 0.0   ;;  %v310_v1 = vld [vmem:[%s2364_s7 + $0x188] sm:$0xff]  ;;  %v312_v2 = vld [vmem:[%s2364_s7 + $0x198] sm:$0xff]  ;;  %vm409_vm0 = vcmask 261120   ;;  %s1703_s22 = sshll.u32 %s2361_s8, 4 }
  0x71   : > { %477 = vmatprep.mubr.f32.mxu0 %v2183_v0  ;;  %548 = vmatprep.mubr.f32.mxu1 %v2183_v0  ;;  %v309_v3 = vld [vmem:[%s2364_s7 + $0x180] sm:$0xff]  ;;  %v311_v4 = vld [vmem:[%s2364_s7 + $0x190] sm:$0xff]  ;;  %v294_v5 = vld [vmem:[%s2364_s7 + $0x108] sm:$0xff]  ;;  %s2465_s24 = scalar_lea.vmem [#allocation6], %s1703_s22  ;;  %s1704_s10 = sshll.u32 %s2361_s8, 5 }
  0x72   : > { %437 = vmatprep.subr.mxu0 %v310_v1  ;;  %508 = vmatprep.subr.mxu1 %v312_v2  ;;  %v296_v6 = vld [vmem:[%s2364_s7 + $0x118] sm:$0xff]  ;;  %v293_v7 = vld [vmem:[%s2364_s7 + $0x100] sm:$0xff]  ;;  %v295_v8 = vld [vmem:[%s2364_s7 + $0x110] sm:$0xff]  ;;  %s2480_s25 = scalar_lea.vmem [#allocation7], %s1704_s10   ;;  %p2931_p11 = scmp.ne.s32.totalorder %s2926_s23, 0 }
  0x73   : > { %438 = vmatpush1.msra.mxu0 %v309_v3  ;;  %509 = vmatpush1.msra.mxu1 %v311_v4  ;;  %v278_v9 = vld [vmem:[%s2364_s7 + $0x88] sm:$0xff]  ;;  %v280_v10 = vld [vmem:[%s2364_s7 + $0x98] sm:$0xff]  ;;  %v277_v11 = vld [vmem:[%s2364_s7 + $0x80] sm:$0xff]  ;;  %v329_v3 = vlaneseq  ;;  %s1714_s26 = sshll.u32 (%p2931_p11), %s2226_s16, 4  ;;  %s1748_s27 = sshll.u32 (%p2931_p11), %s2226_s16, 5 }
  0x74   : > { %439 = vmatprep.subr.mxu0 %v294_v5  ;;  %510 = vmatprep.subr.mxu1 %v296_v6  ;;  %v279_v12 = vld [vmem:[%s2364_s7 + $0x90] sm:$0xff]  ;;  %v262_v13 = vld [vmem:[%s2364_s7 + $0x8] sm:$0xff]  ;;  %v264_v14 = vld [vmem:[%s2364_s7 + $0x18] sm:$0xff]  ;;  %s1097_s12 = ssub.s32 (%p2931_p11), 77, %s1714_s26  ;;  %s2500_s28 = scalar_lea.vmem (%p2931_p11), %s2921_s3, %s1748_s27  }
  0x75   : > { %440 = vmatpush1.msra.mxu0 %v293_v7  ;;  %511 = vmatpush1.msra.mxu1 %v295_v8  ;;  %v261_v15 = vld [vmem:[%s2364_s7] sm:$0xff]  ;;  %v263_v16 = vld [vmem:[%s2364_s7 + $0x10] sm:$0xff]  ;;  %v2388_v17 = vld [vmem:[#allocation2] sm:$0x3]  ;;  %v2461_v4 = vshrl.u32 %v329_v3, 7  ;;  %p1098_p6 = scmp.lt.s32.totalorder (%p2931_p11), %s1097_s12, 16 }
  0x76   : > { %441 = vmatprep.subr.mxu0 %v278_v9  ;;  %512 = vmatprep.subr.mxu1 %v280_v10  ;;  %v314_v18 = vld [vmem:[%s2364_s7 + $0x1a8] sm:$0xff]  ;;  %v316_v19 = vld [vmem:[%s2364_s7 + $0x1b8] sm:$0xff]  ;;  %v313_v20 = vld [vmem:[%s2364_s7 + $0x1a0] sm:$0xff]  ;;  %v2184_v9 = vmov 1983009808  }
  0x77   : > { %442 = vmatpush1.msra.mxu0 %v277_v11  ;;  %513 = vmatpush1.msra.mxu1 %v279_v12  ;;  %v315_v21 = vld [vmem:[%s2364_s7 + $0x1b0] sm:$0xff]  ;;  %v298_v22 = vld [vmem:[%s2364_s7 + $0x128] sm:$0xff]  ;;  %v300_v23 = vld [vmem:[%s2364_s7 + $0x138] sm:$0xff]  ;;  %v331_v5 = vsub.s32 0, %v2461_v4  ;;  %v339_v6 = vsub.s32 2, %v2461_v4  ;;  %v343_v8 = vsub.s32 3, %v2461_v4  ;;  %v1016_v10 = vunpack.c.l.s4 %v2184_v9 }
  0x78   : > { %443 = vmatprep.subr.mxu0 %v262_v13  ;;  %514 = vmatprep.subr.mxu1 %v264_v14  ;;  %v297_v24 = vld [vmem:[%s2364_s7 + $0x120] sm:$0xff]  ;;  %v299_v25 = vld [vmem:[%s2364_s7 + $0x130] sm:$0xff]  ;;  %v282_v26 = vld [vmem:[%s2364_s7 + $0xa8] sm:$0xff] }
  0x79   : > { %444 = vmatpush1.msra.mxu0 %v261_v15  ;;  %515 = vmatpush1.msra.mxu1 %v263_v16  ;;  %v284_v27 = vld [vmem:[%s2364_s7 + $0xb8] sm:$0xff]  ;;  %v281_v28 = vld [vmem:[%s2364_s7 + $0xa0] sm:$0xff]  ;;  %v283_v29 = vld [vmem:[%s2364_s7 + $0xb0] sm:$0xff] }
  0x7a   : > { %1705 = vmatmul.mubr.msk.f32.vlgmr.msra.gmra.mxu0 %vm409_vm0, %v2388_v17  ;;  %1706 = vmatmul.mubr.msk.f32.vlgmr.msra.gmra.mxu1 %vm409_vm0, %v2388_v17  ;;  %v266_v30 = vld [vmem:[%s2364_s7 + $0x28] sm:$0xff]  ;;  %v268_v31 = vld [vmem:[%s2364_s7 + $0x38] sm:$0xff]  ;;  %v265_v32 = vld [vmem:[%s2364_s7 + $0x20] sm:$0xff] }
  0x7b   : > { %579 = vmatprep.subr.mxu0 %v314_v18  ;;  %650 = vmatprep.subr.mxu1 %v316_v19  ;;  %v267_v33 = vld [vmem:[%s2364_s7 + $0x30] sm:$0xff]  ;;  %v318_v34 = vld [vmem:[%s2364_s7 + $0x1c8] sm:$0xff]  ;;  %v320_v35 = vld [vmem:[%s2364_s7 + $0x1d8] sm:$0xff] }
  0x7c   : > { %580 = vmatpush1.msra.mxu0 %v313_v20  ;;  %651 = vmatpush1.msra.mxu1 %v315_v21  ;;  %v317_v36 = vld [vmem:[%s2364_s7 + $0x1c0] sm:$0xff]  ;;  %v319_v37 = vld [vmem:[%s2364_s7 + $0x1d0] sm:$0xff]  ;;  %v302_v38 = vld [vmem:[%s2364_s7 + $0x148] sm:$0xff] }
  0x7d   : > { %581 = vmatprep.subr.mxu0 %v298_v22  ;;  %652 = vmatprep.subr.mxu1 %v300_v23  ;;  %v304_v39 = vld [vmem:[%s2364_s7 + $0x158] sm:$0xff]  ;;  %v301_v40 = vld [vmem:[%s2364_s7 + $0x140] sm:$0xff]  ;;  %v303_v41 = vld [vmem:[%s2364_s7 + $0x150] sm:$0xff]  ;;  %v347_v22 = vsub.s32 4, %v2461_v4  ;;  %v355_v23 = vsub.s32 6, %v2461_v4 }
  0x7e   : > { %582 = vmatpush1.msra.mxu0 %v297_v24  ;;  %653 = vmatpush1.msra.mxu1 %v299_v25  ;;  %v286_v42 = vld [vmem:[%s2364_s7 + $0xc8] sm:$0xff]  ;;  %v288_v43 = vld [vmem:[%s2364_s7 + $0xd8] sm:$0xff]  ;;  %v285_v44 = vld [vmem:[%s2364_s7 + $0xc0] sm:$0xff] }
  0x7f   : > { %583 = vmatprep.subr.mxu0 %v282_v26  ;;  %654 = vmatprep.subr.mxu1 %v284_v27  ;;  %v287_v45 = vld [vmem:[%s2364_s7 + $0xd0] sm:$0xff]  ;;  %v270_v46 = vld [vmem:[%s2364_s7 + $0x48] sm:$0xff]  ;;  %v272_v47 = vld [vmem:[%s2364_s7 + $0x58] sm:$0xff] }
  0x80   : > { %584 = vmatpush1.msra.mxu0 %v281_v28  ;;  %655 = vmatpush1.msra.mxu1 %v283_v29  ;;  %v269_v48 = vld [vmem:[%s2364_s7 + $0x40] sm:$0xff]  ;;  %v271_v49 = vld [vmem:[%s2364_s7 + $0x50] sm:$0xff]  ;;  %v322_v50 = vld [vmem:[%s2364_s7 + $0x1e8] sm:$0xff] }
  0x81   : > { %585 = vmatprep.subr.mxu0 %v266_v30  ;;  %656 = vmatprep.subr.mxu1 %v268_v31  ;;  %v324_v51 = vld [vmem:[%s2364_s7 + $0x1f8] sm:$0xff]  ;;  %v321_v52 = vld [vmem:[%s2364_s7 + $0x1e0] sm:$0xff]  ;;  %v323_v53 = vld [vmem:[%s2364_s7 + $0x1f0] sm:$0xff]  ;;  %v351_v31 = vsub.s32 5, %v2461_v4 }
  0x82   : > { %586 = vmatpush1.msra.mxu0 %v265_v32  ;;  %619 = vmatprep.mubr.f32.mxu0 %v2183_v0  ;;  %v306_v54 = vld [vmem:[%s2364_s7 + $0x168] sm:$0xff]  ;;  %v308_v55 = vld [vmem:[%s2364_s7 + $0x178] sm:$0xff]  ;;  %v305_v56 = vld [vmem:[%s2364_s7 + $0x160] sm:$0xff]  ;;  %v359_v32 = vsub.s32 7, %v2461_v4 }
  0x83   : > { %657 = vmatpush1.msra.mxu1 %v267_v33  ;;  %690 = vmatprep.mubr.f32.mxu1 %v2183_v0  ;;  %v307_v57 = vld [vmem:[%s2364_s7 + $0x170] sm:$0xff]  ;;  %v290_v58 = vld [vmem:[%s2364_s7 + $0xe8] sm:$0xff]  ;;  %v292_v59 = vld [vmem:[%s2364_s7 + $0xf8] sm:$0xff] }
  0x84   : > { %1707 = vmatmul.mubr.msk.f32.vlgmr.msra.gmra.mxu0 %vm409_vm0, %v2388_v17  ;;  %1708 = vmatmul.mubr.msk.f32.vlgmr.msra.gmra.mxu1 %vm409_vm0, %v2388_v17  ;;  %v289_v60 = vld [vmem:[%s2364_s7 + $0xe0] sm:$0xff]  ;;  %v291_v61 = vld [vmem:[%s2364_s7 + $0xf0] sm:$0xff]  ;;  %v274_v62 = vld [vmem:[%s2364_s7 + $0x68] sm:$0xff] }
  0x85   : > { %721 = vmatprep.subr.mxu0 %v318_v34  ;;  %792 = vmatprep.subr.mxu1 %v320_v35  ;;  %v276_v63 = vld [vmem:[%s2364_s7 + $0x78] sm:$0xff]  ;;  %v273_v1 = vld [vmem:[%s2364_s7 + $0x60] sm:$0xff]  ;;  %v275_v2 = vld [vmem:[%s2364_s7 + $0x70] sm:$0xff] }
  0x86   : > { %722 = vmatpush1.msra.mxu0 %v317_v36  ;;  %793 = vmatpush1.msra.mxu1 %v319_v37  ;;  %v325_v7 = vld [vmem:[%s2465_s24] sm:$0xff] }
  0x87   : > { %723 = vmatprep.subr.mxu0 %v302_v38  ;;  %794 = vmatprep.subr.mxu1 %v304_v39  ;;  %v332_v11 = vrot.slane %v325_v7, %v331_v5  ;;  %v340_v12 = vrot.slane %v325_v7, %v339_v6  ;;  %v344_v14 = vrot.slane %v325_v7, %v343_v8 }
  0x88   : > { %724 = vmatpush1.msra.mxu0 %v301_v40  ;;  %795 = vmatpush1.msra.mxu1 %v303_v41  ;;  %v348_v35 = vrot.slane %v325_v7, %v347_v22  ;;  %v356_v36 = vrot.slane %v325_v7, %v355_v23  ;;  %v352_v39 = vrot.slane %v325_v7, %v351_v31 }
  0x89   : > { %725 = vmatprep.subr.mxu0 %v286_v42  ;;  %796 = vmatprep.subr.mxu1 %v288_v43  ;;  %v360_v40 = vrot.slane %v325_v7, %v359_v32 }
  0x8a   : > { %726 = vmatpush1.msra.mxu0 %v285_v44  ;;  %797 = vmatpush1.msra.mxu1 %v287_v45 }
  0x8b   : > { %727 = vmatprep.subr.mxu0 %v270_v46  ;;  %798 = vmatprep.subr.mxu1 %v272_v47 }
  0x8c   : > { %728 = vmatpush1.msra.mxu0 %v269_v48  ;;  %761 = vmatprep.mubr.f32.mxu0 %v2183_v0 }
  0x8d   : > { %799 = vmatpush1.msra.mxu1 %v271_v49  ;;  %832 = vmatprep.mubr.f32.mxu1 %v2183_v0 }
  0x8e   : > { %1709 = vmatmul.mubr.msk.f32.vlgmr.msra.gmra.mxu0 %vm409_vm0, %v2388_v17  ;;  %1710 = vmatmul.mubr.msk.f32.vlgmr.msra.gmra.mxu1 %vm409_vm0, %v2388_v17 }
  0x8f   : > { %863 = vmatprep.subr.mxu0 %v322_v50  ;;  %934 = vmatprep.subr.mxu1 %v324_v51 }
  0x90   : > { %864 = vmatpush1.msra.mxu0 %v321_v52  ;;  %935 = vmatpush1.msra.mxu1 %v323_v53  ;;  %v326_v52 = vld [vmem:[%s2465_s24 + $0x8] sm:$0xff] }
  0x91   : > { %865 = vmatprep.subr.mxu0 %v306_v54  ;;  %936 = vmatprep.subr.mxu1 %v308_v55 }
  0x92   : > { %866 = vmatpush1.msra.mxu0 %v305_v56  ;;  %937 = vmatpush1.msra.mxu1 %v307_v57  ;;  %v364_v57 = vrot.slane %v326_v52, %v331_v5 }
  0x93   : > { %867 = vmatprep.subr.mxu0 %v290_v58  ;;  %938 = vmatprep.subr.mxu1 %v292_v59  ;;  %v372_v58 = vrot.slane %v326_v52, %v339_v6 }
  0x94   : > { %868 = vmatpush1.msra.mxu0 %v289_v60  ;;  %939 = vmatpush1.msra.mxu1 %v291_v61 }
  0x95   : > { %869 = vmatprep.subr.mxu0 %v274_v62  ;;  %940 = vmatprep.subr.mxu1 %v276_v63  ;;  %v376_v62 = vrot.slane %v326_v52, %v343_v8 }
  0x96   : > { %870 = vmatpush1.msra.mxu0 %v273_v1  ;;  %903 = vmatprep.mubr.f32.mxu0 %v2183_v0 }
  0x97   : > { %941 = vmatpush1.msra.mxu1 %v275_v2  ;;  %974 = vmatprep.mubr.f32.mxu1 %v2183_v0  ;;  %v335_v0 = vsub.s32 1, %v2461_v4 }
  0x98   : > { %1711 = vmatmul.mubr.msk.f32.vlgmr.msra.gmra.mxu0 %vm409_vm0, %v2388_v17  ;;  %1712 = vmatmul.mubr.msk.f32.vlgmr.msra.gmra.mxu1 %vm409_vm0, %v2388_v17  ;;  %v1017_v17 = vunpack.c.0.s8 %v1016_v10 }
  0x99   : > { %v336_v13 = vrot.slane %v325_v7, %v335_v0  ;;  %v368_v61 = vrot.slane %v326_v52, %v335_v0  ;;  %v388_v0 = vrot.slane %v326_v52, %v355_v23 }
  0x9a   : > { %v2473_v28 = vsub.s32 %v1017_v17, %v2461_v4 }
 0x13a   : > { %v479_v15 = vpop.f32.mrf.mxu0  ;;  %v550_v16 = vpop.f32.mrf.mxu1 }
 0x13b   : > { %v480_v18 = vadd.f32 %v479_v15, %v332_v11  ;;  %v551_v19 = vadd.f32 %v550_v16, %v340_v12  ;;  %v380_v16 = vrot.slane %v326_v52, %v347_v22 }
 0x13c   : > { %v481_v20 = vpop.f32.mrf.mxu0  ;;  %v552_v21 = vpop.f32.mrf.mxu1 }
 0x13d   : > { %v981_v24 = vmax.f32 %v480_v18, 0.0  ;;  %v983_v25 = vmax.f32 %v551_v19, 0.0  ;;  %v482_v26 = vadd.f32 %v481_v20, %v336_v13  ;;  %v553_v27 = vadd.f32 %v552_v21, %v344_v14 }
 0x13e   : > { %v384_v18 = vrot.slane %v326_v52, %v351_v31  ;;  %v392_v19 = vrot.slane %v326_v52, %v359_v32 }
 0x13f   : > { %v982_v29 = vmax.f32 %v482_v26, 0.0  ;;  %v984_v30 = vmax.f32 %v553_v27, 0.0 }
 0x141   : > { %v1013_v33 = vcombine.low %v981_v24, %v982_v29  ;;  %v1014_v34 = vcombine.low %v983_v25, %v984_v30 }
 0x143   : > { %v1021_v37 = vrot.slane %v1013_v33, %v2473_v28  ;;  %v1028_v38 = vrot.slane %v1014_v34, %v2473_v28 }
 0x144   : > { %v621_v41 = vpop.f32.mrf.mxu0  ;;  %v692_v42 = vpop.f32.mrf.mxu1 }
 0x145   : > { %v1029_v43 = vcombine.low %v1021_v37, %v1028_v38  ;;  %v622_v44 = vadd.f32 %v621_v41, %v348_v35  ;;  %v693_v45 = vadd.f32 %v692_v42, %v356_v36 }
 0x146   : > { %v623_v46 = vpop.f32.mrf.mxu0  ;;  %v694_v47 = vpop.f32.mrf.mxu1 }
 0x147   : > { %1085 = vst [vmem:[%s2480_s25] sm:$0xff] %v1029_v43  ;;  %v985_v48 = vmax.f32 %v622_v44, 0.0  ;;  %v987_v49 = vmax.f32 %v693_v45, 0.0  ;;  %v624_v50 = vadd.f32 %v623_v46, %v352_v39  ;;  %v695_v51 = vadd.f32 %v694_v47, %v360_v40 }
 0x149   : > { %v986_v53 = vmax.f32 %v624_v50, 0.0  ;;  %v988_v54 = vmax.f32 %v695_v51, 0.0 }
 0x14b   : > { %v1030_v55 = vcombine.low %v985_v48, %v986_v53  ;;  %v1031_v56 = vcombine.low %v987_v49, %v988_v54 }
 0x14d   : > { %v1038_v59 = vrot.slane %v1030_v55, %v2473_v28  ;;  %v1045_v60 = vrot.slane %v1031_v56, %v2473_v28 }
 0x14e   : > { %v763_v63 = vpop.f32.mrf.mxu0  ;;  %v834_v1 = vpop.f32.mrf.mxu1 }
 0x14f   : > { %v1046_v2 = vcombine.low %v1038_v59, %v1045_v60  ;;  %v764_v3 = vadd.f32 %v763_v63, %v364_v57  ;;  %v835_v4 = vadd.f32 %v834_v1, %v372_v58 }
 0x150   : > { %v765_v7 = vpop.f32.mrf.mxu0  ;;  %v836_v9 = vpop.f32.mrf.mxu1 }
 0x151   : > { %1086 = vst [vmem:[%s2480_s25 + $0x8] sm:$0xff] %v1046_v2  ;;  %v989_v10 = vmax.f32 %v764_v3, 0.0  ;;  %v991_v11 = vmax.f32 %v835_v4, 0.0  ;;  %v766_v12 = vadd.f32 %v765_v7, %v368_v61  ;;  %v837_v13 = vadd.f32 %v836_v9, %v376_v62 }
 0x153   : > { %v990_v5 = vmax.f32 %v766_v12, 0.0  ;;  %v992_v6 = vmax.f32 %v837_v13, 0.0 }
 0x155   : > { %v1047_v14 = vcombine.low %v989_v10, %v990_v5  ;;  %v1048_v15 = vcombine.low %v991_v11, %v992_v6 }
 0x157   : > { %v1055_v8 = vrot.slane %v1047_v14, %v2473_v28  ;;  %v1062_v17 = vrot.slane %v1048_v15, %v2473_v28 }
 0x158   : > { %v905_v20 = vpop.f32.mrf.mxu0  ;;  %v976_v21 = vpop.f32.mrf.mxu1 }
 0x159   : > { %v1063_v24 = vcombine.low %v1055_v8, %v1062_v17  ;;  %v906_v25 = vadd.f32 %v905_v20, %v380_v16  ;;  %v977_v26 = vadd.f32 %v976_v21, %v388_v0 }
 0x15a   : > { %v907_v27 = vpop.f32.mrf.mxu0  ;;  %v978_v29 = vpop.f32.mrf.mxu1 }
 0x15b   : > { %1087 = vst [vmem:[%s2480_s25 + $0x10] sm:$0xff] %v1063_v24  ;;  %v908_v30 = vadd.f32 %v907_v27, %v384_v18  ;;  %v979_v33 = vadd.f32 %v978_v29, %v392_v19  ;;  %v993_v34 = vmax.f32 %v906_v25, 0.0  ;;  %v995_v22 = vmax.f32 %v977_v26, 0.0 }
 0x15d   : > { %v994_v23 = vmax.f32 %v908_v30, 0.0  ;;  %v996_v35 = vmax.f32 %v979_v33, 0.0 }
 0x15f   : > { %v1064_v36 = vcombine.low %v993_v34, %v994_v23  ;;  %v1065_v37 = vcombine.low %v995_v22, %v996_v35 }
 0x161   : > { %v1072_v31 = vrot.slane %v1064_v36, %v2473_v28  ;;  %v1079_v32 = vrot.slane %v1065_v37, %v2473_v28  ;;  %1095 = sbr.rel (!%p2931_p11) target bundleno = 504 (0x1f8), region = 48 }
 0x163   : > { %v1080_v38 = vcombine.low %v1072_v31, %v1079_v32 }
 0x165   : > { %1088 = vst [vmem:[%s2480_s25 + $0x18] sm:$0xff] %v1080_v38 }
 0x166   : > { %s2951_s12 = smov (!%p1098_p6, %s1097_s12), 16 }
 0x167   : > { %s1715_s29 = sshll.u32 %s2951_s12, 5  ;;  %s2502_s30 = sshll.u32 %s2951_s12, 1 }
 0x168   : > { %p1719_p7 = scmp.eq.s32.totalorder %s1715_s29, 0 }
 0x169   : > { %p1108_p9 = scmp.lt.u32.totalorder (!%p1719_p7), %s2502_s30, 8 }
 0x16a   : > { %1107 = sbr.rel (%p1719_p7) target bundleno = 504 (0x1f8), region = 52 }
 0x16f   : > { %1111 = sbr.rel (%p1108_p9) target bundleno = 495 (0x1ef), region = 56  ;;  %s2506_s23 = sand.u32 (!%p1108_p9), 7, %s2502_s30  }
 0x170   : > { %p1128_p8 = scmp.eq.s32.totalorder (!%p1108_p9), %s2506_s23, 0  ;;  %p1720_p12 = scmp.ne.s32.totalorder (!%p1108_p9), %s2506_s23, 0 }
 0x174   : > { %1131 = sbr.rel (%p1720_p12) target bundleno = 431 (0x1af), region = 71  ;;  %s1132_s16 = sshrl.u32 (!%p1720_p12), %s2502_s30, 3 }
 0x175   : > { %s2513_s15 = sshrl.u32 (!%p1720_p12), %s1132_s16, 6 }
 0x176   : > { %p1721_p13 = scmp.le.s32.totalorder (!%p1720_p12), %s2513_s15, 0 }
 0x179   : > { %1590 = sbr.rel (%p1721_p13) target bundleno = 415 (0x19f), region = 166  ;;  %s2932_s4 = smov (!%p1721_p13), %s2500_s28 }
 0x17a   : > { %s2933_s5 = smov (!%p1721_p13), %s2480_s25  ;;  %s2522_s6 = smov (!%p1721_p13), 0  }
 0x17b   : > { %s2524_s11 = smov (!%p1721_p13), 0  }
 0x17e LB: >> { %v1145_v28 = vld [vmem:[%s2120_s5] sm:$0xff]  ;;  %v1147_v39 = vld [vmem:[%s2120_s5 + $0x8] sm:$0xff]  ;;  %v1149_v40 = vld [vmem:[%s2120_s5 + $0x10] sm:$0xff]  ;;  %s1273_s8 = sadd.s32 1, %s2124_s6  ;;  %s1139_s11 = sadd.s32 1, %s2128_s11   ;;  %s2128_s11 = sphi %s2524_s11, %s1139_s11   ;;  %s2124_s6 = sphi %s2522_s6, %s2936_s6   ;;  %s2120_s5 = sphi %s2933_s5, %s2935_s5   ;;  %s2116_s4 = sphi %s2932_s4, %s2934_s4  }
 0x17f   : >> { %1146 = vst [vmem:[%s2116_s4] sm:$0xff] %v1145_v28  ;;  %1148 = vst [vmem:[%s2116_s4 + $0x8] sm:$0xff] %v1147_v39  ;;  %v1151_v41 = vld [vmem:[%s2120_s5 + $0x18] sm:$0xff]  ;;  %v1153_v42 = vld [vmem:[%s2120_s5 + $0x20] sm:$0xff]  ;;  %p1274_p2 = scmp.ge.s32.totalorder %s1273_s8, %s2513_s15  ;;  %p1138_p5 = scmp.ge.s32.totalorder %s1139_s11, %s2513_s15 }
 0x180   : >> { %1150 = vst [vmem:[%s2116_s4 + $0x10] sm:$0xff] %v1149_v40  ;;  %v1155_v43 = vld [vmem:[%s2120_s5 + $0x28] sm:$0xff]  ;;  %1152 = vst [vmem:[%s2116_s4 + $0x18] sm:$0xff] %v1151_v41  ;;  %v1157_v44 = vld [vmem:[%s2120_s5 + $0x30] sm:$0xff] }
 0x181   : >> { %1154 = vst [vmem:[%s2116_s4 + $0x20] sm:$0xff] %v1153_v42  ;;  %1156 = vst [vmem:[%s2116_s4 + $0x28] sm:$0xff] %v1155_v43  ;;  %v1159_v45 = vld [vmem:[%s2120_s5 + $0x38] sm:$0xff]  ;;  %v1161_v46 = vld [vmem:[%s2120_s5 + $0x40] sm:$0xff]  ;;  %s2953_s8 = smov (%p1274_p2, %s1273_s8), 0 }
 0x182   : >> { %1158 = vst [vmem:[%s2116_s4 + $0x30] sm:$0xff] %v1157_v44  ;;  %1160 = vst [vmem:[%s2116_s4 + $0x38] sm:$0xff] %v1159_v45  ;;  %v1163_v47 = vld [vmem:[%s2120_s5 + $0x48] sm:$0xff]  ;;  %v1165_v48 = vld [vmem:[%s2120_s5 + $0x50] sm:$0xff]  ;;  %s1722_s21 = sshll.u32 %s2953_s8, 9  ;;  %s2936_s6 = smov %s2953_s8 }
 0x183   : >> { %1162 = vst [vmem:[%s2116_s4 + $0x40] sm:$0xff] %v1161_v46  ;;  %v1167_v49 = vld [vmem:[%s2120_s5 + $0x58] sm:$0xff]  ;;  %1164 = vst [vmem:[%s2116_s4 + $0x48] sm:$0xff] %v1163_v47  ;;  %v1169_v50 = vld [vmem:[%s2120_s5 + $0x60] sm:$0xff]  ;;  %s2580_s9 = scalar_lea.vmem %s2480_s25, %s1722_s21 [#allocation7]   ;;  %s2583_s7 = scalar_lea.vmem %s2500_s28, %s1722_s21  }
 0x184   : >> { %1166 = vst [vmem:[%s2116_s4 + $0x50] sm:$0xff] %v1165_v48  ;;  %1168 = vst [vmem:[%s2116_s4 + $0x58] sm:$0xff] %v1167_v49  ;;  %v1171_v51 = vld [vmem:[%s2120_s5 + $0x68] sm:$0xff]  ;;  %v1173_v52 = vld [vmem:[%s2120_s5 + $0x70] sm:$0xff] }
 0x185   : >> { %1170 = vst [vmem:[%s2116_s4 + $0x60] sm:$0xff] %v1169_v50  ;;  %1172 = vst [vmem:[%s2116_s4 + $0x68] sm:$0xff] %v1171_v51  ;;  %v1175_v53 = vld [vmem:[%s2120_s5 + $0x78] sm:$0xff]  ;;  %v1177_v54 = vld [vmem:[%s2120_s5 + $0x80] sm:$0xff] }
 0x186   : >> { %1174 = vst [vmem:[%s2116_s4 + $0x70] sm:$0xff] %v1173_v52  ;;  %v1179_v55 = vld [vmem:[%s2120_s5 + $0x88] sm:$0xff]  ;;  %1176 = vst [vmem:[%s2116_s4 + $0x78] sm:$0xff] %v1175_v53  ;;  %v1181_v56 = vld [vmem:[%s2120_s5 + $0x90] sm:$0xff] }
 0x187   : >> { %1178 = vst [vmem:[%s2116_s4 + $0x80] sm:$0xff] %v1177_v54  ;;  %1180 = vst [vmem:[%s2116_s4 + $0x88] sm:$0xff] %v1179_v55  ;;  %v1183_v57 = vld [vmem:[%s2120_s5 + $0x98] sm:$0xff]  ;;  %v1185_v58 = vld [vmem:[%s2120_s5 + $0xa0] sm:$0xff] }
 0x188   : >> { %1182 = vst [vmem:[%s2116_s4 + $0x90] sm:$0xff] %v1181_v56  ;;  %1184 = vst [vmem:[%s2116_s4 + $0x98] sm:$0xff] %v1183_v57  ;;  %v1187_v59 = vld [vmem:[%s2120_s5 + $0xa8] sm:$0xff]  ;;  %v1189_v60 = vld [vmem:[%s2120_s5 + $0xb0] sm:$0xff] }
 0x189   : >> { %1186 = vst [vmem:[%s2116_s4 + $0xa0] sm:$0xff] %v1185_v58  ;;  %v1191_v61 = vld [vmem:[%s2120_s5 + $0xb8] sm:$0xff]  ;;  %1188 = vst [vmem:[%s2116_s4 + $0xa8] sm:$0xff] %v1187_v59  ;;  %v1193_v62 = vld [vmem:[%s2120_s5 + $0xc0] sm:$0xff] }
 0x18a   : >> { %1190 = vst [vmem:[%s2116_s4 + $0xb0] sm:$0xff] %v1189_v60  ;;  %1192 = vst [vmem:[%s2116_s4 + $0xb8] sm:$0xff] %v1191_v61  ;;  %v1195_v63 = vld [vmem:[%s2120_s5 + $0xc8] sm:$0xff]  ;;  %v1197_v1 = vld [vmem:[%s2120_s5 + $0xd0] sm:$0xff] }
 0x18b   : >> { %1194 = vst [vmem:[%s2116_s4 + $0xc0] sm:$0xff] %v1193_v62  ;;  %1196 = vst [vmem:[%s2116_s4 + $0xc8] sm:$0xff] %v1195_v63  ;;  %v1199_v2 = vld [vmem:[%s2120_s5 + $0xd8] sm:$0xff]  ;;  %v1201_v3 = vld [vmem:[%s2120_s5 + $0xe0] sm:$0xff] }
 0x18c   : >> { %1198 = vst [vmem:[%s2116_s4 + $0xd0] sm:$0xff] %v1197_v1  ;;  %v1203_v4 = vld [vmem:[%s2120_s5 + $0xe8] sm:$0xff]  ;;  %1200 = vst [vmem:[%s2116_s4 + $0xd8] sm:$0xff] %v1199_v2  ;;  %v1205_v7 = vld [vmem:[%s2120_s5 + $0xf0] sm:$0xff] }
 0x18d   : >> { %1202 = vst [vmem:[%s2116_s4 + $0xe0] sm:$0xff] %v1201_v3  ;;  %1204 = vst [vmem:[%s2116_s4 + $0xe8] sm:$0xff] %v1203_v4  ;;  %v1207_v9 = vld [vmem:[%s2120_s5 + $0xf8] sm:$0xff]  ;;  %v1209_v10 = vld [vmem:[%s2120_s5 + $0x100] sm:$0xff] }
 0x18e   : >> { %1206 = vst [vmem:[%s2116_s4 + $0xf0] sm:$0xff] %v1205_v7  ;;  %1208 = vst [vmem:[%s2116_s4 + $0xf8] sm:$0xff] %v1207_v9  ;;  %v1211_v11 = vld [vmem:[%s2120_s5 + $0x108] sm:$0xff]  ;;  %v1213_v12 = vld [vmem:[%s2120_s5 + $0x110] sm:$0xff] }
 0x18f   : >> { %1210 = vst [vmem:[%s2116_s4 + $0x100] sm:$0xff] %v1209_v10  ;;  %v1215_v13 = vld [vmem:[%s2120_s5 + $0x118] sm:$0xff]  ;;  %1212 = vst [vmem:[%s2116_s4 + $0x108] sm:$0xff] %v1211_v11  ;;  %v1217_v5 = vld [vmem:[%s2120_s5 + $0x120] sm:$0xff] }
 0x190   : >> { %1214 = vst [vmem:[%s2116_s4 + $0x110] sm:$0xff] %v1213_v12  ;;  %1216 = vst [vmem:[%s2116_s4 + $0x118] sm:$0xff] %v1215_v13  ;;  %v1219_v6 = vld [vmem:[%s2120_s5 + $0x128] sm:$0xff]  ;;  %v1221_v14 = vld [vmem:[%s2120_s5 + $0x130] sm:$0xff] }
 0x191   : >> { %1218 = vst [vmem:[%s2116_s4 + $0x120] sm:$0xff] %v1217_v5  ;;  %1220 = vst [vmem:[%s2116_s4 + $0x128] sm:$0xff] %v1219_v6  ;;  %v1223_v15 = vld [vmem:[%s2120_s5 + $0x138] sm:$0xff]  ;;  %v1225_v16 = vld [vmem:[%s2120_s5 + $0x140] sm:$0xff] }
 0x192   : >> { %1222 = vst [vmem:[%s2116_s4 + $0x130] sm:$0xff] %v1221_v14  ;;  %v1227_v0 = vld [vmem:[%s2120_s5 + $0x148] sm:$0xff]  ;;  %1224 = vst [vmem:[%s2116_s4 + $0x138] sm:$0xff] %v1223_v15  ;;  %v1229_v8 = vld [vmem:[%s2120_s5 + $0x150] sm:$0xff] }
 0x193   : >> { %1226 = vst [vmem:[%s2116_s4 + $0x140] sm:$0xff] %v1225_v16  ;;  %1228 = vst [vmem:[%s2116_s4 + $0x148] sm:$0xff] %v1227_v0  ;;  %v1231_v17 = vld [vmem:[%s2120_s5 + $0x158] sm:$0xff]  ;;  %v1233_v18 = vld [vmem:[%s2120_s5 + $0x160] sm:$0xff] }
 0x194   : >> { %1230 = vst [vmem:[%s2116_s4 + $0x150] sm:$0xff] %v1229_v8  ;;  %1232 = vst [vmem:[%s2116_s4 + $0x158] sm:$0xff] %v1231_v17  ;;  %v1235_v19 = vld [vmem:[%s2120_s5 + $0x168] sm:$0xff]  ;;  %v1237_v20 = vld [vmem:[%s2120_s5 + $0x170] sm:$0xff] }
 0x195   : >> { %1234 = vst [vmem:[%s2116_s4 + $0x160] sm:$0xff] %v1233_v18  ;;  %v1239_v21 = vld [vmem:[%s2120_s5 + $0x178] sm:$0xff]  ;;  %1236 = vst [vmem:[%s2116_s4 + $0x168] sm:$0xff] %v1235_v19  ;;  %v1241_v24 = vld [vmem:[%s2120_s5 + $0x180] sm:$0xff] }
 0x196   : >> { %1238 = vst [vmem:[%s2116_s4 + $0x170] sm:$0xff] %v1237_v20  ;;  %1240 = vst [vmem:[%s2116_s4 + $0x178] sm:$0xff] %v1239_v21  ;;  %v1243_v25 = vld [vmem:[%s2120_s5 + $0x188] sm:$0xff]  ;;  %v1245_v26 = vld [vmem:[%s2120_s5 + $0x190] sm:$0xff] }
 0x197   : >> { %1242 = vst [vmem:[%s2116_s4 + $0x180] sm:$0xff] %v1241_v24  ;;  %1244 = vst [vmem:[%s2116_s4 + $0x188] sm:$0xff] %v1243_v25  ;;  %v1247_v27 = vld [vmem:[%s2120_s5 + $0x198] sm:$0xff]  ;;  %v1249_v29 = vld [vmem:[%s2120_s5 + $0x1a0] sm:$0xff] }
 0x198   : >> { %1246 = vst [vmem:[%s2116_s4 + $0x190] sm:$0xff] %v1245_v26  ;;  %v1251_v30 = vld [vmem:[%s2120_s5 + $0x1a8] sm:$0xff]  ;;  %1248 = vst [vmem:[%s2116_s4 + $0x198] sm:$0xff] %v1247_v27  ;;  %v1253_v33 = vld [vmem:[%s2120_s5 + $0x1b0] sm:$0xff] }
 0x199   : >> { %1250 = vst [vmem:[%s2116_s4 + $0x1a0] sm:$0xff] %v1249_v29  ;;  %1252 = vst [vmem:[%s2116_s4 + $0x1a8] sm:$0xff] %v1251_v30  ;;  %v1255_v34 = vld [vmem:[%s2120_s5 + $0x1b8] sm:$0xff]  ;;  %v1257_v22 = vld [vmem:[%s2120_s5 + $0x1c0] sm:$0xff] }
 0x19a   : >> { %1254 = vst [vmem:[%s2116_s4 + $0x1b0] sm:$0xff] %v1253_v33  ;;  %1256 = vst [vmem:[%s2116_s4 + $0x1b8] sm:$0xff] %v1255_v34  ;;  %v1259_v23 = vld [vmem:[%s2120_s5 + $0x1c8] sm:$0xff]  ;;  %v1261_v35 = vld [vmem:[%s2120_s5 + $0x1d0] sm:$0xff]  ;;  %1141 = sbr.rel (!%p1138_p5) target bundleno = 382 (0x17e), region = 172 }
 0x19b   : >> { %1258 = vst [vmem:[%s2116_s4 + $0x1c0] sm:$0xff] %v1257_v22  ;;  %v1263_v36 = vld [vmem:[%s2120_s5 + $0x1d8] sm:$0xff]  ;;  %1260 = vst [vmem:[%s2116_s4 + $0x1c8] sm:$0xff] %v1259_v23  ;;  %v1265_v37 = vld [vmem:[%s2120_s5 + $0x1e0] sm:$0xff] }
 0x19c   : >> { %1262 = vst [vmem:[%s2116_s4 + $0x1d0] sm:$0xff] %v1261_v35  ;;  %1264 = vst [vmem:[%s2116_s4 + $0x1d8] sm:$0xff] %v1263_v36  ;;  %v1267_v31 = vld [vmem:[%s2120_s5 + $0x1e8] sm:$0xff]  ;;  %v1269_v32 = vld [vmem:[%s2120_s5 + $0x1f0] sm:$0xff] }
 0x19d   : >> { %1266 = vst [vmem:[%s2116_s4 + $0x1e0] sm:$0xff] %v1265_v37  ;;  %1268 = vst [vmem:[%s2116_s4 + $0x1e8] sm:$0xff] %v1267_v31  ;;  %v1271_v38 = vld [vmem:[%s2120_s5 + $0x1f8] sm:$0xff]  ;;  %s2935_s5 = smov %s2580_s9 }
 0x19e   : >> { %1270 = vst [vmem:[%s2116_s4 + $0x1f0] sm:$0xff] %v1269_v32  ;;  %1272 = vst [vmem:[%s2116_s4 + $0x1f8] sm:$0xff] %v1271_v38  ;;  %s2934_s4 = smov %s2583_s7 }
 0x19f PF: > { %s2689_s22 = sand.u32 63, %s1132_s16   ;;  %s1749_s24 = sshll.u32 %s2513_s15, 13 }
 0x1a0   : > { %s1284_s10 = sshra.s32 %s1749_s24, 4  ;;  %p1727_p10 = scmp.le.s32.totalorder %s2689_s22, 0 }
 0x1a1   : > { %s1285_s26 = scalar_lea.vmem %s2480_s25, %s1284_s10 [#allocation7]   ;;  %s1288_s27 = scalar_lea.vmem %s2500_s28, %s1284_s10  }
 0x1a2   : > { %1604 = sbr.rel (%p1727_p10) target bundleno = 431 (0x1af), region = 177  ;;  %s2130_s12 = smov (!%p1727_p10), %s1288_s27  }
 0x1a3   : > { %s2134_s18 = smov (!%p1727_p10), %s1285_s26   ;;  %s2138_s19 = smov (!%p1727_p10), 0  }
 0x1a4   : > { %s2142_s29 = smov (!%p1727_p10), 0  }
 0x1a7 LB: >> { %v1300_v28 = vld [vmem:[%s2136_s18] sm:$0xff]  ;;  %s1302_s16 = sadd.s32 1, %s2140_s19  ;;  %s1294_s29 = sadd.s32 1, %s2144_s29   ;;  %s2144_s29 = sphi %s2142_s29, %s1294_s29   ;;  %s2140_s19 = sphi %s2138_s19, %s2139_s19   ;;  %s2136_s18 = sphi %s2134_s18, %s1307_s18   ;;  %s2132_s12 = sphi %s2130_s12, %s1308_s12  }
 0x1a8   : >> { %1301 = vst [vmem:[%s2132_s12] sm:$0xff] %v1300_v28  ;;  %p1303_p0 = scmp.ge.s32.totalorder %s1302_s16, %s2689_s22  ;;  %p1293_p3 = scmp.ge.s32.totalorder %s1294_s29, %s2689_s22 }
 0x1aa   : >> { %s2955_s16 = smov (%p1303_p0, %s1302_s16), 0  ;;  %1296 = sbr.rel (!%p1293_p3) target bundleno = 423 (0x1a7), region = 183 }
 0x1ab   : >> { %s1728_s15 = sshll.u32 %s2955_s16, 3  ;;  %s2139_s19 = smov %s2955_s16  }
 0x1ac   : >> { %s1307_s18 = scalar_lea.vmem %s1285_s26, %s1728_s15 [#allocation7]   ;;  %s1308_s12 = scalar_lea.vmem %s1288_s27, %s1728_s15  }
 0x1af PF: > { %1311 = sbr.rel (%p1128_p8) target bundleno = 495 (0x1ef), region = 89  ;;  %s2701_s4 = ssub.s32 (!%p1128_p8), %s2502_s30, %s2506_s23 }
 0x1b0   : > { %s1317_s5 = sshrl.u32 (!%p1128_p8), %s2502_s30, 3  ;;  %s1314_s6 = scalar_lea.vmem (!%p1128_p8), %s2480_s25, %s2701_s4 [#allocation7] }
 0x1b1   : > { %s1316_s11 = scalar_lea.vmem (!%p1128_p8), %s2500_s28, %s2701_s4  ;;  %s2710_s8 = sshrl.u32 (!%p1128_p8), %s1317_s5, 6 }
 0x1b2   : > { %p1730_p1 = scmp.le.s32.totalorder (!%p1128_p8), %s2710_s8, 0 }
 0x1b4   : > { %1618 = sbr.rel (%p1730_p1) target bundleno = 474 (0x1da), region = 188  ;;  %s2937_s21 = smov (!%p1730_p1), %s2500_s28 }
 0x1b5   : > { %s2938_s9 = smov (!%p1730_p1), %s2480_s25  ;;  %s2719_s7 = smov (!%p1730_p1), 0  }
 0x1b6   : > { %s2721_s22 = smov (!%p1730_p1), 0  }
 0x1b9 LB: >> { %v1330_v39 = vld [vmem:[%s2152_s9] sm:$0xff]  ;;  %v1332_v40 = vld [vmem:[%s2152_s9 + $0x8] sm:$0xff]  ;;  %v1334_v41 = vld [vmem:[%s2152_s9 + $0x10] sm:$0xff]  ;;  %s1458_s24 = sadd.s32 1, %s2156_s7  ;;  %s1324_s22 = sadd.s32 1, %s2160_s22   ;;  %s2160_s22 = sphi %s2721_s22, %s1324_s22   ;;  %s2156_s7 = sphi %s2719_s7, %s2941_s7   ;;  %s2152_s9 = sphi %s2938_s9, %s2940_s9   ;;  %s2148_s21 = sphi %s2937_s21, %s2939_s21  }
 0x1ba   : >> { %1331 = vst [vmem:[%s2148_s21] sm:$0xff] %v1330_v39  ;;  %1333 = vst [vmem:[%s2148_s21 + $0x8] sm:$0xff] %v1332_v40  ;;  %v1336_v42 = vld [vmem:[%s2152_s9 + $0x18] sm:$0xff]  ;;  %v1338_v43 = vld [vmem:[%s2152_s9 + $0x20] sm:$0xff]  ;;  %p1459_p4 = scmp.ge.s32.totalorder %s1458_s24, %s2710_s8  ;;  %p1323_p11 = scmp.ge.s32.totalorder %s1324_s22, %s2710_s8 }
 0x1bb   : >> { %1335 = vst [vmem:[%s2148_s21 + $0x10] sm:$0xff] %v1334_v41  ;;  %v1340_v44 = vld [vmem:[%s2152_s9 + $0x28] sm:$0xff]  ;;  %1337 = vst [vmem:[%s2148_s21 + $0x18] sm:$0xff] %v1336_v42  ;;  %v1342_v45 = vld [vmem:[%s2152_s9 + $0x30] sm:$0xff] }
 0x1bc   : >> { %1339 = vst [vmem:[%s2148_s21 + $0x20] sm:$0xff] %v1338_v43  ;;  %1341 = vst [vmem:[%s2148_s21 + $0x28] sm:$0xff] %v1340_v44  ;;  %v1344_v46 = vld [vmem:[%s2152_s9 + $0x38] sm:$0xff]  ;;  %v1346_v47 = vld [vmem:[%s2152_s9 + $0x40] sm:$0xff]  ;;  %s2957_s24 = smov (%p1459_p4, %s1458_s24), 0 }
 0x1bd   : >> { %1343 = vst [vmem:[%s2148_s21 + $0x30] sm:$0xff] %v1342_v45  ;;  %1345 = vst [vmem:[%s2148_s21 + $0x38] sm:$0xff] %v1344_v46  ;;  %v1348_v48 = vld [vmem:[%s2152_s9 + $0x48] sm:$0xff]  ;;  %v1350_v49 = vld [vmem:[%s2152_s9 + $0x50] sm:$0xff]  ;;  %s1731_s10 = sshll.u32 %s2957_s24, 9  ;;  %s2941_s7 = smov %s2957_s24 }
 0x1be   : >> { %1347 = vst [vmem:[%s2148_s21 + $0x40] sm:$0xff] %v1346_v47  ;;  %v1352_v50 = vld [vmem:[%s2152_s9 + $0x58] sm:$0xff]  ;;  %1349 = vst [vmem:[%s2148_s21 + $0x48] sm:$0xff] %v1348_v48  ;;  %v1354_v51 = vld [vmem:[%s2152_s9 + $0x60] sm:$0xff]  ;;  %s2777_s26 = scalar_lea.vmem %s2480_s25, %s1731_s10 [#allocation7]   ;;  %s2780_s27 = scalar_lea.vmem %s2500_s28, %s1731_s10  }
 0x1bf   : >> { %1351 = vst [vmem:[%s2148_s21 + $0x50] sm:$0xff] %v1350_v49  ;;  %1353 = vst [vmem:[%s2148_s21 + $0x58] sm:$0xff] %v1352_v50  ;;  %v1356_v52 = vld [vmem:[%s2152_s9 + $0x68] sm:$0xff]  ;;  %v1358_v53 = vld [vmem:[%s2152_s9 + $0x70] sm:$0xff] }
 0x1c0   : >> { %1355 = vst [vmem:[%s2148_s21 + $0x60] sm:$0xff] %v1354_v51  ;;  %1357 = vst [vmem:[%s2148_s21 + $0x68] sm:$0xff] %v1356_v52  ;;  %v1360_v54 = vld [vmem:[%s2152_s9 + $0x78] sm:$0xff]  ;;  %v1362_v55 = vld [vmem:[%s2152_s9 + $0x80] sm:$0xff] }
 0x1c1   : >> { %1359 = vst [vmem:[%s2148_s21 + $0x70] sm:$0xff] %v1358_v53  ;;  %v1364_v56 = vld [vmem:[%s2152_s9 + $0x88] sm:$0xff]  ;;  %1361 = vst [vmem:[%s2148_s21 + $0x78] sm:$0xff] %v1360_v54  ;;  %v1366_v57 = vld [vmem:[%s2152_s9 + $0x90] sm:$0xff] }
 0x1c2   : >> { %1363 = vst [vmem:[%s2148_s21 + $0x80] sm:$0xff] %v1362_v55  ;;  %1365 = vst [vmem:[%s2148_s21 + $0x88] sm:$0xff] %v1364_v56  ;;  %v1368_v58 = vld [vmem:[%s2152_s9 + $0x98] sm:$0xff]  ;;  %v1370_v59 = vld [vmem:[%s2152_s9 + $0xa0] sm:$0xff] }
 0x1c3   : >> { %1367 = vst [vmem:[%s2148_s21 + $0x90] sm:$0xff] %v1366_v57  ;;  %1369 = vst [vmem:[%s2148_s21 + $0x98] sm:$0xff] %v1368_v58  ;;  %v1372_v60 = vld [vmem:[%s2152_s9 + $0xa8] sm:$0xff]  ;;  %v1374_v61 = vld [vmem:[%s2152_s9 + $0xb0] sm:$0xff] }
 0x1c4   : >> { %1371 = vst [vmem:[%s2148_s21 + $0xa0] sm:$0xff] %v1370_v59  ;;  %v1376_v62 = vld [vmem:[%s2152_s9 + $0xb8] sm:$0xff]  ;;  %1373 = vst [vmem:[%s2148_s21 + $0xa8] sm:$0xff] %v1372_v60  ;;  %v1378_v63 = vld [vmem:[%s2152_s9 + $0xc0] sm:$0xff] }
 0x1c5   : >> { %1375 = vst [vmem:[%s2148_s21 + $0xb0] sm:$0xff] %v1374_v61  ;;  %1377 = vst [vmem:[%s2148_s21 + $0xb8] sm:$0xff] %v1376_v62  ;;  %v1380_v1 = vld [vmem:[%s2152_s9 + $0xc8] sm:$0xff]  ;;  %v1382_v2 = vld [vmem:[%s2152_s9 + $0xd0] sm:$0xff] }
 0x1c6   : >> { %1379 = vst [vmem:[%s2148_s21 + $0xc0] sm:$0xff] %v1378_v63  ;;  %1381 = vst [vmem:[%s2148_s21 + $0xc8] sm:$0xff] %v1380_v1  ;;  %v1384_v3 = vld [vmem:[%s2152_s9 + $0xd8] sm:$0xff]  ;;  %v1386_v4 = vld [vmem:[%s2152_s9 + $0xe0] sm:$0xff] }
 0x1c7   : >> { %1383 = vst [vmem:[%s2148_s21 + $0xd0] sm:$0xff] %v1382_v2  ;;  %v1388_v7 = vld [vmem:[%s2152_s9 + $0xe8] sm:$0xff]  ;;  %1385 = vst [vmem:[%s2148_s21 + $0xd8] sm:$0xff] %v1384_v3  ;;  %v1390_v9 = vld [vmem:[%s2152_s9 + $0xf0] sm:$0xff] }
 0x1c8   : >> { %1387 = vst [vmem:[%s2148_s21 + $0xe0] sm:$0xff] %v1386_v4  ;;  %1389 = vst [vmem:[%s2148_s21 + $0xe8] sm:$0xff] %v1388_v7  ;;  %v1392_v10 = vld [vmem:[%s2152_s9 + $0xf8] sm:$0xff]  ;;  %v1394_v11 = vld [vmem:[%s2152_s9 + $0x100] sm:$0xff] }
 0x1c9   : >> { %1391 = vst [vmem:[%s2148_s21 + $0xf0] sm:$0xff] %v1390_v9  ;;  %1393 = vst [vmem:[%s2148_s21 + $0xf8] sm:$0xff] %v1392_v10  ;;  %v1396_v12 = vld [vmem:[%s2152_s9 + $0x108] sm:$0xff]  ;;  %v1398_v13 = vld [vmem:[%s2152_s9 + $0x110] sm:$0xff] }
 0x1ca   : >> { %1395 = vst [vmem:[%s2148_s21 + $0x100] sm:$0xff] %v1394_v11  ;;  %v1400_v5 = vld [vmem:[%s2152_s9 + $0x118] sm:$0xff]  ;;  %1397 = vst [vmem:[%s2148_s21 + $0x108] sm:$0xff] %v1396_v12  ;;  %v1402_v6 = vld [vmem:[%s2152_s9 + $0x120] sm:$0xff] }
 0x1cb   : >> { %1399 = vst [vmem:[%s2148_s21 + $0x110] sm:$0xff] %v1398_v13  ;;  %1401 = vst [vmem:[%s2148_s21 + $0x118] sm:$0xff] %v1400_v5  ;;  %v1404_v14 = vld [vmem:[%s2152_s9 + $0x128] sm:$0xff]  ;;  %v1406_v15 = vld [vmem:[%s2152_s9 + $0x130] sm:$0xff] }
 0x1cc   : >> { %1403 = vst [vmem:[%s2148_s21 + $0x120] sm:$0xff] %v1402_v6  ;;  %1405 = vst [vmem:[%s2148_s21 + $0x128] sm:$0xff] %v1404_v14  ;;  %v1408_v16 = vld [vmem:[%s2152_s9 + $0x138] sm:$0xff]  ;;  %v1410_v0 = vld [vmem:[%s2152_s9 + $0x140] sm:$0xff] }
 0x1cd   : >> { %1407 = vst [vmem:[%s2148_s21 + $0x130] sm:$0xff] %v1406_v15  ;;  %v1412_v8 = vld [vmem:[%s2152_s9 + $0x148] sm:$0xff]  ;;  %1409 = vst [vmem:[%s2148_s21 + $0x138] sm:$0xff] %v1408_v16  ;;  %v1414_v17 = vld [vmem:[%s2152_s9 + $0x150] sm:$0xff] }
 0x1ce   : >> { %1411 = vst [vmem:[%s2148_s21 + $0x140] sm:$0xff] %v1410_v0  ;;  %1413 = vst [vmem:[%s2148_s21 + $0x148] sm:$0xff] %v1412_v8  ;;  %v1416_v18 = vld [vmem:[%s2152_s9 + $0x158] sm:$0xff]  ;;  %v1418_v19 = vld [vmem:[%s2152_s9 + $0x160] sm:$0xff] }
 0x1cf   : >> { %1415 = vst [vmem:[%s2148_s21 + $0x150] sm:$0xff] %v1414_v17  ;;  %1417 = vst [vmem:[%s2148_s21 + $0x158] sm:$0xff] %v1416_v18  ;;  %v1420_v20 = vld [vmem:[%s2152_s9 + $0x168] sm:$0xff]  ;;  %v1422_v21 = vld [vmem:[%s2152_s9 + $0x170] sm:$0xff] }
 0x1d0   : >> { %1419 = vst [vmem:[%s2148_s21 + $0x160] sm:$0xff] %v1418_v19  ;;  %v1424_v24 = vld [vmem:[%s2152_s9 + $0x178] sm:$0xff]  ;;  %1421 = vst [vmem:[%s2148_s21 + $0x168] sm:$0xff] %v1420_v20  ;;  %v1426_v25 = vld [vmem:[%s2152_s9 + $0x180] sm:$0xff] }
 0x1d1   : >> { %1423 = vst [vmem:[%s2148_s21 + $0x170] sm:$0xff] %v1422_v21  ;;  %1425 = vst [vmem:[%s2148_s21 + $0x178] sm:$0xff] %v1424_v24  ;;  %v1428_v26 = vld [vmem:[%s2152_s9 + $0x188] sm:$0xff]  ;;  %v1430_v27 = vld [vmem:[%s2152_s9 + $0x190] sm:$0xff] }
 0x1d2   : >> { %1427 = vst [vmem:[%s2148_s21 + $0x180] sm:$0xff] %v1426_v25  ;;  %1429 = vst [vmem:[%s2148_s21 + $0x188] sm:$0xff] %v1428_v26  ;;  %v1432_v29 = vld [vmem:[%s2152_s9 + $0x198] sm:$0xff]  ;;  %v1434_v30 = vld [vmem:[%s2152_s9 + $0x1a0] sm:$0xff] }
 0x1d3   : >> { %1431 = vst [vmem:[%s2148_s21 + $0x190] sm:$0xff] %v1430_v27  ;;  %v1436_v33 = vld [vmem:[%s2152_s9 + $0x1a8] sm:$0xff]  ;;  %1433 = vst [vmem:[%s2148_s21 + $0x198] sm:$0xff] %v1432_v29  ;;  %v1438_v34 = vld [vmem:[%s2152_s9 + $0x1b0] sm:$0xff] }
 0x1d4   : >> { %1435 = vst [vmem:[%s2148_s21 + $0x1a0] sm:$0xff] %v1434_v30  ;;  %1437 = vst [vmem:[%s2148_s21 + $0x1a8] sm:$0xff] %v1436_v33  ;;  %v1440_v22 = vld [vmem:[%s2152_s9 + $0x1b8] sm:$0xff]  ;;  %v1442_v23 = vld [vmem:[%s2152_s9 + $0x1c0] sm:$0xff] }
 0x1d5   : >> { %1439 = vst [vmem:[%s2148_s21 + $0x1b0] sm:$0xff] %v1438_v34  ;;  %1441 = vst [vmem:[%s2148_s21 + $0x1b8] sm:$0xff] %v1440_v22  ;;  %v1444_v35 = vld [vmem:[%s2152_s9 + $0x1c8] sm:$0xff]  ;;  %v1446_v36 = vld [vmem:[%s2152_s9 + $0x1d0] sm:$0xff]  ;;  %1326 = sbr.rel (!%p1323_p11) target bundleno = 441 (0x1b9), region = 194 }
 0x1d6   : >> { %1443 = vst [vmem:[%s2148_s21 + $0x1c0] sm:$0xff] %v1442_v23  ;;  %v1448_v37 = vld [vmem:[%s2152_s9 + $0x1d8] sm:$0xff]  ;;  %1445 = vst [vmem:[%s2148_s21 + $0x1c8] sm:$0xff] %v1444_v35  ;;  %v1450_v31 = vld [vmem:[%s2152_s9 + $0x1e0] sm:$0xff] }
 0x1d7   : >> { %1447 = vst [vmem:[%s2148_s21 + $0x1d0] sm:$0xff] %v1446_v36  ;;  %1449 = vst [vmem:[%s2148_s21 + $0x1d8] sm:$0xff] %v1448_v37  ;;  %v1452_v32 = vld [vmem:[%s2152_s9 + $0x1e8] sm:$0xff]  ;;  %v1454_v38 = vld [vmem:[%s2152_s9 + $0x1f0] sm:$0xff] }
 0x1d8   : >> { %1451 = vst [vmem:[%s2148_s21 + $0x1e0] sm:$0xff] %v1450_v31  ;;  %1453 = vst [vmem:[%s2148_s21 + $0x1e8] sm:$0xff] %v1452_v32  ;;  %v1456_v28 = vld [vmem:[%s2152_s9 + $0x1f8] sm:$0xff]  ;;  %s2940_s9 = smov %s2777_s26 }
 0x1d9   : >> { %1455 = vst [vmem:[%s2148_s21 + $0x1f0] sm:$0xff] %v1454_v38  ;;  %1457 = vst [vmem:[%s2148_s21 + $0x1f8] sm:$0xff] %v1456_v28  ;;  %s2939_s21 = smov %s2780_s27 }
 0x1da PF: > { %s2886_s12 = sand.u32 63, %s1317_s5   ;;  %s1751_s18 = sshll.u32 %s2710_s8, 13 }
 0x1db   : > { %s1469_s19 = sshra.s32 %s1751_s18, 4  ;;  %p1736_p6 = scmp.le.s32.totalorder %s2886_s12, 0 }
 0x1dc   : > { %s1470_s29 = scalar_lea.vmem %s2480_s25, %s1469_s19 [#allocation7]   ;;  %s1473_s16 = scalar_lea.vmem %s2500_s28, %s1469_s19  }
 0x1dd   : > { %1632 = sbr.rel (%p1736_p6) target bundleno = 490 (0x1ea), region = 199  ;;  %s2162_s15 = smov (!%p1736_p6), %s1473_s16  }
 0x1de   : > { %s2166_s24 = smov (!%p1736_p6), %s1470_s29   ;;  %s2170_s10 = smov (!%p1736_p6), 0  }
 0x1df   : > { %s2174_s22 = smov (!%p1736_p6), 0  }
 0x1e2 LB: >> { %v1485_v39 = vld [vmem:[%s2168_s24] sm:$0xff]  ;;  %s1487_s5 = sadd.s32 1, %s2172_s10  ;;  %s1479_s22 = sadd.s32 1, %s2176_s22   ;;  %s2176_s22 = sphi %s2174_s22, %s1479_s22   ;;  %s2172_s10 = sphi %s2170_s10, %s2171_s10   ;;  %s2168_s24 = sphi %s2166_s24, %s1492_s24   ;;  %s2164_s15 = sphi %s2162_s15, %s1493_s15  }
 0x1e3   : >> { %1486 = vst [vmem:[%s2164_s15] sm:$0xff] %v1485_v39  ;;  %p1488_p7 = scmp.ge.s32.totalorder %s1487_s5, %s2886_s12  ;;  %p1478_p9 = scmp.ge.s32.totalorder %s1479_s22, %s2886_s12 }
 0x1e5   : >> { %s2959_s5 = smov (%p1488_p7, %s1487_s5), 0  ;;  %1481 = sbr.rel (!%p1478_p9) target bundleno = 482 (0x1e2), region = 205 }
 0x1e6   : >> { %s1737_s8 = sshll.u32 %s2959_s5, 3  ;;  %s2171_s10 = smov %s2959_s5  }
 0x1e7   : >> { %s1492_s24 = scalar_lea.vmem %s1470_s29, %s1737_s8 [#allocation7]   ;;  %s1493_s15 = scalar_lea.vmem %s1473_s16, %s1737_s8  }
 0x1ea PF: > { %s2185_s21 = smov 1  }
 0x1eb   : > { %s1494_s9 = sshll.u32 %s2185_s21, %s2506_s23 }
 0x1ec   : > { %s1739_s7 = sadd.s32 4294967295, %s1494_s9 }
 0x1ed   : > { %v1504_v40 = vld [vmem:[%s1314_s6] sm:%s1739_s7] }
 0x1ee   : > { %1505 = vst [vmem:[%s1316_s11] sm:%s1739_s7] %v1504_v40 }
 0x1ef PF: > { %p1740_p8 = scmp.ge.u32.totalorder %s2502_s30, 8 }
 0x1f0   : > { %s2186_s26 = smov (!%p1740_p8), 1  }
 0x1f1   : > { %1114 = sbr.rel (%p1740_p8) target bundleno = 504 (0x1f8), region = 60  ;;  %s1115_s27 = sshll.u32 (!%p1740_p8), %s2186_s26, %s2502_s30 }
 0x1f2   : > { %s1741_s12 = sadd.s32 (!%p1740_p8), 4294967295, %s1115_s27 }
 0x1f6   : > { %v1125_v41 = vld [vmem:[%s2480_s25] sm:%s1741_s12] }
 0x1f7   : > { %1126 = vst [vmem:[%s2500_s28] sm:%s1741_s12] %v1125_v41 }
 0x1f8 PF: > { %p14_p12 = scmp.ge.s32.totalorder %s2229_s17, 7   ;;  %s2942_s12 = smov %s2104_s13 }
 0x1f9   : > { %s2943_s13 = smov %s2108_s14  ;;  %s2944_s14 = smov %s2239_s20 }
 0x1fa   : > { %s2945_s15 = smov %s2229_s17  ;;  %16 = sbr.rel (!%p14_p12) target bundleno = 4 (0x4), region = 216 }
 0x1ff   :  { %1519 = vsyncpa [#allocation3], 1 }
 0x200   :  { %1521 = vsyncpa [#allocation3 + $0x1], 1 }
 0x201   :  { %1522 = vsyncpa [#allocation5], 1 }
 0x202   :  { %1524 = vsyncpa [#allocation5 + $0x1], 1 }

// kernel: pixel_decoder_forward.6
= control target key start
LH: loop header
LB: loop body
LE: loop exit
PB: predicated region body
PF: predicated region fallthrough
CT: control target
= control target key end

     0   :  { %s2952_s0 = inlined_call_operand.vmem [shape: f32[8,72], index: 0, kind: input, shape index: {}]   ;;  %s2953_s1 = inlined_call_operand.vmem [shape: f32[8,1], index: 1, kind: input, shape index: {}]   ;;  %s2954_s2 = inlined_call_operand.vmem [shape: f32[2,72,1369], index: 2, kind: input, shape index: {}]   ;;  %s2955_s3 = inlined_call_operand.vmem [shape: f32[2,8,1369], index: 3, kind: output, shape index: {}]  }
   0x1   :  { %2956 = sst [smem:[#allocation4_spill]] %s2954_s2 }
   0x2   :  { %s2258_s12 = smov 0   ;;  %s2260_s13 = smov 0  }
   0x3   :  { %s2262_s14 = smov 0   ;;  %s2264_s15 = smov 0  }
   0x4   :  { %s2266_s16 = smov 0   ;;  %s2268_s17 = smov 0  }
   0x5   :  { %s2270_s18 = smov 0  }
   0x6 LB: > { %s22_s19 = sadd.s32 1, %s2126_s16  ;;  %s25_s20 = sadd.s32 1, %s2130_s17  ;;  %s2134_s18 = sphi %s2270_s18, %s13_s18   ;;  %s2130_s17 = sphi %s2268_s17, %s2980_s17   ;;  %s2126_s16 = sphi %s2266_s16, %s2979_s16   ;;  %s2122_s15 = sphi %s2264_s15, %s2978_s15   ;;  %s2118_s14 = sphi %s2262_s14, %s2977_s14   ;;  %s2114_s13 = sphi %s2260_s13, %s2976_s13   ;;  %s2110_s12 = sphi %s2258_s12, %s2975_s12  }
   0x7   : > { %p23_p0 = scmp.ge.s32.totalorder %s22_s19, 3  ;;  %s1555_s21 = sadd.s32 4294967295, %s2134_s18  }
   0x8   : > { %p83_p1 = scmp.ne.s32.totalorder %s2114_s13, %s2110_s12  ;;  %p84_p2 = scmp.eq.s32.totalorder %s2134_s18, 0 }
   0x9   : > { %s2982_s19 = smov (%p23_p0, %s22_s19), 0  ;;  %s2984_s20 = smov (!%p23_p0, %s25_s20), %s2130_s17 }
   0xa   : > { %p27_p3 = scmp.ge.s32.totalorder %s2984_s20, 2  ;;  %p115_p4 = scmp.eq.s32.totalorder %s1555_s21, 5 }
   0xb   : > { %s72_s22 = ssub.s32 %s2126_s16, %s2982_s19  ;;  %p85_p5 = por %p84_p2, %p83_p1 }
   0xc   : > { %s2986_s20 = smov (%p27_p3, %s2984_s20), 0  ;;  %p2306_p6 = por %p115_p4, %p83_p1 }
   0xd   : > { %s71_s24 = ssub.s32 %s2130_s17, %s2986_s20  ;;  %s76_s26 = sadd.s32 1, %s2114_s13 }
   0xe   : > { %s73_s25 = sor.u32 %s72_s22, %s71_s24  ;;  %p1558_p8 = scmp.ge.s32.totalorder %s2134_s18, 6 }
   0xf   : > { %p74_p7 = scmp.eq.s32.totalorder %s73_s25, 0 }
  0x10   : > { %143 = sbr.rel (%p1558_p8) target bundleno = 108 (0x6c), region = 24 }
  0x11   : > { %s2314_s27 = scalar_select %p74_p7, %s2114_s13, %s76_s26  }
  0x15   : > { %146 = sbr.rel (!%p85_p5) target bundleno = 108 (0x6c), region = 28  ;;  %s148_s28 = sand.u32 (%p85_p5), 1, %s2114_s13  }
  0x16   : > { %s1559_s29 = sshll.u32 (%p85_p5), %s2126_s16, 2  ;;  %s1629_s30 = smul.u32 (%p85_p5), 288, %s148_s28 }
  0x17   : > { %s152_s4 = ssub.s32 (%p85_p5), 11, %s1559_s29  ;;  %s1630_s5 = smul.u32 (%p85_p5), 99, %s2130_s17 }
  0x18   : > { %p153_p9 = scmp.lt.s32.totalorder (%p85_p5), %s152_s4, 4  ;;  %s2958_s2 = sld [smem:[#allocation4_spill]] (%p85_p5) }
  0x19   : > { %s158_s6 = sadd.s32 (%p85_p5), %s1630_s5, %s1559_s29  ;;  %s2327_s22 = scalar_lea.vmem (%p85_p5), [#allocation2], %s1629_s30  }
  0x1a   : > { %s2988_s4 = smov (!%p153_p9, %s152_s4), 4  ;;  %s1561_s8 = sshll.u32 %s158_s6, 3 }
  0x1b   : > { %s155_s7 = smul.u32 1152, %s2988_s4  ;;  %s2325_s21 = sshll.u32 %s2988_s4, 3 }
  0x1d   : > { %p1563_p10 = scmp.eq.s32.totalorder %s155_s7, 0 }
  0x1e   : > { %s2323_s11 = scalar_lea.vmem %s2958_s2, %s1561_s8   ;;  %p165_p11 = scmp.lt.u32.totalorder (!%p1563_p10), %s2325_s21, 8 }
  0x1f   : > { %164 = sbr.rel (%p1563_p10) target bundleno = 108 (0x6c), region = 32 }
  0x24   : > { %168 = sbr.rel (%p165_p11) target bundleno = 91 (0x5b), region = 36  ;;  %s2331_s24 = sand.u32 (!%p165_p11), 7, %s2325_s21  }
  0x25   : > { %p201_p12 = scmp.eq.s32.totalorder (!%p165_p11), %s2331_s24, 0  ;;  %p1564_p13 = scmp.ne.s32.totalorder (!%p165_p11), %s2331_s24, 0 }
  0x29   : > { %204 = sbr.rel (%p1564_p13) target bundleno = 59 (0x3b), region = 51  ;;  %s205_s25 = sshrl.u32 (!%p1564_p13), %s2325_s21, 3 }
  0x2a   : > { %s206_s26 = sshrl.u32 (!%p1564_p13), %s205_s25, 3  ;;  %s2336_s28 = sand.u32 (!%p1564_p13), 7, %s205_s25  }
  0x2b   : > { %s1621_s29 = sshll.u32 (!%p1564_p13), %s206_s26, 10  ;;  %p1571_p0 = scmp.le.s32.totalorder (!%p1564_p13), %s2336_s28, 0 }
  0x2c   : > { %s373_s30 = sshra.s32 (!%p1564_p13), %s1621_s29, 4 }
  0x2d   : > { %s2339_s4 = scalar_lea.vmem (!%p1564_p13), %s2323_s11, %s373_s30   ;;  %s2342_s5 = scalar_lea.vmem (!%p1564_p13), %s2327_s22, %s373_s30 [#allocation2]  }
  0x2e   : > { %1430 = sbr.rel (%p1571_p0) target bundleno = 59 (0x3b), region = 240  ;;  %s2959_s6 = smov (!%p1571_p0), %s2342_s5 }
  0x2f   : > { %s2960_s7 = smov (!%p1571_p0), %s2339_s4  ;;  %s2351_s8 = smov (!%p1571_p0), 0  }
  0x30   : > { %s2353_s9 = smov (!%p1571_p0), 0  }
  0x33 LB: >> { %v389_v0 = vld [vmem:[%s2142_s7] sm:$0xff]  ;;  %v391_v1 = vld [vmem:[%s2142_s7 + $0x58] sm:$0xff]  ;;  %v393_v2 = vld [vmem:[%s2142_s7 + $0xb0] sm:$0xff]  ;;  %s407_s10 = sadd.s32 1, %s2146_s8  ;;  %s383_s9 = sadd.s32 1, %s2150_s9   ;;  %s2150_s9 = sphi %s2353_s9, %s383_s9   ;;  %s2146_s8 = sphi %s2351_s8, %s2961_s8   ;;  %s2142_s7 = sphi %s2960_s7, %s412_s7   ;;  %s2138_s6 = sphi %s2959_s6, %s413_s6  }
  0x34   : >> { %390 = vst [vmem:[%s2138_s6] sm:$0xff] %v389_v0  ;;  %392 = vst [vmem:[%s2138_s6 + $0x20] sm:$0xff] %v391_v1  ;;  %v395_v3 = vld [vmem:[%s2142_s7 + $0x108] sm:$0xff]  ;;  %v397_v4 = vld [vmem:[%s2142_s7 + $0x160] sm:$0xff]  ;;  %p408_p1 = scmp.ge.s32.totalorder %s407_s10, %s2336_s28  ;;  %p382_p2 = scmp.ge.s32.totalorder %s383_s9, %s2336_s28 }
  0x35   : >> { %394 = vst [vmem:[%s2138_s6 + $0x40] sm:$0xff] %v393_v2  ;;  %v399_v5 = vld [vmem:[%s2142_s7 + $0x1b8] sm:$0xff]  ;;  %396 = vst [vmem:[%s2138_s6 + $0x60] sm:$0xff] %v395_v3  ;;  %v401_v6 = vld [vmem:[%s2142_s7 + $0x210] sm:$0xff] }
  0x36   : >> { %398 = vst [vmem:[%s2138_s6 + $0x80] sm:$0xff] %v397_v4  ;;  %400 = vst [vmem:[%s2138_s6 + $0xa0] sm:$0xff] %v399_v5  ;;  %v403_v7 = vld [vmem:[%s2142_s7 + $0x268] sm:$0xff]  ;;  %v405_v8 = vld [vmem:[%s2142_s7 + $0x2c0] sm:$0xff]  ;;  %s2990_s10 = smov (%p408_p1, %s407_s10), 0  ;;  %385 = sbr.rel (!%p382_p2) target bundleno = 51 (0x33), region = 246 }
  0x37   : >> { %402 = vst [vmem:[%s2138_s6 + $0xc0] sm:$0xff] %v401_v6  ;;  %404 = vst [vmem:[%s2138_s6 + $0xe0] sm:$0xff] %v403_v7  ;;  %s1572_s25 = sshll.u32 %s2990_s10, 3  ;;  %s2961_s8 = smov %s2990_s10 }
  0x38   : >> { %406 = vst [vmem:[%s2138_s6 + $0x100] sm:$0xff] %v405_v8  ;;  %s412_s7 = scalar_lea.vmem %s2339_s4, %s1572_s25   ;;  %s413_s6 = scalar_lea.vmem %s2342_s5, %s1572_s25 [#allocation2]  }
  0x3b PF: > { %416 = sbr.rel (%p201_p12) target bundleno = 91 (0x5b), region = 69  ;;  %s418_s26 = ssub.s32 (!%p201_p12), %s2325_s21, %s2331_s24 }
  0x3c   : > { %s422_s29 = sshrl.u32 (!%p201_p12), %s2325_s21, 3  ;;  %s2380_s30 = scalar_lea.vmem (!%p201_p12), %s2323_s11, %s418_s26 }
  0x3d   : > { %s2383_s10 = scalar_lea.vmem (!%p201_p12), %s2327_s22, %s418_s26 [#allocation2]  ;;  %s423_s9 = sshrl.u32 (!%p201_p12), %s422_s29, 3 }
  0x3e   : > { %s2385_s25 = sand.u32 (!%p201_p12), 7, %s422_s29   ;;  %s1623_s28 = sshll.u32 (!%p201_p12), %s423_s9, 10 }
  0x3f   : > { %s590_s4 = sshra.s32 (!%p201_p12), %s1623_s28, 4  ;;  %p1580_p3 = scmp.le.s32.totalorder (!%p201_p12), %s2385_s25, 0 }
  0x40   : > { %s2388_s5 = scalar_lea.vmem %s2323_s11, %s590_s4   ;;  %s2391_s6 = scalar_lea.vmem %s2327_s22, %s590_s4 [#allocation2]  }
  0x41   : > { %1458 = sbr.rel (%p1580_p3) target bundleno = 78 (0x4e), region = 262  ;;  %s2962_s7 = smov (!%p1580_p3), %s2391_s6 }
  0x42   : > { %s2963_s8 = smov (!%p1580_p3), %s2388_s5  ;;  %s2400_s26 = smov (!%p1580_p3), 0  }
  0x43   : > { %s2402_s2 = smov (!%p1580_p3), 0  }
  0x46 LB: >> { %v606_v9 = vld [vmem:[%s2158_s8] sm:$0xff]  ;;  %v608_v10 = vld [vmem:[%s2158_s8 + $0x58] sm:$0xff]  ;;  %v610_v11 = vld [vmem:[%s2158_s8 + $0xb0] sm:$0xff]  ;;  %s624_s29 = sadd.s32 1, %s2162_s26  ;;  %s600_s2 = sadd.s32 1, %s2166_s2   ;;  %s2166_s2 = sphi %s2402_s2, %s600_s2   ;;  %s2162_s26 = sphi %s2400_s26, %s2964_s26   ;;  %s2158_s8 = sphi %s2963_s8, %s629_s8   ;;  %s2154_s7 = sphi %s2962_s7, %s630_s7  }
  0x47   : >> { %607 = vst [vmem:[%s2154_s7] sm:$0xff] %v606_v9  ;;  %609 = vst [vmem:[%s2154_s7 + $0x20] sm:$0xff] %v608_v10  ;;  %v612_v12 = vld [vmem:[%s2158_s8 + $0x108] sm:$0xff]  ;;  %v614_v13 = vld [vmem:[%s2158_s8 + $0x160] sm:$0xff]  ;;  %p625_p4 = scmp.ge.s32.totalorder %s624_s29, %s2385_s25  ;;  %p599_p5 = scmp.ge.s32.totalorder %s600_s2, %s2385_s25 }
  0x48   : >> { %611 = vst [vmem:[%s2154_s7 + $0x40] sm:$0xff] %v610_v11  ;;  %v616_v14 = vld [vmem:[%s2158_s8 + $0x1b8] sm:$0xff]  ;;  %613 = vst [vmem:[%s2154_s7 + $0x60] sm:$0xff] %v612_v12  ;;  %v618_v15 = vld [vmem:[%s2158_s8 + $0x210] sm:$0xff] }
  0x49   : >> { %615 = vst [vmem:[%s2154_s7 + $0x80] sm:$0xff] %v614_v13  ;;  %617 = vst [vmem:[%s2154_s7 + $0xa0] sm:$0xff] %v616_v14  ;;  %v620_v16 = vld [vmem:[%s2158_s8 + $0x268] sm:$0xff]  ;;  %v622_v17 = vld [vmem:[%s2158_s8 + $0x2c0] sm:$0xff]  ;;  %s2992_s29 = smov (%p625_p4, %s624_s29), 0  ;;  %602 = sbr.rel (!%p599_p5) target bundleno = 70 (0x46), region = 268 }
  0x4a   : >> { %619 = vst [vmem:[%s2154_s7 + $0xc0] sm:$0xff] %v618_v15  ;;  %621 = vst [vmem:[%s2154_s7 + $0xe0] sm:$0xff] %v620_v16  ;;  %s1581_s9 = sshll.u32 %s2992_s29, 3  ;;  %s2964_s26 = smov %s2992_s29 }
  0x4b   : >> { %623 = vst [vmem:[%s2154_s7 + $0x100] sm:$0xff] %v622_v17  ;;  %s629_s8 = scalar_lea.vmem %s2388_s5, %s1581_s9   ;;  %s630_s7 = scalar_lea.vmem %s2391_s6, %s1581_s9 [#allocation2]  }
  0x4e PF: > { %s2232_s28 = smov 1  }
  0x4f   : > { %s631_s4 = sshll.u32 %s2232_s28, %s2331_s24 }
  0x50   : > { %s1583_s2 = sadd.s32 4294967295, %s631_s4 }
  0x51   : > { %v641_v18 = vld [vmem:[%s2380_s30] sm:%s1583_s2]  ;;  %v643_v19 = vld [vmem:[%s2380_s30 + $0x58] sm:%s1583_s2] }
  0x52   : > { %642 = vst [vmem:[%s2383_s10] sm:%s1583_s2] %v641_v18  ;;  %644 = vst [vmem:[%s2383_s10 + $0x20] sm:%s1583_s2] %v643_v19 }
  0x53   : > { %v645_v20 = vld [vmem:[%s2380_s30 + $0xb0] sm:%s1583_s2]  ;;  %v647_v21 = vld [vmem:[%s2380_s30 + $0x108] sm:%s1583_s2] }
  0x54   : > { %646 = vst [vmem:[%s2383_s10 + $0x40] sm:%s1583_s2] %v645_v20  ;;  %648 = vst [vmem:[%s2383_s10 + $0x60] sm:%s1583_s2] %v647_v21 }
  0x55   : > { %v649_v22 = vld [vmem:[%s2380_s30 + $0x160] sm:%s1583_s2]  ;;  %v651_v23 = vld [vmem:[%s2380_s30 + $0x1b8] sm:%s1583_s2] }
  0x56   : > { %650 = vst [vmem:[%s2383_s10 + $0x80] sm:%s1583_s2] %v649_v22  ;;  %652 = vst [vmem:[%s2383_s10 + $0xa0] sm:%s1583_s2] %v651_v23 }
  0x57   : > { %v653_v24 = vld [vmem:[%s2380_s30 + $0x210] sm:%s1583_s2]  ;;  %v655_v25 = vld [vmem:[%s2380_s30 + $0x268] sm:%s1583_s2] }
  0x58   : > { %654 = vst [vmem:[%s2383_s10 + $0xc0] sm:%s1583_s2] %v653_v24  ;;  %656 = vst [vmem:[%s2383_s10 + $0xe0] sm:%s1583_s2] %v655_v25 }
  0x59   : > { %v657_v26 = vld [vmem:[%s2380_s30 + $0x2c0] sm:%s1583_s2] }
  0x5a   : > { %658 = vst [vmem:[%s2383_s10 + $0x100] sm:%s1583_s2] %v657_v26 }
  0x5b PF: > { %p1584_p7 = scmp.ge.u32.totalorder %s2325_s21, 8 }
  0x5c   : > { %s2233_s24 = smov (!%p1584_p7), 1  }
  0x5d   : > { %171 = sbr.rel (%p1584_p7) target bundleno = 108 (0x6c), region = 40  ;;  %s172_s30 = sshll.u32 (!%p1584_p7), %s2233_s24, %s2325_s21 }
  0x5e   : > { %s1585_s10 = sadd.s32 (!%p1584_p7), 4294967295, %s172_s30 }
  0x62   : > { %v182_v27 = vld [vmem:[%s2323_s11] sm:%s1585_s10]  ;;  %v184_v28 = vld [vmem:[%s2323_s11 + $0x58] sm:%s1585_s10] }
  0x63   : > { %183 = vst [vmem:[%s2327_s22] sm:%s1585_s10] %v182_v27  ;;  %185 = vst [vmem:[%s2327_s22 + $0x20] sm:%s1585_s10] %v184_v28 }
  0x64   : > { %v186_v29 = vld [vmem:[%s2323_s11 + $0xb0] sm:%s1585_s10]  ;;  %v188_v30 = vld [vmem:[%s2323_s11 + $0x108] sm:%s1585_s10] }
  0x65   : > { %187 = vst [vmem:[%s2327_s22 + $0x40] sm:%s1585_s10] %v186_v29  ;;  %189 = vst [vmem:[%s2327_s22 + $0x60] sm:%s1585_s10] %v188_v30 }
  0x66   : > { %v190_v31 = vld [vmem:[%s2323_s11 + $0x160] sm:%s1585_s10]  ;;  %v192_v32 = vld [vmem:[%s2323_s11 + $0x1b8] sm:%s1585_s10] }
  0x67   : > { %191 = vst [vmem:[%s2327_s22 + $0x80] sm:%s1585_s10] %v190_v31  ;;  %193 = vst [vmem:[%s2327_s22 + $0xa0] sm:%s1585_s10] %v192_v32 }
  0x68   : > { %v194_v33 = vld [vmem:[%s2323_s11 + $0x210] sm:%s1585_s10]  ;;  %v196_v34 = vld [vmem:[%s2323_s11 + $0x268] sm:%s1585_s10] }
  0x69   : > { %195 = vst [vmem:[%s2327_s22 + $0xc0] sm:%s1585_s10] %v194_v33  ;;  %197 = vst [vmem:[%s2327_s22 + $0xe0] sm:%s1585_s10] %v196_v34 }
  0x6a   : > { %v198_v35 = vld [vmem:[%s2323_s11 + $0x2c0] sm:%s1585_s10] }
  0x6b   : > { %199 = vst [vmem:[%s2327_s22 + $0x100] sm:%s1585_s10] %v198_v35 }
  0x6c PF: > { %p1586_p8 = scmp.ge.s32.totalorder %s2134_s18, 1  ;;  %p661_p9 = scmp.lt.s32.totalorder %s2134_s18, 7 }
  0x6e   : > { %p662_p10 = pnand %p1586_p8, %p661_p9 }
  0x6f   : > { %s668_s21 = sand.u32 (!%p662_p10), 1, %s2110_s12  }
  0x70   : > { %665 = sbr.rel (%p662_p10) target bundleno = 484 (0x1e4), region = 94  ;;  %s1587_s8 = sshll.u32 (!%p662_p10), %s668_s21, 5 }
  0x71   : > { %s1631_s11 = smul.u32 (!%p662_p10), 288, %s668_s21  ;;  %s2513_s26 = scalar_lea.vmem (!%p662_p10), [#allocation3], %s1587_s8  }
  0x73   : > { %s2470_s22 = scalar_lea.vmem (!%p662_p10), [#allocation2], %s1631_s11 }
  0x75   : > { %v737_v36 = vld [vmem:[%s2953_s1] sm:$0xff]  ;;  %v2234_v37 = vmov 0.0   ;;  %v2235_v38 = vmov 0   ;;  %v734_v39 = vld [vmem:[%s2470_s22 + $0x108] sm:$0xff]  ;;  %v736_v40 = vld [vmem:[%s2470_s22 + $0x118] sm:$0xff]  ;;  %vm743_vm0 = vcmask 588800  }
  0x76   : > { %811 = vmatprep.mubr.f32.mxu0 %v2234_v37  ;;  %882 = vmatprep.mubr.f32.mxu1 %v2234_v37  ;;  %v733_v41 = vld [vmem:[%s2470_s22 + $0x100] sm:$0xff]  ;;  %v735_v42 = vld [vmem:[%s2470_s22 + $0x110] sm:$0xff]  ;;  %v730_v43 = vld [vmem:[%s2470_s22 + $0xe8] sm:$0xff]  ;;  %s1591_s12 = sshll.u32 (%p2306_p6), %s2118_s14, 2  ;;  %s1632_s29 = smul.u32 (%p2306_p6), 11, %s2122_s15 }
  0x77   : > { %1951 = vset.pattern.permute.xlu0 %v2235_v38  ;;  %761 = vmatprep.subr.mxu0 %v734_v39  ;;  %v732_v44 = vld [vmem:[%s2470_s22 + $0xf8] sm:$0xff]  ;;  %v729_v45 = vld [vmem:[%s2470_s22 + $0xe0] sm:$0xff]  ;;  %v731_v46 = vld [vmem:[%s2470_s22 + $0xf0] sm:$0xff]  ;;  %s905_s9 = ssub.s32 (%p2306_p6), 11, %s1591_s12 }
  0x78   : > { %740 = vperm.xlu0 %1951, %v737_v36   ;;  %832 = vmatprep.subr.mxu1 %v736_v40  ;;  %v726_v47 = vld [vmem:[%s2470_s22 + $0xc8] sm:$0xff]  ;;  %v728_v48 = vld [vmem:[%s2470_s22 + $0xd8] sm:$0xff]  ;;  %v725_v49 = vld [vmem:[%s2470_s22 + $0xc0] sm:$0xff]  ;;  %p906_p11 = scmp.lt.s32.totalorder (%p2306_p6), %s905_s9, 4  ;;  %s911_s28 = sadd.s32 (%p2306_p6), %s1632_s29, %s1591_s12 }
  0x79   : > { %762 = vmatpush1.msra.mxu0 %v733_v41  ;;  %833 = vmatpush1.msra.mxu1 %v735_v42  ;;  %v727_v50 = vld [vmem:[%s2470_s22 + $0xd0] sm:$0xff]  ;;  %v722_v51 = vld [vmem:[%s2470_s22 + $0xa8] sm:$0xff]  ;;  %v724_v52 = vld [vmem:[%s2470_s22 + $0xb8] sm:$0xff]  ;;  %s1594_s4 = sshll.u32 (%p2306_p6), %s911_s28, 3 }
  0x7a   : > { %763 = vmatprep.subr.mxu0 %v730_v43  ;;  %834 = vmatprep.subr.mxu1 %v732_v44  ;;  %v721_v53 = vld [vmem:[%s2470_s22 + $0xa0] sm:$0xff]  ;;  %v723_v54 = vld [vmem:[%s2470_s22 + $0xb0] sm:$0xff]  ;;  %v718_v55 = vld [vmem:[%s2470_s22 + $0x88] sm:$0xff]  ;;  %s2526_s30 = scalar_lea.vmem (%p2306_p6), %s2955_s3, %s1594_s4  }
  0x7b   : > { %764 = vmatpush1.msra.mxu0 %v729_v45  ;;  %835 = vmatpush1.msra.mxu1 %v731_v46  ;;  %v720_v56 = vld [vmem:[%s2470_s22 + $0x98] sm:$0xff]  ;;  %v717_v57 = vld [vmem:[%s2470_s22 + $0x80] sm:$0xff]  ;;  %v719_v58 = vld [vmem:[%s2470_s22 + $0x90] sm:$0xff] }
  0x7c   : > { %765 = vmatprep.subr.mxu0 %v726_v47  ;;  %836 = vmatprep.subr.mxu1 %v728_v48  ;;  %v714_v59 = vld [vmem:[%s2470_s22 + $0x68] sm:$0xff]  ;;  %v716_v60 = vld [vmem:[%s2470_s22 + $0x78] sm:$0xff]  ;;  %v713_v61 = vld [vmem:[%s2470_s22 + $0x60] sm:$0xff] }
  0x7d   : > { %766 = vmatpush1.msra.mxu0 %v725_v49  ;;  %837 = vmatpush1.msra.mxu1 %v727_v50  ;;  %v715_v62 = vld [vmem:[%s2470_s22 + $0x70] sm:$0xff]  ;;  %v710_v63 = vld [vmem:[%s2470_s22 + $0x48] sm:$0xff]  ;;  %v712_v0 = vld [vmem:[%s2470_s22 + $0x58] sm:$0xff] }
  0x7e   : > { %767 = vmatprep.subr.mxu0 %v722_v51  ;;  %838 = vmatprep.subr.mxu1 %v724_v52  ;;  %v709_v1 = vld [vmem:[%s2470_s22 + $0x40] sm:$0xff]  ;;  %v711_v2 = vld [vmem:[%s2470_s22 + $0x50] sm:$0xff]  ;;  %v706_v3 = vld [vmem:[%s2470_s22 + $0x28] sm:$0xff] }
  0x7f   : > { %768 = vmatpush1.msra.mxu0 %v721_v53  ;;  %839 = vmatpush1.msra.mxu1 %v723_v54  ;;  %v708_v4 = vld [vmem:[%s2470_s22 + $0x38] sm:$0xff]  ;;  %v705_v5 = vld [vmem:[%s2470_s22 + $0x20] sm:$0xff]  ;;  %v707_v6 = vld [vmem:[%s2470_s22 + $0x30] sm:$0xff] }
  0x80   : > { %769 = vmatprep.subr.mxu0 %v718_v55  ;;  %840 = vmatprep.subr.mxu1 %v720_v56  ;;  %v702_v7 = vld [vmem:[%s2470_s22 + $0x8] sm:$0xff]  ;;  %v704_v8 = vld [vmem:[%s2470_s22 + $0x18] sm:$0xff]  ;;  %v701_v9 = vld [vmem:[%s2470_s22] sm:$0xff] }
  0x81   : > { %770 = vmatpush1.msra.mxu0 %v717_v57  ;;  %841 = vmatpush1.msra.mxu1 %v719_v58  ;;  %v703_v10 = vld [vmem:[%s2470_s22 + $0x10] sm:$0xff]  ;;  %v700_v11 = vld [vmem:[%s2952_s0] sm:$0xff] }
  0x82   : > { %771 = vmatprep.subr.mxu0 %v714_v59  ;;  %842 = vmatprep.subr.mxu1 %v716_v60 }
  0x83   : > { %772 = vmatpush1.msra.mxu0 %v713_v61  ;;  %843 = vmatpush1.msra.mxu1 %v715_v62 }
  0x84   : > { %773 = vmatprep.subr.mxu0 %v710_v63  ;;  %844 = vmatprep.subr.mxu1 %v712_v0 }
  0x85   : > { %774 = vmatpush1.msra.mxu0 %v709_v1  ;;  %845 = vmatpush1.msra.mxu1 %v711_v2 }
  0x86   : > { %775 = vmatprep.subr.mxu0 %v706_v3  ;;  %846 = vmatprep.subr.mxu1 %v708_v4 }
  0x87   : > { %776 = vmatpush1.msra.mxu0 %v705_v5  ;;  %847 = vmatpush1.msra.mxu1 %v707_v6 }
  0x88   : > { %777 = vmatprep.subr.mxu0 %v702_v7  ;;  %848 = vmatprep.subr.mxu1 %v704_v8 }
  0x89   : > { %778 = vmatpush1.msra.mxu0 %v701_v9  ;;  %849 = vmatpush1.msra.mxu1 %v703_v10 }
  0x8a   : > { %1588 = vmatmul.mubr.msk.f32.vlgmr.msra.gmra.mxu0 %vm743_vm0, %v700_v11  ;;  %1589 = vmatmul.mubr.msk.f32.vlgmr.msra.gmra.mxu1 %vm743_vm0, %v700_v11 }
  0xf3   : > { %v741_v12 = vpop.permute.xlu0 %740 }
 0x14a   : > { %v813_v13 = vpop.f32.mrf.mxu0  ;;  %v884_v14 = vpop.f32.mrf.mxu1 }
 0x14b   : > { %v814_v15 = vadd.f32 %v813_v13, %v741_v12  ;;  %v885_v16 = vadd.f32 %v884_v14, %v741_v12 }
 0x14c   : > { %v815_v17 = vpop.f32.mrf.mxu0  ;;  %v886_v18 = vpop.f32.mrf.mxu1 }
 0x14d   : > { %v889_v19 = vmax.f32 %v814_v15, 0.0  ;;  %v891_v20 = vmax.f32 %v885_v16, 0.0  ;;  %v816_v21 = vadd.f32 %v815_v17, %v741_v12  ;;  %v887_v22 = vadd.f32 %v886_v18, %v741_v12  ;;  %903 = sbr.rel (!%p2306_p6) target bundleno = 484 (0x1e4), region = 102 }
 0x14f   : > { %893 = vst [vmem:[%s2513_s26] sm:$0xff] %v889_v19  ;;  %895 = vst [vmem:[%s2513_s26 + $0x10] sm:$0xff] %v891_v20  ;;  %v890_v23 = vmax.f32 %v816_v21, 0.0  ;;  %v892_v24 = vmax.f32 %v887_v22, 0.0 }
 0x151   : > { %894 = vst [vmem:[%s2513_s26 + $0x8] sm:$0xff] %v890_v23  ;;  %896 = vst [vmem:[%s2513_s26 + $0x18] sm:$0xff] %v892_v24 }
 0x152   : > { %s2994_s9 = smov (!%p906_p11, %s905_s9), 4 }
 0x153   : > { %s1592_s10 = sshll.u32 %s2994_s9, 7  ;;  %s2528_s21 = sshll.u32 %s2994_s9, 3 }
 0x154   : > { %p1596_p12 = scmp.eq.s32.totalorder %s1592_s10, 0 }
 0x155   : > { %p918_p6 = scmp.lt.u32.totalorder (!%p1596_p12), %s2528_s21, 8 }
 0x156   : > { %917 = sbr.rel (%p1596_p12) target bundleno = 484 (0x1e4), region = 106 }
 0x15b   : > { %921 = sbr.rel (%p918_p6) target bundleno = 475 (0x1db), region = 110  ;;  %s2532_s14 = sand.u32 (!%p918_p6), 7, %s2528_s21  }
 0x15c   : > { %p938_p13 = scmp.eq.s32.totalorder (!%p918_p6), %s2532_s14, 0  ;;  %p1597_p0 = scmp.ne.s32.totalorder (!%p918_p6), %s2532_s14, 0 }
 0x160   : > { %941 = sbr.rel (%p1597_p0) target bundleno = 411 (0x19b), region = 125  ;;  %s942_s15 = sshrl.u32 (!%p1597_p0), %s2528_s21, 3 }
 0x161   : > { %s2539_s23 = sshrl.u32 (!%p1597_p0), %s942_s15, 6 }
 0x162   : > { %p1598_p1 = scmp.le.s32.totalorder (!%p1597_p0), %s2539_s23, 0 }
 0x165   : > { %1472 = sbr.rel (%p1598_p1) target bundleno = 395 (0x18b), region = 273  ;;  %s2965_s25 = smov (!%p1598_p1), %s2526_s30 }
 0x166   : > { %s2966_s5 = smov (!%p1598_p1), %s2513_s26  ;;  %s2548_s11 = smov (!%p1598_p1), 0  }
 0x167   : > { %s2550_s22 = smov (!%p1598_p1), 0  }
 0x16a LB: >> { %v955_v25 = vld [vmem:[%s2174_s5] sm:$0xff]  ;;  %v957_v26 = vld [vmem:[%s2174_s5 + $0x8] sm:$0xff]  ;;  %v959_v27 = vld [vmem:[%s2174_s5 + $0x10] sm:$0xff]  ;;  %s1083_s6 = sadd.s32 1, %s2178_s11  ;;  %s949_s22 = sadd.s32 1, %s2182_s22   ;;  %s2182_s22 = sphi %s2550_s22, %s949_s22   ;;  %s2178_s11 = sphi %s2548_s11, %s2969_s11   ;;  %s2174_s5 = sphi %s2966_s5, %s2968_s5   ;;  %s2170_s25 = sphi %s2965_s25, %s2967_s25  }
 0x16b   : >> { %956 = vst [vmem:[%s2170_s25] sm:$0xff] %v955_v25  ;;  %958 = vst [vmem:[%s2170_s25 + $0x8] sm:$0xff] %v957_v26  ;;  %v961_v28 = vld [vmem:[%s2174_s5 + $0x18] sm:$0xff]  ;;  %v963_v29 = vld [vmem:[%s2174_s5 + $0x20] sm:$0xff]  ;;  %p1084_p2 = scmp.ge.s32.totalorder %s1083_s6, %s2539_s23  ;;  %p948_p3 = scmp.ge.s32.totalorder %s949_s22, %s2539_s23 }
 0x16c   : >> { %960 = vst [vmem:[%s2170_s25 + $0x10] sm:$0xff] %v959_v27  ;;  %v965_v30 = vld [vmem:[%s2174_s5 + $0x28] sm:$0xff]  ;;  %962 = vst [vmem:[%s2170_s25 + $0x18] sm:$0xff] %v961_v28  ;;  %v967_v31 = vld [vmem:[%s2174_s5 + $0x30] sm:$0xff] }
 0x16d   : >> { %964 = vst [vmem:[%s2170_s25 + $0x20] sm:$0xff] %v963_v29  ;;  %966 = vst [vmem:[%s2170_s25 + $0x28] sm:$0xff] %v965_v30  ;;  %v969_v32 = vld [vmem:[%s2174_s5 + $0x38] sm:$0xff]  ;;  %v971_v33 = vld [vmem:[%s2174_s5 + $0x40] sm:$0xff]  ;;  %s2996_s6 = smov (%p1084_p2, %s1083_s6), 0 }
 0x16e   : >> { %968 = vst [vmem:[%s2170_s25 + $0x30] sm:$0xff] %v967_v31  ;;  %970 = vst [vmem:[%s2170_s25 + $0x38] sm:$0xff] %v969_v32  ;;  %v973_v34 = vld [vmem:[%s2174_s5 + $0x48] sm:$0xff]  ;;  %v975_v35 = vld [vmem:[%s2174_s5 + $0x50] sm:$0xff]  ;;  %s1599_s7 = sshll.u32 %s2996_s6, 9  ;;  %s2969_s11 = smov %s2996_s6 }
 0x16f   : >> { %972 = vst [vmem:[%s2170_s25 + $0x40] sm:$0xff] %v971_v33  ;;  %v977_v36 = vld [vmem:[%s2174_s5 + $0x58] sm:$0xff]  ;;  %974 = vst [vmem:[%s2170_s25 + $0x48] sm:$0xff] %v973_v34  ;;  %v979_v37 = vld [vmem:[%s2174_s5 + $0x60] sm:$0xff]  ;;  %s2606_s8 = scalar_lea.vmem %s2513_s26, %s1599_s7 [#allocation3]   ;;  %s2609_s12 = scalar_lea.vmem %s2526_s30, %s1599_s7  }
 0x170   : >> { %976 = vst [vmem:[%s2170_s25 + $0x50] sm:$0xff] %v975_v35  ;;  %978 = vst [vmem:[%s2170_s25 + $0x58] sm:$0xff] %v977_v36  ;;  %v981_v38 = vld [vmem:[%s2174_s5 + $0x68] sm:$0xff]  ;;  %v983_v39 = vld [vmem:[%s2174_s5 + $0x70] sm:$0xff] }
 0x171   : >> { %980 = vst [vmem:[%s2170_s25 + $0x60] sm:$0xff] %v979_v37  ;;  %982 = vst [vmem:[%s2170_s25 + $0x68] sm:$0xff] %v981_v38  ;;  %v985_v40 = vld [vmem:[%s2174_s5 + $0x78] sm:$0xff]  ;;  %v987_v41 = vld [vmem:[%s2174_s5 + $0x80] sm:$0xff] }
 0x172   : >> { %984 = vst [vmem:[%s2170_s25 + $0x70] sm:$0xff] %v983_v39  ;;  %v989_v42 = vld [vmem:[%s2174_s5 + $0x88] sm:$0xff]  ;;  %986 = vst [vmem:[%s2170_s25 + $0x78] sm:$0xff] %v985_v40  ;;  %v991_v43 = vld [vmem:[%s2174_s5 + $0x90] sm:$0xff] }
 0x173   : >> { %988 = vst [vmem:[%s2170_s25 + $0x80] sm:$0xff] %v987_v41  ;;  %990 = vst [vmem:[%s2170_s25 + $0x88] sm:$0xff] %v989_v42  ;;  %v993_v44 = vld [vmem:[%s2174_s5 + $0x98] sm:$0xff]  ;;  %v995_v45 = vld [vmem:[%s2174_s5 + $0xa0] sm:$0xff] }
 0x174   : >> { %992 = vst [vmem:[%s2170_s25 + $0x90] sm:$0xff] %v991_v43  ;;  %994 = vst [vmem:[%s2170_s25 + $0x98] sm:$0xff] %v993_v44  ;;  %v997_v46 = vld [vmem:[%s2174_s5 + $0xa8] sm:$0xff]  ;;  %v999_v47 = vld [vmem:[%s2174_s5 + $0xb0] sm:$0xff] }
 0x175   : >> { %996 = vst [vmem:[%s2170_s25 + $0xa0] sm:$0xff] %v995_v45  ;;  %v1001_v48 = vld [vmem:[%s2174_s5 + $0xb8] sm:$0xff]  ;;  %998 = vst [vmem:[%s2170_s25 + $0xa8] sm:$0xff] %v997_v46  ;;  %v1003_v49 = vld [vmem:[%s2174_s5 + $0xc0] sm:$0xff] }
 0x176   : >> { %1000 = vst [vmem:[%s2170_s25 + $0xb0] sm:$0xff] %v999_v47  ;;  %1002 = vst [vmem:[%s2170_s25 + $0xb8] sm:$0xff] %v1001_v48  ;;  %v1005_v50 = vld [vmem:[%s2174_s5 + $0xc8] sm:$0xff]  ;;  %v1007_v51 = vld [vmem:[%s2174_s5 + $0xd0] sm:$0xff] }
 0x177   : >> { %1004 = vst [vmem:[%s2170_s25 + $0xc0] sm:$0xff] %v1003_v49  ;;  %1006 = vst [vmem:[%s2170_s25 + $0xc8] sm:$0xff] %v1005_v50  ;;  %v1009_v52 = vld [vmem:[%s2174_s5 + $0xd8] sm:$0xff]  ;;  %v1011_v53 = vld [vmem:[%s2174_s5 + $0xe0] sm:$0xff] }
 0x178   : >> { %1008 = vst [vmem:[%s2170_s25 + $0xd0] sm:$0xff] %v1007_v51  ;;  %v1013_v54 = vld [vmem:[%s2174_s5 + $0xe8] sm:$0xff]  ;;  %1010 = vst [vmem:[%s2170_s25 + $0xd8] sm:$0xff] %v1009_v52  ;;  %v1015_v55 = vld [vmem:[%s2174_s5 + $0xf0] sm:$0xff] }
 0x179   : >> { %1012 = vst [vmem:[%s2170_s25 + $0xe0] sm:$0xff] %v1011_v53  ;;  %1014 = vst [vmem:[%s2170_s25 + $0xe8] sm:$0xff] %v1013_v54  ;;  %v1017_v56 = vld [vmem:[%s2174_s5 + $0xf8] sm:$0xff]  ;;  %v1019_v57 = vld [vmem:[%s2174_s5 + $0x100] sm:$0xff] }
 0x17a   : >> { %1016 = vst [vmem:[%s2170_s25 + $0xf0] sm:$0xff] %v1015_v55  ;;  %1018 = vst [vmem:[%s2170_s25 + $0xf8] sm:$0xff] %v1017_v56  ;;  %v1021_v58 = vld [vmem:[%s2174_s5 + $0x108] sm:$0xff]  ;;  %v1023_v59 = vld [vmem:[%s2174_s5 + $0x110] sm:$0xff] }
 0x17b   : >> { %1020 = vst [vmem:[%s2170_s25 + $0x100] sm:$0xff] %v1019_v57  ;;  %v1025_v60 = vld [vmem:[%s2174_s5 + $0x118] sm:$0xff]  ;;  %1022 = vst [vmem:[%s2170_s25 + $0x108] sm:$0xff] %v1021_v58  ;;  %v1027_v61 = vld [vmem:[%s2174_s5 + $0x120] sm:$0xff] }
 0x17c   : >> { %1024 = vst [vmem:[%s2170_s25 + $0x110] sm:$0xff] %v1023_v59  ;;  %1026 = vst [vmem:[%s2170_s25 + $0x118] sm:$0xff] %v1025_v60  ;;  %v1029_v62 = vld [vmem:[%s2174_s5 + $0x128] sm:$0xff]  ;;  %v1031_v63 = vld [vmem:[%s2174_s5 + $0x130] sm:$0xff] }
 0x17d   : >> { %1028 = vst [vmem:[%s2170_s25 + $0x120] sm:$0xff] %v1027_v61  ;;  %1030 = vst [vmem:[%s2170_s25 + $0x128] sm:$0xff] %v1029_v62  ;;  %v1033_v0 = vld [vmem:[%s2174_s5 + $0x138] sm:$0xff]  ;;  %v1035_v1 = vld [vmem:[%s2174_s5 + $0x140] sm:$0xff] }
 0x17e   : >> { %1032 = vst [vmem:[%s2170_s25 + $0x130] sm:$0xff] %v1031_v63  ;;  %v1037_v2 = vld [vmem:[%s2174_s5 + $0x148] sm:$0xff]  ;;  %1034 = vst [vmem:[%s2170_s25 + $0x138] sm:$0xff] %v1033_v0  ;;  %v1039_v3 = vld [vmem:[%s2174_s5 + $0x150] sm:$0xff] }
 0x17f   : >> { %1036 = vst [vmem:[%s2170_s25 + $0x140] sm:$0xff] %v1035_v1  ;;  %1038 = vst [vmem:[%s2170_s25 + $0x148] sm:$0xff] %v1037_v2  ;;  %v1041_v4 = vld [vmem:[%s2174_s5 + $0x158] sm:$0xff]  ;;  %v1043_v5 = vld [vmem:[%s2174_s5 + $0x160] sm:$0xff] }
 0x180   : >> { %1040 = vst [vmem:[%s2170_s25 + $0x150] sm:$0xff] %v1039_v3  ;;  %1042 = vst [vmem:[%s2170_s25 + $0x158] sm:$0xff] %v1041_v4  ;;  %v1045_v6 = vld [vmem:[%s2174_s5 + $0x168] sm:$0xff]  ;;  %v1047_v7 = vld [vmem:[%s2174_s5 + $0x170] sm:$0xff] }
 0x181   : >> { %1044 = vst [vmem:[%s2170_s25 + $0x160] sm:$0xff] %v1043_v5  ;;  %v1049_v8 = vld [vmem:[%s2174_s5 + $0x178] sm:$0xff]  ;;  %1046 = vst [vmem:[%s2170_s25 + $0x168] sm:$0xff] %v1045_v6  ;;  %v1051_v9 = vld [vmem:[%s2174_s5 + $0x180] sm:$0xff] }
 0x182   : >> { %1048 = vst [vmem:[%s2170_s25 + $0x170] sm:$0xff] %v1047_v7  ;;  %1050 = vst [vmem:[%s2170_s25 + $0x178] sm:$0xff] %v1049_v8  ;;  %v1053_v10 = vld [vmem:[%s2174_s5 + $0x188] sm:$0xff]  ;;  %v1055_v11 = vld [vmem:[%s2174_s5 + $0x190] sm:$0xff] }
 0x183   : >> { %1052 = vst [vmem:[%s2170_s25 + $0x180] sm:$0xff] %v1051_v9  ;;  %1054 = vst [vmem:[%s2170_s25 + $0x188] sm:$0xff] %v1053_v10  ;;  %v1057_v12 = vld [vmem:[%s2174_s5 + $0x198] sm:$0xff]  ;;  %v1059_v13 = vld [vmem:[%s2174_s5 + $0x1a0] sm:$0xff] }
 0x184   : >> { %1056 = vst [vmem:[%s2170_s25 + $0x190] sm:$0xff] %v1055_v11  ;;  %v1061_v14 = vld [vmem:[%s2174_s5 + $0x1a8] sm:$0xff]  ;;  %1058 = vst [vmem:[%s2170_s25 + $0x198] sm:$0xff] %v1057_v12  ;;  %v1063_v15 = vld [vmem:[%s2174_s5 + $0x1b0] sm:$0xff] }
 0x185   : >> { %1060 = vst [vmem:[%s2170_s25 + $0x1a0] sm:$0xff] %v1059_v13  ;;  %1062 = vst [vmem:[%s2170_s25 + $0x1a8] sm:$0xff] %v1061_v14  ;;  %v1065_v16 = vld [vmem:[%s2174_s5 + $0x1b8] sm:$0xff]  ;;  %v1067_v17 = vld [vmem:[%s2174_s5 + $0x1c0] sm:$0xff] }
 0x186   : >> { %1064 = vst [vmem:[%s2170_s25 + $0x1b0] sm:$0xff] %v1063_v15  ;;  %1066 = vst [vmem:[%s2170_s25 + $0x1b8] sm:$0xff] %v1065_v16  ;;  %v1069_v18 = vld [vmem:[%s2174_s5 + $0x1c8] sm:$0xff]  ;;  %v1071_v19 = vld [vmem:[%s2174_s5 + $0x1d0] sm:$0xff]  ;;  %951 = sbr.rel (!%p948_p3) target bundleno = 362 (0x16a), region = 279 }
 0x187   : >> { %1068 = vst [vmem:[%s2170_s25 + $0x1c0] sm:$0xff] %v1067_v17  ;;  %v1073_v20 = vld [vmem:[%s2174_s5 + $0x1d8] sm:$0xff]  ;;  %1070 = vst [vmem:[%s2170_s25 + $0x1c8] sm:$0xff] %v1069_v18  ;;  %v1075_v21 = vld [vmem:[%s2174_s5 + $0x1e0] sm:$0xff] }
 0x188   : >> { %1072 = vst [vmem:[%s2170_s25 + $0x1d0] sm:$0xff] %v1071_v19  ;;  %1074 = vst [vmem:[%s2170_s25 + $0x1d8] sm:$0xff] %v1073_v20  ;;  %v1077_v22 = vld [vmem:[%s2174_s5 + $0x1e8] sm:$0xff]  ;;  %v1079_v23 = vld [vmem:[%s2174_s5 + $0x1f0] sm:$0xff] }
 0x189   : >> { %1076 = vst [vmem:[%s2170_s25 + $0x1e0] sm:$0xff] %v1075_v21  ;;  %1078 = vst [vmem:[%s2170_s25 + $0x1e8] sm:$0xff] %v1077_v22  ;;  %v1081_v24 = vld [vmem:[%s2174_s5 + $0x1f8] sm:$0xff]  ;;  %s2968_s5 = smov %s2606_s8 }
 0x18a   : >> { %1080 = vst [vmem:[%s2170_s25 + $0x1f0] sm:$0xff] %v1079_v23  ;;  %1082 = vst [vmem:[%s2170_s25 + $0x1f8] sm:$0xff] %v1081_v24  ;;  %s2967_s25 = smov %s2609_s12 }
 0x18b PF: > { %s2715_s29 = sand.u32 63, %s942_s15   ;;  %s1625_s9 = sshll.u32 %s2539_s23, 13 }
 0x18c   : > { %s1094_s28 = sshra.s32 %s1625_s9, 4  ;;  %p1604_p4 = scmp.le.s32.totalorder %s2715_s29, 0 }
 0x18d   : > { %s1095_s4 = scalar_lea.vmem %s2513_s26, %s1094_s28 [#allocation3]   ;;  %s1098_s2 = scalar_lea.vmem %s2526_s30, %s1094_s28  }
 0x18e   : > { %1486 = sbr.rel (%p1604_p4) target bundleno = 411 (0x19b), region = 284  ;;  %s2184_s24 = smov (!%p1604_p4), %s1098_s2  }
 0x18f   : > { %s2188_s10 = smov (!%p1604_p4), %s1095_s4   ;;  %s2192_s6 = smov (!%p1604_p4), 0  }
 0x190   : > { %s2196_s22 = smov (!%p1604_p4), 0  }
 0x193 LB: >> { %v1110_v25 = vld [vmem:[%s2190_s10] sm:$0xff]  ;;  %s1112_s15 = sadd.s32 1, %s2194_s6  ;;  %s1104_s22 = sadd.s32 1, %s2198_s22   ;;  %s2198_s22 = sphi %s2196_s22, %s1104_s22   ;;  %s2194_s6 = sphi %s2192_s6, %s2193_s6   ;;  %s2190_s10 = sphi %s2188_s10, %s1117_s10   ;;  %s2186_s24 = sphi %s2184_s24, %s1118_s24  }
 0x194   : >> { %1111 = vst [vmem:[%s2186_s24] sm:$0xff] %v1110_v25  ;;  %p1113_p5 = scmp.ge.s32.totalorder %s1112_s15, %s2715_s29  ;;  %p1103_p7 = scmp.ge.s32.totalorder %s1104_s22, %s2715_s29 }
 0x196   : >> { %s2998_s15 = smov (%p1113_p5, %s1112_s15), 0  ;;  %1106 = sbr.rel (!%p1103_p7) target bundleno = 403 (0x193), region = 290 }
 0x197   : >> { %s1605_s23 = sshll.u32 %s2998_s15, 3  ;;  %s2193_s6 = smov %s2998_s15  }
 0x198   : >> { %s1117_s10 = scalar_lea.vmem %s1095_s4, %s1605_s23 [#allocation3]   ;;  %s1118_s24 = scalar_lea.vmem %s1098_s2, %s1605_s23  }
 0x19b PF: > { %1121 = sbr.rel (%p938_p13) target bundleno = 475 (0x1db), region = 143  ;;  %s2727_s25 = ssub.s32 (!%p938_p13), %s2528_s21, %s2532_s14 }
 0x19c   : > { %s1127_s5 = sshrl.u32 (!%p938_p13), %s2528_s21, 3  ;;  %s1124_s11 = scalar_lea.vmem (!%p938_p13), %s2513_s26, %s2727_s25 [#allocation3] }
 0x19d   : > { %s1126_s7 = scalar_lea.vmem (!%p938_p13), %s2526_s30, %s2727_s25  ;;  %s2736_s8 = sshrl.u32 (!%p938_p13), %s1127_s5, 6 }
 0x19e   : > { %p1607_p8 = scmp.le.s32.totalorder (!%p938_p13), %s2736_s8, 0 }
 0x1a0   : > { %1500 = sbr.rel (%p1607_p8) target bundleno = 454 (0x1c6), region = 295  ;;  %s2970_s12 = smov (!%p1607_p8), %s2526_s30 }
 0x1a1   : > { %s2971_s29 = smov (!%p1607_p8), %s2513_s26  ;;  %s2745_s9 = smov (!%p1607_p8), 0  }
 0x1a2   : > { %s2747_s28 = smov (!%p1607_p8), 0  }
 0x1a5 LB: >> { %v1140_v26 = vld [vmem:[%s2206_s29] sm:$0xff]  ;;  %v1142_v27 = vld [vmem:[%s2206_s29 + $0x8] sm:$0xff]  ;;  %v1144_v28 = vld [vmem:[%s2206_s29 + $0x10] sm:$0xff]  ;;  %s1268_s4 = sadd.s32 1, %s2210_s9  ;;  %s1134_s28 = sadd.s32 1, %s2214_s28   ;;  %s2214_s28 = sphi %s2747_s28, %s1134_s28   ;;  %s2210_s9 = sphi %s2745_s9, %s2974_s9   ;;  %s2206_s29 = sphi %s2971_s29, %s2973_s29   ;;  %s2202_s12 = sphi %s2970_s12, %s2972_s12  }
 0x1a6   : >> { %1141 = vst [vmem:[%s2202_s12] sm:$0xff] %v1140_v26  ;;  %1143 = vst [vmem:[%s2202_s12 + $0x8] sm:$0xff] %v1142_v27  ;;  %v1146_v29 = vld [vmem:[%s2206_s29 + $0x18] sm:$0xff]  ;;  %v1148_v30 = vld [vmem:[%s2206_s29 + $0x20] sm:$0xff]  ;;  %p1269_p9 = scmp.ge.s32.totalorder %s1268_s4, %s2736_s8  ;;  %p1133_p10 = scmp.ge.s32.totalorder %s1134_s28, %s2736_s8 }
 0x1a7   : >> { %1145 = vst [vmem:[%s2202_s12 + $0x10] sm:$0xff] %v1144_v28  ;;  %v1150_v31 = vld [vmem:[%s2206_s29 + $0x28] sm:$0xff]  ;;  %1147 = vst [vmem:[%s2202_s12 + $0x18] sm:$0xff] %v1146_v29  ;;  %v1152_v32 = vld [vmem:[%s2206_s29 + $0x30] sm:$0xff] }
 0x1a8   : >> { %1149 = vst [vmem:[%s2202_s12 + $0x20] sm:$0xff] %v1148_v30  ;;  %1151 = vst [vmem:[%s2202_s12 + $0x28] sm:$0xff] %v1150_v31  ;;  %v1154_v33 = vld [vmem:[%s2206_s29 + $0x38] sm:$0xff]  ;;  %v1156_v34 = vld [vmem:[%s2206_s29 + $0x40] sm:$0xff]  ;;  %s3000_s4 = smov (%p1269_p9, %s1268_s4), 0 }
 0x1a9   : >> { %1153 = vst [vmem:[%s2202_s12 + $0x30] sm:$0xff] %v1152_v32  ;;  %1155 = vst [vmem:[%s2202_s12 + $0x38] sm:$0xff] %v1154_v33  ;;  %v1158_v35 = vld [vmem:[%s2206_s29 + $0x48] sm:$0xff]  ;;  %v1160_v36 = vld [vmem:[%s2206_s29 + $0x50] sm:$0xff]  ;;  %s1608_s2 = sshll.u32 %s3000_s4, 9  ;;  %s2974_s9 = smov %s3000_s4 }
 0x1aa   : >> { %1157 = vst [vmem:[%s2202_s12 + $0x40] sm:$0xff] %v1156_v34  ;;  %v1162_v37 = vld [vmem:[%s2206_s29 + $0x58] sm:$0xff]  ;;  %1159 = vst [vmem:[%s2202_s12 + $0x48] sm:$0xff] %v1158_v35  ;;  %v1164_v38 = vld [vmem:[%s2206_s29 + $0x60] sm:$0xff]  ;;  %s2803_s24 = scalar_lea.vmem %s2513_s26, %s1608_s2 [#allocation3]   ;;  %s2806_s10 = scalar_lea.vmem %s2526_s30, %s1608_s2  }
 0x1ab   : >> { %1161 = vst [vmem:[%s2202_s12 + $0x50] sm:$0xff] %v1160_v36  ;;  %1163 = vst [vmem:[%s2202_s12 + $0x58] sm:$0xff] %v1162_v37  ;;  %v1166_v39 = vld [vmem:[%s2206_s29 + $0x68] sm:$0xff]  ;;  %v1168_v40 = vld [vmem:[%s2206_s29 + $0x70] sm:$0xff] }
 0x1ac   : >> { %1165 = vst [vmem:[%s2202_s12 + $0x60] sm:$0xff] %v1164_v38  ;;  %1167 = vst [vmem:[%s2202_s12 + $0x68] sm:$0xff] %v1166_v39  ;;  %v1170_v41 = vld [vmem:[%s2206_s29 + $0x78] sm:$0xff]  ;;  %v1172_v42 = vld [vmem:[%s2206_s29 + $0x80] sm:$0xff] }
 0x1ad   : >> { %1169 = vst [vmem:[%s2202_s12 + $0x70] sm:$0xff] %v1168_v40  ;;  %v1174_v43 = vld [vmem:[%s2206_s29 + $0x88] sm:$0xff]  ;;  %1171 = vst [vmem:[%s2202_s12 + $0x78] sm:$0xff] %v1170_v41  ;;  %v1176_v44 = vld [vmem:[%s2206_s29 + $0x90] sm:$0xff] }
 0x1ae   : >> { %1173 = vst [vmem:[%s2202_s12 + $0x80] sm:$0xff] %v1172_v42  ;;  %1175 = vst [vmem:[%s2202_s12 + $0x88] sm:$0xff] %v1174_v43  ;;  %v1178_v45 = vld [vmem:[%s2206_s29 + $0x98] sm:$0xff]  ;;  %v1180_v46 = vld [vmem:[%s2206_s29 + $0xa0] sm:$0xff] }
 0x1af   : >> { %1177 = vst [vmem:[%s2202_s12 + $0x90] sm:$0xff] %v1176_v44  ;;  %1179 = vst [vmem:[%s2202_s12 + $0x98] sm:$0xff] %v1178_v45  ;;  %v1182_v47 = vld [vmem:[%s2206_s29 + $0xa8] sm:$0xff]  ;;  %v1184_v48 = vld [vmem:[%s2206_s29 + $0xb0] sm:$0xff] }
 0x1b0   : >> { %1181 = vst [vmem:[%s2202_s12 + $0xa0] sm:$0xff] %v1180_v46  ;;  %v1186_v49 = vld [vmem:[%s2206_s29 + $0xb8] sm:$0xff]  ;;  %1183 = vst [vmem:[%s2202_s12 + $0xa8] sm:$0xff] %v1182_v47  ;;  %v1188_v50 = vld [vmem:[%s2206_s29 + $0xc0] sm:$0xff] }
 0x1b1   : >> { %1185 = vst [vmem:[%s2202_s12 + $0xb0] sm:$0xff] %v1184_v48  ;;  %1187 = vst [vmem:[%s2202_s12 + $0xb8] sm:$0xff] %v1186_v49  ;;  %v1190_v51 = vld [vmem:[%s2206_s29 + $0xc8] sm:$0xff]  ;;  %v1192_v52 = vld [vmem:[%s2206_s29 + $0xd0] sm:$0xff] }
 0x1b2   : >> { %1189 = vst [vmem:[%s2202_s12 + $0xc0] sm:$0xff] %v1188_v50  ;;  %1191 = vst [vmem:[%s2202_s12 + $0xc8] sm:$0xff] %v1190_v51  ;;  %v1194_v53 = vld [vmem:[%s2206_s29 + $0xd8] sm:$0xff]  ;;  %v1196_v54 = vld [vmem:[%s2206_s29 + $0xe0] sm:$0xff] }
 0x1b3   : >> { %1193 = vst [vmem:[%s2202_s12 + $0xd0] sm:$0xff] %v1192_v52  ;;  %v1198_v55 = vld [vmem:[%s2206_s29 + $0xe8] sm:$0xff]  ;;  %1195 = vst [vmem:[%s2202_s12 + $0xd8] sm:$0xff] %v1194_v53  ;;  %v1200_v56 = vld [vmem:[%s2206_s29 + $0xf0] sm:$0xff] }
 0x1b4   : >> { %1197 = vst [vmem:[%s2202_s12 + $0xe0] sm:$0xff] %v1196_v54  ;;  %1199 = vst [vmem:[%s2202_s12 + $0xe8] sm:$0xff] %v1198_v55  ;;  %v1202_v57 = vld [vmem:[%s2206_s29 + $0xf8] sm:$0xff]  ;;  %v1204_v58 = vld [vmem:[%s2206_s29 + $0x100] sm:$0xff] }
 0x1b5   : >> { %1201 = vst [vmem:[%s2202_s12 + $0xf0] sm:$0xff] %v1200_v56  ;;  %1203 = vst [vmem:[%s2202_s12 + $0xf8] sm:$0xff] %v1202_v57  ;;  %v1206_v59 = vld [vmem:[%s2206_s29 + $0x108] sm:$0xff]  ;;  %v1208_v60 = vld [vmem:[%s2206_s29 + $0x110] sm:$0xff] }
 0x1b6   : >> { %1205 = vst [vmem:[%s2202_s12 + $0x100] sm:$0xff] %v1204_v58  ;;  %v1210_v61 = vld [vmem:[%s2206_s29 + $0x118] sm:$0xff]  ;;  %1207 = vst [vmem:[%s2202_s12 + $0x108] sm:$0xff] %v1206_v59  ;;  %v1212_v62 = vld [vmem:[%s2206_s29 + $0x120] sm:$0xff] }
 0x1b7   : >> { %1209 = vst [vmem:[%s2202_s12 + $0x110] sm:$0xff] %v1208_v60  ;;  %1211 = vst [vmem:[%s2202_s12 + $0x118] sm:$0xff] %v1210_v61  ;;  %v1214_v63 = vld [vmem:[%s2206_s29 + $0x128] sm:$0xff]  ;;  %v1216_v0 = vld [vmem:[%s2206_s29 + $0x130] sm:$0xff] }
 0x1b8   : >> { %1213 = vst [vmem:[%s2202_s12 + $0x120] sm:$0xff] %v1212_v62  ;;  %1215 = vst [vmem:[%s2202_s12 + $0x128] sm:$0xff] %v1214_v63  ;;  %v1218_v1 = vld [vmem:[%s2206_s29 + $0x138] sm:$0xff]  ;;  %v1220_v2 = vld [vmem:[%s2206_s29 + $0x140] sm:$0xff] }
 0x1b9   : >> { %1217 = vst [vmem:[%s2202_s12 + $0x130] sm:$0xff] %v1216_v0  ;;  %v1222_v3 = vld [vmem:[%s2206_s29 + $0x148] sm:$0xff]  ;;  %1219 = vst [vmem:[%s2202_s12 + $0x138] sm:$0xff] %v1218_v1  ;;  %v1224_v4 = vld [vmem:[%s2206_s29 + $0x150] sm:$0xff] }
 0x1ba   : >> { %1221 = vst [vmem:[%s2202_s12 + $0x140] sm:$0xff] %v1220_v2  ;;  %1223 = vst [vmem:[%s2202_s12 + $0x148] sm:$0xff] %v1222_v3  ;;  %v1226_v5 = vld [vmem:[%s2206_s29 + $0x158] sm:$0xff]  ;;  %v1228_v6 = vld [vmem:[%s2206_s29 + $0x160] sm:$0xff] }
 0x1bb   : >> { %1225 = vst [vmem:[%s2202_s12 + $0x150] sm:$0xff] %v1224_v4  ;;  %1227 = vst [vmem:[%s2202_s12 + $0x158] sm:$0xff] %v1226_v5  ;;  %v1230_v7 = vld [vmem:[%s2206_s29 + $0x168] sm:$0xff]  ;;  %v1232_v8 = vld [vmem:[%s2206_s29 + $0x170] sm:$0xff] }
 0x1bc   : >> { %1229 = vst [vmem:[%s2202_s12 + $0x160] sm:$0xff] %v1228_v6  ;;  %v1234_v9 = vld [vmem:[%s2206_s29 + $0x178] sm:$0xff]  ;;  %1231 = vst [vmem:[%s2202_s12 + $0x168] sm:$0xff] %v1230_v7  ;;  %v1236_v10 = vld [vmem:[%s2206_s29 + $0x180] sm:$0xff] }
 0x1bd   : >> { %1233 = vst [vmem:[%s2202_s12 + $0x170] sm:$0xff] %v1232_v8  ;;  %1235 = vst [vmem:[%s2202_s12 + $0x178] sm:$0xff] %v1234_v9  ;;  %v1238_v11 = vld [vmem:[%s2206_s29 + $0x188] sm:$0xff]  ;;  %v1240_v12 = vld [vmem:[%s2206_s29 + $0x190] sm:$0xff] }
 0x1be   : >> { %1237 = vst [vmem:[%s2202_s12 + $0x180] sm:$0xff] %v1236_v10  ;;  %1239 = vst [vmem:[%s2202_s12 + $0x188] sm:$0xff] %v1238_v11  ;;  %v1242_v13 = vld [vmem:[%s2206_s29 + $0x198] sm:$0xff]  ;;  %v1244_v14 = vld [vmem:[%s2206_s29 + $0x1a0] sm:$0xff] }
 0x1bf   : >> { %1241 = vst [vmem:[%s2202_s12 + $0x190] sm:$0xff] %v1240_v12  ;;  %v1246_v15 = vld [vmem:[%s2206_s29 + $0x1a8] sm:$0xff]  ;;  %1243 = vst [vmem:[%s2202_s12 + $0x198] sm:$0xff] %v1242_v13  ;;  %v1248_v16 = vld [vmem:[%s2206_s29 + $0x1b0] sm:$0xff] }
 0x1c0   : >> { %1245 = vst [vmem:[%s2202_s12 + $0x1a0] sm:$0xff] %v1244_v14  ;;  %1247 = vst [vmem:[%s2202_s12 + $0x1a8] sm:$0xff] %v1246_v15  ;;  %v1250_v17 = vld [vmem:[%s2206_s29 + $0x1b8] sm:$0xff]  ;;  %v1252_v18 = vld [vmem:[%s2206_s29 + $0x1c0] sm:$0xff] }
 0x1c1   : >> { %1249 = vst [vmem:[%s2202_s12 + $0x1b0] sm:$0xff] %v1248_v16  ;;  %1251 = vst [vmem:[%s2202_s12 + $0x1b8] sm:$0xff] %v1250_v17  ;;  %v1254_v19 = vld [vmem:[%s2206_s29 + $0x1c8] sm:$0xff]  ;;  %v1256_v20 = vld [vmem:[%s2206_s29 + $0x1d0] sm:$0xff]  ;;  %1136 = sbr.rel (!%p1133_p10) target bundleno = 421 (0x1a5), region = 301 }
 0x1c2   : >> { %1253 = vst [vmem:[%s2202_s12 + $0x1c0] sm:$0xff] %v1252_v18  ;;  %v1258_v21 = vld [vmem:[%s2206_s29 + $0x1d8] sm:$0xff]  ;;  %1255 = vst [vmem:[%s2202_s12 + $0x1c8] sm:$0xff] %v1254_v19  ;;  %v1260_v22 = vld [vmem:[%s2206_s29 + $0x1e0] sm:$0xff] }
 0x1c3   : >> { %1257 = vst [vmem:[%s2202_s12 + $0x1d0] sm:$0xff] %v1256_v20  ;;  %1259 = vst [vmem:[%s2202_s12 + $0x1d8] sm:$0xff] %v1258_v21  ;;  %v1262_v23 = vld [vmem:[%s2206_s29 + $0x1e8] sm:$0xff]  ;;  %v1264_v24 = vld [vmem:[%s2206_s29 + $0x1f0] sm:$0xff] }
 0x1c4   : >> { %1261 = vst [vmem:[%s2202_s12 + $0x1e0] sm:$0xff] %v1260_v22  ;;  %1263 = vst [vmem:[%s2202_s12 + $0x1e8] sm:$0xff] %v1262_v23  ;;  %v1266_v25 = vld [vmem:[%s2206_s29 + $0x1f8] sm:$0xff]  ;;  %s2973_s29 = smov %s2803_s24 }
 0x1c5   : >> { %1265 = vst [vmem:[%s2202_s12 + $0x1f0] sm:$0xff] %v1264_v24  ;;  %1267 = vst [vmem:[%s2202_s12 + $0x1f8] sm:$0xff] %v1266_v25  ;;  %s2972_s12 = smov %s2806_s10 }
 0x1c6 PF: > { %s2912_s6 = sand.u32 63, %s1127_s5   ;;  %s1627_s22 = sshll.u32 %s2736_s8, 13 }
 0x1c7   : > { %s1279_s15 = sshra.s32 %s1627_s22, 4  ;;  %p1613_p11 = scmp.le.s32.totalorder %s2912_s6, 0 }
 0x1c8   : > { %s1280_s23 = scalar_lea.vmem %s2513_s26, %s1279_s15 [#allocation3]   ;;  %s1283_s2 = scalar_lea.vmem %s2526_s30, %s1279_s15  }
 0x1c9   : > { %1514 = sbr.rel (%p1613_p11) target bundleno = 470 (0x1d6), region = 306  ;;  %s2216_s24 = smov (!%p1613_p11), %s1283_s2  }
 0x1ca   : > { %s2220_s4 = smov (!%p1613_p11), %s1280_s23   ;;  %s2224_s10 = smov (!%p1613_p11), 0  }
 0x1cb   : > { %s2228_s28 = smov (!%p1613_p11), 0  }
 0x1ce LB: >> { %v1295_v26 = vld [vmem:[%s2222_s4] sm:$0xff]  ;;  %s1297_s5 = sadd.s32 1, %s2226_s10  ;;  %s1289_s28 = sadd.s32 1, %s2230_s28   ;;  %s2230_s28 = sphi %s2228_s28, %s1289_s28   ;;  %s2226_s10 = sphi %s2224_s10, %s2225_s10   ;;  %s2222_s4 = sphi %s2220_s4, %s1302_s4   ;;  %s2218_s24 = sphi %s2216_s24, %s1303_s24  }
 0x1cf   : >> { %1296 = vst [vmem:[%s2218_s24] sm:$0xff] %v1295_v26  ;;  %p1298_p12 = scmp.ge.s32.totalorder %s1297_s5, %s2912_s6  ;;  %p1288_p6 = scmp.ge.s32.totalorder %s1289_s28, %s2912_s6 }
 0x1d1   : >> { %s3002_s5 = smov (%p1298_p12, %s1297_s5), 0  ;;  %1291 = sbr.rel (!%p1288_p6) target bundleno = 462 (0x1ce), region = 312 }
 0x1d2   : >> { %s1614_s8 = sshll.u32 %s3002_s5, 3  ;;  %s2225_s10 = smov %s3002_s5  }
 0x1d3   : >> { %s1302_s4 = scalar_lea.vmem %s1280_s23, %s1614_s8 [#allocation3]   ;;  %s1303_s24 = scalar_lea.vmem %s1283_s2, %s1614_s8  }
 0x1d6 PF: > { %s2236_s12 = smov 1  }
 0x1d7   : > { %s1304_s29 = sshll.u32 %s2236_s12, %s2532_s14 }
 0x1d8   : > { %s1616_s9 = sadd.s32 4294967295, %s1304_s29 }
 0x1d9   : > { %v1314_v27 = vld [vmem:[%s1124_s11] sm:%s1616_s9] }
 0x1da   : > { %1315 = vst [vmem:[%s1126_s7] sm:%s1616_s9] %v1314_v27 }
 0x1db PF: > { %p1617_p13 = scmp.ge.u32.totalorder %s2528_s21, 8 }
 0x1dc   : > { %s2237_s22 = smov (!%p1617_p13), 1  }
 0x1dd   : > { %924 = sbr.rel (%p1617_p13) target bundleno = 484 (0x1e4), region = 114  ;;  %s925_s6 = sshll.u32 (!%p1617_p13), %s2237_s22, %s2528_s21 }
 0x1de   : > { %s1618_s15 = sadd.s32 (!%p1617_p13), 4294967295, %s925_s6 }
 0x1e2   : > { %v935_v28 = vld [vmem:[%s2513_s26] sm:%s1618_s15] }
 0x1e3   : > { %936 = vst [vmem:[%s2526_s30] sm:%s1618_s15] %v935_v28 }
 0x1e4 PF: > { %s13_s18 = sadd.s32 1, %s2134_s18   ;;  %s2975_s12 = smov %s2114_s13 }
 0x1e5   : > { %p10_p0 = scmp.ge.s32.totalorder %s13_s18, 8   ;;  %s2976_s13 = smov %s2314_s27 }
 0x1e6   : > { %s2977_s14 = smov %s2126_s16  ;;  %s2978_s15 = smov %s2130_s17 }
 0x1e7   : > { %s2979_s16 = smov %s2982_s19  ;;  %s2980_s17 = smov %s2986_s20 }
 0x1e8   :  { %12 = sbr.rel (!%p10_p0) target bundleno = 6 (0x6), region = 323 }

// kernel: pixel_decoder_forward.7
= control target key start
LH: loop header
LB: loop body
LE: loop exit
PB: predicated region body
PF: predicated region fallthrough
CT: control target
= control target key end

     0   :  { %s733_s12 = smov 0   ;;  %s735_s13 = smov 0   ;;  %s943_s0 = inlined_call_operand.vmem [shape: f32[8,72], index: 0, kind: input, shape index: {}]   ;;  %s944_s1 = inlined_call_operand.vmem [shape: f32[8,1], index: 1, kind: input, shape index: {}]   ;;  %s945_s2 = inlined_call_operand.vmem [shape: f32[2,72,1521], index: 2, kind: input, shape index: {}]   ;;  %s946_s3 = inlined_call_operand.vmem [shape: f32[2,8,1521], index: 3, kind: output, shape index: {}]  }
   0x1   :  { %s737_s14 = smov 0   ;;  %s739_s15 = smov 0  }
   0x2   :  { %s741_s16 = smov 0   ;;  %s743_s17 = smov 0  }
   0x3   :  { %s745_s18 = smov 0  }
   0x4 LB: > { %s22_s19 = sadd.s32 1, %s701_s16  ;;  %s25_s20 = sadd.s32 1, %s705_s17  ;;  %s709_s18 = sphi %s745_s18, %s13_s18   ;;  %s705_s17 = sphi %s743_s17, %s952_s17   ;;  %s701_s16 = sphi %s741_s16, %s951_s16   ;;  %s697_s15 = sphi %s739_s15, %s950_s15   ;;  %s693_s14 = sphi %s737_s14, %s949_s14   ;;  %s689_s13 = sphi %s735_s13, %s948_s13   ;;  %s685_s12 = sphi %s733_s12, %s947_s12  }
   0x5   : > { %p23_p0 = scmp.ge.s32.totalorder %s22_s19, 3  ;;  %p83_p1 = scmp.ne.s32.totalorder %s689_s13, %s685_s12 }
   0x6   : > { %p84_p2 = scmp.eq.s32.totalorder %s709_s18, 0  ;;  %s76_s24 = sadd.s32 1, %s689_s13 }
   0x7   : > { %s954_s19 = smov (%p23_p0, %s22_s19), 0  ;;  %s956_s20 = smov (!%p23_p0, %s25_s20), %s705_s17 }
   0x8   : > { %p85_p3 = por %p84_p2, %p83_p1  ;;  %p27_p4 = scmp.ge.s32.totalorder %s956_s20, 2 }
   0x9   : > { %s72_s21 = ssub.s32 %s701_s16, %s954_s19  ;;  %p582_p6 = scmp.ge.s32.totalorder %s709_s18, 6 }
   0xa   : > { %s958_s20 = smov (%p27_p4, %s956_s20), 0 }
   0xb   : > { %s71_s22 = ssub.s32 %s705_s17, %s958_s20  ;;  %143 = sbr.rel (%p582_p6) target bundleno = 42 (0x2a), region = 24 }
   0xc   : > { %s73_s23 = sor.u32 %s72_s21, %s71_s22 }
   0xd   : > { %p74_p5 = scmp.eq.s32.totalorder %s73_s23, 0 }
   0xf   : > { %s784_s25 = scalar_select %p74_p5, %s689_s13, %s76_s24  }
  0x10   : > { %146 = sbr.rel (!%p85_p3) target bundleno = 42 (0x2a), region = 28  ;;  %s148_s26 = sand.u32 (%p85_p3), 1, %s689_s13  }
  0x11   : > { %s592_s27 = smul.u32 (%p85_p3), 288, %s148_s26  ;;  %s583_s28 = sshll.u32 (%p85_p3), %s701_s16, 2 }
  0x12   : > { %s593_s29 = smul.u32 (%p85_p3), 108, %s705_s17 }
  0x13   : > { %s798_s8 = scalar_lea.vmem (%p85_p3), [#allocation2], %s592_s27 }
  0x14   : > { %s153_s30 = sadd.s32 (%p85_p3), %s593_s29, %s583_s28 }
  0x15   : > { %s584_s4 = sshll.u32 %s153_s30, 3 }
  0x16   : > { %s793_s7 = scalar_lea.vmem %s945_s2, %s584_s4 }
  0x17   : > { %v168_v0 = vld [vmem:[%s793_s7] sm:$0xff]  ;;  %v170_v1 = vld [vmem:[%s793_s7 + $0x8] sm:$0xff]  ;;  %v172_v2 = vld [vmem:[%s793_s7 + $0x10] sm:$0xff] }
  0x18   : > { %169 = vst [vmem:[%s798_s8] sm:$0xff] %v168_v0  ;;  %171 = vst [vmem:[%s798_s8 + $0x8] sm:$0xff] %v170_v1  ;;  %v174_v3 = vld [vmem:[%s793_s7 + $0x18] sm:$0xff]  ;;  %v176_v4 = vld [vmem:[%s793_s7 + $0x60] sm:$0xff] }
  0x19   : > { %173 = vst [vmem:[%s798_s8 + $0x10] sm:$0xff] %v172_v2  ;;  %v178_v5 = vld [vmem:[%s793_s7 + $0x68] sm:$0xff]  ;;  %175 = vst [vmem:[%s798_s8 + $0x18] sm:$0xff] %v174_v3  ;;  %v180_v6 = vld [vmem:[%s793_s7 + $0x70] sm:$0xff] }
  0x1a   : > { %177 = vst [vmem:[%s798_s8 + $0x20] sm:$0xff] %v176_v4  ;;  %179 = vst [vmem:[%s798_s8 + $0x28] sm:$0xff] %v178_v5  ;;  %v182_v7 = vld [vmem:[%s793_s7 + $0x78] sm:$0xff]  ;;  %v184_v8 = vld [vmem:[%s793_s7 + $0xc0] sm:$0xff] }
  0x1b   : > { %181 = vst [vmem:[%s798_s8 + $0x30] sm:$0xff] %v180_v6  ;;  %183 = vst [vmem:[%s798_s8 + $0x38] sm:$0xff] %v182_v7  ;;  %v186_v9 = vld [vmem:[%s793_s7 + $0xc8] sm:$0xff]  ;;  %v188_v10 = vld [vmem:[%s793_s7 + $0xd0] sm:$0xff] }
  0x1c   : > { %185 = vst [vmem:[%s798_s8 + $0x40] sm:$0xff] %v184_v8  ;;  %v190_v11 = vld [vmem:[%s793_s7 + $0xd8] sm:$0xff]  ;;  %187 = vst [vmem:[%s798_s8 + $0x48] sm:$0xff] %v186_v9  ;;  %v192_v12 = vld [vmem:[%s793_s7 + $0x120] sm:$0xff] }
  0x1d   : > { %189 = vst [vmem:[%s798_s8 + $0x50] sm:$0xff] %v188_v10  ;;  %191 = vst [vmem:[%s798_s8 + $0x58] sm:$0xff] %v190_v11  ;;  %v194_v13 = vld [vmem:[%s793_s7 + $0x128] sm:$0xff]  ;;  %v196_v14 = vld [vmem:[%s793_s7 + $0x130] sm:$0xff] }
  0x1e   : > { %193 = vst [vmem:[%s798_s8 + $0x60] sm:$0xff] %v192_v12  ;;  %195 = vst [vmem:[%s798_s8 + $0x68] sm:$0xff] %v194_v13  ;;  %v198_v15 = vld [vmem:[%s793_s7 + $0x138] sm:$0xff]  ;;  %v200_v16 = vld [vmem:[%s793_s7 + $0x180] sm:$0xff] }
  0x1f   : > { %197 = vst [vmem:[%s798_s8 + $0x70] sm:$0xff] %v196_v14  ;;  %v202_v17 = vld [vmem:[%s793_s7 + $0x188] sm:$0xff]  ;;  %199 = vst [vmem:[%s798_s8 + $0x78] sm:$0xff] %v198_v15  ;;  %v204_v18 = vld [vmem:[%s793_s7 + $0x190] sm:$0xff] }
  0x20   : > { %201 = vst [vmem:[%s798_s8 + $0x80] sm:$0xff] %v200_v16  ;;  %203 = vst [vmem:[%s798_s8 + $0x88] sm:$0xff] %v202_v17  ;;  %v206_v19 = vld [vmem:[%s793_s7 + $0x198] sm:$0xff]  ;;  %v208_v20 = vld [vmem:[%s793_s7 + $0x1e0] sm:$0xff] }
  0x21   : > { %205 = vst [vmem:[%s798_s8 + $0x90] sm:$0xff] %v204_v18  ;;  %207 = vst [vmem:[%s798_s8 + $0x98] sm:$0xff] %v206_v19  ;;  %v210_v21 = vld [vmem:[%s793_s7 + $0x1e8] sm:$0xff]  ;;  %v212_v22 = vld [vmem:[%s793_s7 + $0x1f0] sm:$0xff] }
  0x22   : > { %209 = vst [vmem:[%s798_s8 + $0xa0] sm:$0xff] %v208_v20  ;;  %v214_v23 = vld [vmem:[%s793_s7 + $0x1f8] sm:$0xff]  ;;  %211 = vst [vmem:[%s798_s8 + $0xa8] sm:$0xff] %v210_v21  ;;  %v216_v24 = vld [vmem:[%s793_s7 + $0x240] sm:$0xff] }
  0x23   : > { %213 = vst [vmem:[%s798_s8 + $0xb0] sm:$0xff] %v212_v22  ;;  %215 = vst [vmem:[%s798_s8 + $0xb8] sm:$0xff] %v214_v23  ;;  %v218_v25 = vld [vmem:[%s793_s7 + $0x248] sm:$0xff]  ;;  %v220_v26 = vld [vmem:[%s793_s7 + $0x250] sm:$0xff] }
  0x24   : > { %217 = vst [vmem:[%s798_s8 + $0xc0] sm:$0xff] %v216_v24  ;;  %219 = vst [vmem:[%s798_s8 + $0xc8] sm:$0xff] %v218_v25  ;;  %v222_v27 = vld [vmem:[%s793_s7 + $0x258] sm:$0xff]  ;;  %v224_v28 = vld [vmem:[%s793_s7 + $0x2a0] sm:$0xff] }
  0x25   : > { %221 = vst [vmem:[%s798_s8 + $0xd0] sm:$0xff] %v220_v26  ;;  %v226_v29 = vld [vmem:[%s793_s7 + $0x2a8] sm:$0xff]  ;;  %223 = vst [vmem:[%s798_s8 + $0xd8] sm:$0xff] %v222_v27  ;;  %v228_v30 = vld [vmem:[%s793_s7 + $0x2b0] sm:$0xff] }
  0x26   : > { %225 = vst [vmem:[%s798_s8 + $0xe0] sm:$0xff] %v224_v28  ;;  %227 = vst [vmem:[%s798_s8 + $0xe8] sm:$0xff] %v226_v29  ;;  %v230_v31 = vld [vmem:[%s793_s7 + $0x2b8] sm:$0xff]  ;;  %v232_v32 = vld [vmem:[%s793_s7 + $0x300] sm:$0xff] }
  0x27   : > { %229 = vst [vmem:[%s798_s8 + $0xf0] sm:$0xff] %v228_v30  ;;  %231 = vst [vmem:[%s798_s8 + $0xf8] sm:$0xff] %v230_v31  ;;  %v234_v33 = vld [vmem:[%s793_s7 + $0x308] sm:$0xff]  ;;  %v236_v34 = vld [vmem:[%s793_s7 + $0x310] sm:$0xff] }
  0x28   : > { %233 = vst [vmem:[%s798_s8 + $0x100] sm:$0xff] %v232_v32  ;;  %v238_v35 = vld [vmem:[%s793_s7 + $0x318] sm:$0xff]  ;;  %235 = vst [vmem:[%s798_s8 + $0x108] sm:$0xff] %v234_v33 }
  0x29   : > { %237 = vst [vmem:[%s798_s8 + $0x110] sm:$0xff] %v236_v34  ;;  %239 = vst [vmem:[%s798_s8 + $0x118] sm:$0xff] %v238_v35 }
  0x2a PF: > { %p585_p7 = scmp.ge.s32.totalorder %s709_s18, 1  ;;  %p244_p8 = scmp.lt.s32.totalorder %s709_s18, 7 }
  0x2c   : > { %p245_p9 = pnand %p585_p7, %p244_p8 }
  0x2d   : > { %s251_s9 = sand.u32 (!%p245_p9), 1, %s685_s12   ;;  %s586_s24 = sshll.u32 (!%p245_p9), %s693_s14, 2 }
  0x2e   : > { %248 = sbr.rel (%p245_p9) target bundleno = 272 (0x110), region = 51  ;;  %p280_p10 = scmp.lt.s32.totalorder (!%p245_p9), %s697_s15, 1 }
  0x2f   : > { %s594_s21 = smul.u32 (!%p245_p9), 288, %s251_s9  ;;  %p282_p11 = scmp.lt.s32.totalorder (!%p245_p9), %s586_s24, 11 }
  0x31   : > { %s875_s22 = scalar_lea.vmem (!%p245_p9), [#allocation2], %s594_s21 }
  0x33   : > { %v326_v36 = vld [vmem:[%s944_s1] sm:$0xff]  ;;  %v711_v37 = vmov 0.0   ;;  %v712_v38 = vmov 0   ;;  %v323_v39 = vld [vmem:[%s875_s22 + $0x108] sm:$0xff]  ;;  %v325_v40 = vld [vmem:[%s875_s22 + $0x118] sm:$0xff]  ;;  %vm332_vm0 = vcmask 588800  }
  0x34   : > { %400 = vmatprep.mubr.f32.mxu0 %v711_v37  ;;  %471 = vmatprep.mubr.f32.mxu1 %v711_v37  ;;  %v322_v41 = vld [vmem:[%s875_s22 + $0x100] sm:$0xff]  ;;  %v324_v42 = vld [vmem:[%s875_s22 + $0x110] sm:$0xff]  ;;  %v319_v43 = vld [vmem:[%s875_s22 + $0xe8] sm:$0xff]  ;;  %s960_s15 = smov (!%p280_p10, %s697_s15), 1  ;;  %s962_s24 = smov (!%p282_p11, %s586_s24), 11 }
  0x35   : > { %654 = vset.pattern.permute.xlu0 %v712_v38  ;;  %350 = vmatprep.subr.mxu0 %v323_v39  ;;  %v321_v44 = vld [vmem:[%s875_s22 + $0xf8] sm:$0xff]  ;;  %v318_v45 = vld [vmem:[%s875_s22 + $0xe0] sm:$0xff]  ;;  %v320_v46 = vld [vmem:[%s875_s22 + $0xf0] sm:$0xff]  ;;  %s595_s26 = smul.u32 12, %s960_s15 }
  0x36   : > { %329 = vperm.xlu0 %654, %v326_v36   ;;  %421 = vmatprep.subr.mxu1 %v325_v40  ;;  %v315_v47 = vld [vmem:[%s875_s22 + $0xc8] sm:$0xff]  ;;  %v317_v48 = vld [vmem:[%s875_s22 + $0xd8] sm:$0xff]  ;;  %v314_v49 = vld [vmem:[%s875_s22 + $0xc0] sm:$0xff] }
  0x37   : > { %351 = vmatpush1.msra.mxu0 %v322_v41  ;;  %422 = vmatpush1.msra.mxu1 %v324_v42  ;;  %v316_v50 = vld [vmem:[%s875_s22 + $0xd0] sm:$0xff]  ;;  %v311_v51 = vld [vmem:[%s875_s22 + $0xa8] sm:$0xff]  ;;  %v313_v52 = vld [vmem:[%s875_s22 + $0xb8] sm:$0xff]  ;;  %s285_s27 = sadd.s32 %s595_s26, %s962_s24 }
  0x38   : > { %352 = vmatprep.subr.mxu0 %v319_v43  ;;  %423 = vmatprep.subr.mxu1 %v321_v44  ;;  %v310_v53 = vld [vmem:[%s875_s22 + $0xa0] sm:$0xff]  ;;  %v312_v54 = vld [vmem:[%s875_s22 + $0xb0] sm:$0xff]  ;;  %v307_v55 = vld [vmem:[%s875_s22 + $0x88] sm:$0xff]  ;;  %s587_s28 = sshll.u32 %s285_s27, 3 }
  0x39   : > { %353 = vmatpush1.msra.mxu0 %v318_v45  ;;  %424 = vmatpush1.msra.mxu1 %v320_v46  ;;  %v309_v56 = vld [vmem:[%s875_s22 + $0x98] sm:$0xff]  ;;  %v306_v57 = vld [vmem:[%s875_s22 + $0x80] sm:$0xff]  ;;  %v308_v58 = vld [vmem:[%s875_s22 + $0x90] sm:$0xff]  ;;  %s287_s4 = scalar_lea.vmem %s946_s3, %s587_s28 }
  0x3a   : > { %354 = vmatprep.subr.mxu0 %v315_v47  ;;  %425 = vmatprep.subr.mxu1 %v317_v48  ;;  %v303_v59 = vld [vmem:[%s875_s22 + $0x68] sm:$0xff]  ;;  %v305_v60 = vld [vmem:[%s875_s22 + $0x78] sm:$0xff]  ;;  %v302_v61 = vld [vmem:[%s875_s22 + $0x60] sm:$0xff] }
  0x3b   : > { %355 = vmatpush1.msra.mxu0 %v314_v49  ;;  %426 = vmatpush1.msra.mxu1 %v316_v50  ;;  %v304_v62 = vld [vmem:[%s875_s22 + $0x70] sm:$0xff]  ;;  %v299_v63 = vld [vmem:[%s875_s22 + $0x48] sm:$0xff]  ;;  %v301_v0 = vld [vmem:[%s875_s22 + $0x58] sm:$0xff] }
  0x3c   : > { %356 = vmatprep.subr.mxu0 %v311_v51  ;;  %427 = vmatprep.subr.mxu1 %v313_v52  ;;  %v298_v1 = vld [vmem:[%s875_s22 + $0x40] sm:$0xff]  ;;  %v300_v2 = vld [vmem:[%s875_s22 + $0x50] sm:$0xff]  ;;  %v295_v3 = vld [vmem:[%s875_s22 + $0x28] sm:$0xff] }
  0x3d   : > { %357 = vmatpush1.msra.mxu0 %v310_v53  ;;  %428 = vmatpush1.msra.mxu1 %v312_v54  ;;  %v297_v4 = vld [vmem:[%s875_s22 + $0x38] sm:$0xff]  ;;  %v294_v5 = vld [vmem:[%s875_s22 + $0x20] sm:$0xff]  ;;  %v296_v6 = vld [vmem:[%s875_s22 + $0x30] sm:$0xff] }
  0x3e   : > { %358 = vmatprep.subr.mxu0 %v307_v55  ;;  %429 = vmatprep.subr.mxu1 %v309_v56  ;;  %v291_v7 = vld [vmem:[%s875_s22 + $0x8] sm:$0xff]  ;;  %v293_v8 = vld [vmem:[%s875_s22 + $0x18] sm:$0xff]  ;;  %v290_v9 = vld [vmem:[%s875_s22] sm:$0xff] }
  0x3f   : > { %359 = vmatpush1.msra.mxu0 %v306_v57  ;;  %430 = vmatpush1.msra.mxu1 %v308_v58  ;;  %v292_v10 = vld [vmem:[%s875_s22 + $0x10] sm:$0xff]  ;;  %v289_v11 = vld [vmem:[%s943_s0] sm:$0xff] }
  0x40   : > { %360 = vmatprep.subr.mxu0 %v303_v59  ;;  %431 = vmatprep.subr.mxu1 %v305_v60 }
  0x41   : > { %361 = vmatpush1.msra.mxu0 %v302_v61  ;;  %432 = vmatpush1.msra.mxu1 %v304_v62 }
  0x42   : > { %362 = vmatprep.subr.mxu0 %v299_v63  ;;  %433 = vmatprep.subr.mxu1 %v301_v0 }
  0x43   : > { %363 = vmatpush1.msra.mxu0 %v298_v1  ;;  %434 = vmatpush1.msra.mxu1 %v300_v2 }
  0x44   : > { %364 = vmatprep.subr.mxu0 %v295_v3  ;;  %435 = vmatprep.subr.mxu1 %v297_v4 }
  0x45   : > { %365 = vmatpush1.msra.mxu0 %v294_v5  ;;  %436 = vmatpush1.msra.mxu1 %v296_v6 }
  0x46   : > { %366 = vmatprep.subr.mxu0 %v291_v7  ;;  %437 = vmatprep.subr.mxu1 %v293_v8 }
  0x47   : > { %367 = vmatpush1.msra.mxu0 %v290_v9  ;;  %438 = vmatpush1.msra.mxu1 %v292_v10 }
  0x48   : > { %588 = vmatmul.mubr.msk.f32.vlgmr.msra.gmra.mxu0 %vm332_vm0, %v289_v11  ;;  %589 = vmatmul.mubr.msk.f32.vlgmr.msra.gmra.mxu1 %vm332_vm0, %v289_v11 }
  0xb1   : > { %v330_v12 = vpop.permute.xlu0 %329 }
 0x108   : > { %v402_v13 = vpop.f32.mrf.mxu0  ;;  %v473_v14 = vpop.f32.mrf.mxu1 }
 0x109   : > { %v403_v15 = vadd.f32 %v402_v13, %v330_v12  ;;  %v474_v16 = vadd.f32 %v473_v14, %v330_v12 }
 0x10a   : > { %v404_v17 = vpop.f32.mrf.mxu0  ;;  %v475_v18 = vpop.f32.mrf.mxu1 }
 0x10b   : > { %v478_v19 = vmax.f32 %v403_v15, 0.0  ;;  %v480_v20 = vmax.f32 %v474_v16, 0.0  ;;  %v405_v21 = vadd.f32 %v404_v17, %v330_v12  ;;  %v476_v22 = vadd.f32 %v475_v18, %v330_v12 }
 0x10d   : > { %482 = vst [vmem:[%s287_s4] sm:$0xff] %v478_v19  ;;  %484 = vst [vmem:[%s287_s4 + $0x10] sm:$0xff] %v480_v20  ;;  %v479_v23 = vmax.f32 %v405_v21, 0.0  ;;  %v481_v24 = vmax.f32 %v476_v22, 0.0 }
 0x10f   : > { %483 = vst [vmem:[%s287_s4 + $0x8] sm:$0xff] %v479_v23  ;;  %485 = vst [vmem:[%s287_s4 + $0x18] sm:$0xff] %v481_v24 }
 0x110 PF: > { %s13_s18 = sadd.s32 1, %s709_s18   ;;  %s947_s12 = smov %s689_s13 }
 0x111   : > { %p10_p12 = scmp.ge.s32.totalorder %s13_s18, 8   ;;  %s948_s13 = smov %s784_s25 }
 0x112   : > { %s949_s14 = smov %s701_s16  ;;  %s950_s15 = smov %s705_s17 }
 0x113   : > { %s951_s16 = smov %s954_s19  ;;  %s952_s17 = smov %s958_s20 }
 0x114   :  { %12 = sbr.rel (!%p10_p12) target bundleno = 4 (0x4), region = 90 }

// kernel: pixel_decoder_forward.8
= control target key start
LH: loop header
LB: loop body
LE: loop exit
PB: predicated region body
PF: predicated region fallthrough
CT: control target
= control target key end

     0   :  { %s2952_s0 = inlined_call_operand.vmem [shape: f32[8,72], index: 0, kind: input, shape index: {}]   ;;  %s2953_s1 = inlined_call_operand.vmem [shape: f32[8,1], index: 1, kind: input, shape index: {}]   ;;  %s2954_s2 = inlined_call_operand.vmem [shape: f32[2,72,1681], index: 2, kind: input, shape index: {}]   ;;  %s2955_s3 = inlined_call_operand.vmem [shape: f32[2,8,1681], index: 3, kind: output, shape index: {}]  }
   0x1   :  { %2956 = sst [smem:[#allocation4_spill]] %s2954_s2 }
   0x2   :  { %s2258_s12 = smov 0   ;;  %s2260_s13 = smov 0  }
   0x3   :  { %s2262_s14 = smov 0   ;;  %s2264_s15 = smov 0  }
   0x4   :  { %s2266_s16 = smov 0   ;;  %s2268_s17 = smov 0  }
   0x5   :  { %s2270_s18 = smov 0  }
   0x6 LB: > { %s22_s19 = sadd.s32 1, %s2126_s16  ;;  %s25_s20 = sadd.s32 1, %s2130_s17  ;;  %s2134_s18 = sphi %s2270_s18, %s13_s18   ;;  %s2130_s17 = sphi %s2268_s17, %s2980_s17   ;;  %s2126_s16 = sphi %s2266_s16, %s2979_s16   ;;  %s2122_s15 = sphi %s2264_s15, %s2978_s15   ;;  %s2118_s14 = sphi %s2262_s14, %s2977_s14   ;;  %s2114_s13 = sphi %s2260_s13, %s2976_s13   ;;  %s2110_s12 = sphi %s2258_s12, %s2975_s12  }
   0x7   : > { %p23_p0 = scmp.ge.s32.totalorder %s22_s19, 4  ;;  %s1555_s21 = sadd.s32 4294967295, %s2134_s18  }
   0x8   : > { %p83_p1 = scmp.ne.s32.totalorder %s2114_s13, %s2110_s12  ;;  %p84_p2 = scmp.eq.s32.totalorder %s2134_s18, 0 }
   0x9   : > { %s2982_s19 = smov (%p23_p0, %s22_s19), 0  ;;  %s2984_s20 = smov (!%p23_p0, %s25_s20), %s2130_s17 }
   0xa   : > { %p27_p3 = scmp.ge.s32.totalorder %s2984_s20, 2  ;;  %p115_p4 = scmp.eq.s32.totalorder %s1555_s21, 7 }
   0xb   : > { %s72_s22 = ssub.s32 %s2126_s16, %s2982_s19  ;;  %p85_p5 = por %p84_p2, %p83_p1 }
   0xc   : > { %s2986_s20 = smov (%p27_p3, %s2984_s20), 0  ;;  %p2306_p6 = por %p115_p4, %p83_p1 }
   0xd   : > { %s71_s24 = ssub.s32 %s2130_s17, %s2986_s20  ;;  %s76_s26 = sadd.s32 1, %s2114_s13 }
   0xe   : > { %s73_s25 = sor.u32 %s72_s22, %s71_s24  ;;  %p1558_p8 = scmp.ge.s32.totalorder %s2134_s18, 8 }
   0xf   : > { %p74_p7 = scmp.eq.s32.totalorder %s73_s25, 0 }
  0x10   : > { %143 = sbr.rel (%p1558_p8) target bundleno = 108 (0x6c), region = 24 }
  0x11   : > { %s2314_s27 = scalar_select %p74_p7, %s2114_s13, %s76_s26  }
  0x15   : > { %146 = sbr.rel (!%p85_p5) target bundleno = 108 (0x6c), region = 28  ;;  %s148_s28 = sand.u32 (%p85_p5), 1, %s2114_s13  }
  0x16   : > { %s1559_s29 = sshll.u32 (%p85_p5), %s2126_s16, 2  ;;  %s1629_s30 = smul.u32 (%p85_p5), 288, %s148_s28 }
  0x17   : > { %s152_s4 = ssub.s32 (%p85_p5), 14, %s1559_s29  ;;  %s1630_s5 = smul.u32 (%p85_p5), 126, %s2130_s17 }
  0x18   : > { %p153_p9 = scmp.lt.s32.totalorder (%p85_p5), %s152_s4, 4  ;;  %s2958_s2 = sld [smem:[#allocation4_spill]] (%p85_p5) }
  0x19   : > { %s158_s6 = sadd.s32 (%p85_p5), %s1630_s5, %s1559_s29  ;;  %s2327_s22 = scalar_lea.vmem (%p85_p5), [#allocation2], %s1629_s30  }
  0x1a   : > { %s2988_s4 = smov (!%p153_p9, %s152_s4), 4  ;;  %s1561_s8 = sshll.u32 %s158_s6, 3 }
  0x1b   : > { %s155_s7 = smul.u32 1152, %s2988_s4  ;;  %s2325_s21 = sshll.u32 %s2988_s4, 3 }
  0x1d   : > { %p1563_p10 = scmp.eq.s32.totalorder %s155_s7, 0 }
  0x1e   : > { %s2323_s11 = scalar_lea.vmem %s2958_s2, %s1561_s8   ;;  %p165_p11 = scmp.lt.u32.totalorder (!%p1563_p10), %s2325_s21, 8 }
  0x1f   : > { %164 = sbr.rel (%p1563_p10) target bundleno = 108 (0x6c), region = 32 }
  0x24   : > { %168 = sbr.rel (%p165_p11) target bundleno = 91 (0x5b), region = 36  ;;  %s2331_s24 = sand.u32 (!%p165_p11), 7, %s2325_s21  }
  0x25   : > { %p201_p12 = scmp.eq.s32.totalorder (!%p165_p11), %s2331_s24, 0  ;;  %p1564_p13 = scmp.ne.s32.totalorder (!%p165_p11), %s2331_s24, 0 }
  0x29   : > { %204 = sbr.rel (%p1564_p13) target bundleno = 59 (0x3b), region = 51  ;;  %s205_s25 = sshrl.u32 (!%p1564_p13), %s2325_s21, 3 }
  0x2a   : > { %s206_s26 = sshrl.u32 (!%p1564_p13), %s205_s25, 3  ;;  %s2336_s28 = sand.u32 (!%p1564_p13), 7, %s205_s25  }
  0x2b   : > { %s1621_s29 = sshll.u32 (!%p1564_p13), %s206_s26, 10  ;;  %p1571_p0 = scmp.le.s32.totalorder (!%p1564_p13), %s2336_s28, 0 }
  0x2c   : > { %s373_s30 = sshra.s32 (!%p1564_p13), %s1621_s29, 4 }
  0x2d   : > { %s2339_s4 = scalar_lea.vmem (!%p1564_p13), %s2323_s11, %s373_s30   ;;  %s2342_s5 = scalar_lea.vmem (!%p1564_p13), %s2327_s22, %s373_s30 [#allocation2]  }
  0x2e   : > { %1430 = sbr.rel (%p1571_p0) target bundleno = 59 (0x3b), region = 240  ;;  %s2959_s6 = smov (!%p1571_p0), %s2342_s5 }
  0x2f   : > { %s2960_s7 = smov (!%p1571_p0), %s2339_s4  ;;  %s2351_s8 = smov (!%p1571_p0), 0  }
  0x30   : > { %s2353_s9 = smov (!%p1571_p0), 0  }
  0x33 LB: >> { %v389_v0 = vld [vmem:[%s2142_s7] sm:$0xff]  ;;  %v391_v1 = vld [vmem:[%s2142_s7 + $0x70] sm:$0xff]  ;;  %s407_s10 = sadd.s32 1, %s2146_s8  ;;  %s383_s9 = sadd.s32 1, %s2150_s9   ;;  %s2150_s9 = sphi %s2353_s9, %s383_s9   ;;  %s2146_s8 = sphi %s2351_s8, %s2961_s8   ;;  %s2142_s7 = sphi %s2960_s7, %s412_s7   ;;  %s2138_s6 = sphi %s2959_s6, %s413_s6  }
  0x34   : >> { %v393_v2 = vld [vmem:[%s2142_s7 + $0xe0] sm:$0xff]  ;;  %390 = vst [vmem:[%s2138_s6] sm:$0xff] %v389_v0  ;;  %392 = vst [vmem:[%s2138_s6 + $0x20] sm:$0xff] %v391_v1  ;;  %v395_v3 = vld [vmem:[%s2142_s7 + $0x150] sm:$0xff]  ;;  %p408_p1 = scmp.ge.s32.totalorder %s407_s10, %s2336_s28  ;;  %p382_p2 = scmp.ge.s32.totalorder %s383_s9, %s2336_s28 }
  0x35   : >> { %394 = vst [vmem:[%s2138_s6 + $0x40] sm:$0xff] %v393_v2  ;;  %v397_v4 = vld [vmem:[%s2142_s7 + $0x1c0] sm:$0xff]  ;;  %v399_v5 = vld [vmem:[%s2142_s7 + $0x230] sm:$0xff]  ;;  %396 = vst [vmem:[%s2138_s6 + $0x60] sm:$0xff] %v395_v3 }
  0x36   : >> { %398 = vst [vmem:[%s2138_s6 + $0x80] sm:$0xff] %v397_v4  ;;  %400 = vst [vmem:[%s2138_s6 + $0xa0] sm:$0xff] %v399_v5  ;;  %v401_v6 = vld [vmem:[%s2142_s7 + $0x2a0] sm:$0xff]  ;;  %v403_v7 = vld [vmem:[%s2142_s7 + $0x310] sm:$0xff]  ;;  %s2990_s10 = smov (%p408_p1, %s407_s10), 0  ;;  %385 = sbr.rel (!%p382_p2) target bundleno = 51 (0x33), region = 246 }
  0x37   : >> { %v405_v8 = vld [vmem:[%s2142_s7 + $0x380] sm:$0xff]  ;;  %402 = vst [vmem:[%s2138_s6 + $0xc0] sm:$0xff] %v401_v6  ;;  %404 = vst [vmem:[%s2138_s6 + $0xe0] sm:$0xff] %v403_v7  ;;  %s1572_s25 = sshll.u32 %s2990_s10, 3  ;;  %s2961_s8 = smov %s2990_s10 }
  0x38   : >> { %406 = vst [vmem:[%s2138_s6 + $0x100] sm:$0xff] %v405_v8  ;;  %s412_s7 = scalar_lea.vmem %s2339_s4, %s1572_s25   ;;  %s413_s6 = scalar_lea.vmem %s2342_s5, %s1572_s25 [#allocation2]  }
  0x3b PF: > { %416 = sbr.rel (%p201_p12) target bundleno = 91 (0x5b), region = 69  ;;  %s418_s26 = ssub.s32 (!%p201_p12), %s2325_s21, %s2331_s24 }
  0x3c   : > { %s422_s29 = sshrl.u32 (!%p201_p12), %s2325_s21, 3  ;;  %s2380_s30 = scalar_lea.vmem (!%p201_p12), %s2323_s11, %s418_s26 }
  0x3d   : > { %s2383_s10 = scalar_lea.vmem (!%p201_p12), %s2327_s22, %s418_s26 [#allocation2]  ;;  %s423_s9 = sshrl.u32 (!%p201_p12), %s422_s29, 3 }
  0x3e   : > { %s2385_s25 = sand.u32 (!%p201_p12), 7, %s422_s29   ;;  %s1623_s28 = sshll.u32 (!%p201_p12), %s423_s9, 10 }
  0x3f   : > { %s590_s4 = sshra.s32 (!%p201_p12), %s1623_s28, 4  ;;  %p1580_p3 = scmp.le.s32.totalorder (!%p201_p12), %s2385_s25, 0 }
  0x40   : > { %s2388_s5 = scalar_lea.vmem %s2323_s11, %s590_s4   ;;  %s2391_s6 = scalar_lea.vmem %s2327_s22, %s590_s4 [#allocation2]  }
  0x41   : > { %1458 = sbr.rel (%p1580_p3) target bundleno = 78 (0x4e), region = 262  ;;  %s2962_s7 = smov (!%p1580_p3), %s2391_s6 }
  0x42   : > { %s2963_s8 = smov (!%p1580_p3), %s2388_s5  ;;  %s2400_s26 = smov (!%p1580_p3), 0  }
  0x43   : > { %s2402_s2 = smov (!%p1580_p3), 0  }
  0x46 LB: >> { %v606_v9 = vld [vmem:[%s2158_s8] sm:$0xff]  ;;  %v608_v10 = vld [vmem:[%s2158_s8 + $0x70] sm:$0xff]  ;;  %s624_s29 = sadd.s32 1, %s2162_s26  ;;  %s600_s2 = sadd.s32 1, %s2166_s2   ;;  %s2166_s2 = sphi %s2402_s2, %s600_s2   ;;  %s2162_s26 = sphi %s2400_s26, %s2964_s26   ;;  %s2158_s8 = sphi %s2963_s8, %s629_s8   ;;  %s2154_s7 = sphi %s2962_s7, %s630_s7  }
  0x47   : >> { %v610_v11 = vld [vmem:[%s2158_s8 + $0xe0] sm:$0xff]  ;;  %607 = vst [vmem:[%s2154_s7] sm:$0xff] %v606_v9  ;;  %609 = vst [vmem:[%s2154_s7 + $0x20] sm:$0xff] %v608_v10  ;;  %v612_v12 = vld [vmem:[%s2158_s8 + $0x150] sm:$0xff]  ;;  %p625_p4 = scmp.ge.s32.totalorder %s624_s29, %s2385_s25  ;;  %p599_p5 = scmp.ge.s32.totalorder %s600_s2, %s2385_s25 }
  0x48   : >> { %611 = vst [vmem:[%s2154_s7 + $0x40] sm:$0xff] %v610_v11  ;;  %v614_v13 = vld [vmem:[%s2158_s8 + $0x1c0] sm:$0xff]  ;;  %v616_v14 = vld [vmem:[%s2158_s8 + $0x230] sm:$0xff]  ;;  %613 = vst [vmem:[%s2154_s7 + $0x60] sm:$0xff] %v612_v12 }
  0x49   : >> { %615 = vst [vmem:[%s2154_s7 + $0x80] sm:$0xff] %v614_v13  ;;  %617 = vst [vmem:[%s2154_s7 + $0xa0] sm:$0xff] %v616_v14  ;;  %v618_v15 = vld [vmem:[%s2158_s8 + $0x2a0] sm:$0xff]  ;;  %v620_v16 = vld [vmem:[%s2158_s8 + $0x310] sm:$0xff]  ;;  %s2992_s29 = smov (%p625_p4, %s624_s29), 0  ;;  %602 = sbr.rel (!%p599_p5) target bundleno = 70 (0x46), region = 268 }
  0x4a   : >> { %v622_v17 = vld [vmem:[%s2158_s8 + $0x380] sm:$0xff]  ;;  %619 = vst [vmem:[%s2154_s7 + $0xc0] sm:$0xff] %v618_v15  ;;  %621 = vst [vmem:[%s2154_s7 + $0xe0] sm:$0xff] %v620_v16  ;;  %s1581_s9 = sshll.u32 %s2992_s29, 3  ;;  %s2964_s26 = smov %s2992_s29 }
  0x4b   : >> { %623 = vst [vmem:[%s2154_s7 + $0x100] sm:$0xff] %v622_v17  ;;  %s629_s8 = scalar_lea.vmem %s2388_s5, %s1581_s9   ;;  %s630_s7 = scalar_lea.vmem %s2391_s6, %s1581_s9 [#allocation2]  }
  0x4e PF: > { %s2232_s28 = smov 1  }
  0x4f   : > { %s631_s4 = sshll.u32 %s2232_s28, %s2331_s24 }
  0x50   : > { %s1583_s2 = sadd.s32 4294967295, %s631_s4 }
  0x51   : > { %v641_v18 = vld [vmem:[%s2380_s30] sm:%s1583_s2]  ;;  %v643_v19 = vld [vmem:[%s2380_s30 + $0x70] sm:%s1583_s2] }
  0x52   : > { %642 = vst [vmem:[%s2383_s10] sm:%s1583_s2] %v641_v18  ;;  %644 = vst [vmem:[%s2383_s10 + $0x20] sm:%s1583_s2] %v643_v19 }
  0x53   : > { %v645_v20 = vld [vmem:[%s2380_s30 + $0xe0] sm:%s1583_s2]  ;;  %v647_v21 = vld [vmem:[%s2380_s30 + $0x150] sm:%s1583_s2] }
  0x54   : > { %646 = vst [vmem:[%s2383_s10 + $0x40] sm:%s1583_s2] %v645_v20  ;;  %648 = vst [vmem:[%s2383_s10 + $0x60] sm:%s1583_s2] %v647_v21 }
  0x55   : > { %v649_v22 = vld [vmem:[%s2380_s30 + $0x1c0] sm:%s1583_s2]  ;;  %v651_v23 = vld [vmem:[%s2380_s30 + $0x230] sm:%s1583_s2] }
  0x56   : > { %650 = vst [vmem:[%s2383_s10 + $0x80] sm:%s1583_s2] %v649_v22  ;;  %652 = vst [vmem:[%s2383_s10 + $0xa0] sm:%s1583_s2] %v651_v23 }
  0x57   : > { %v653_v24 = vld [vmem:[%s2380_s30 + $0x2a0] sm:%s1583_s2]  ;;  %v655_v25 = vld [vmem:[%s2380_s30 + $0x310] sm:%s1583_s2] }
  0x58   : > { %654 = vst [vmem:[%s2383_s10 + $0xc0] sm:%s1583_s2] %v653_v24  ;;  %656 = vst [vmem:[%s2383_s10 + $0xe0] sm:%s1583_s2] %v655_v25 }
  0x59   : > { %v657_v26 = vld [vmem:[%s2380_s30 + $0x380] sm:%s1583_s2] }
  0x5a   : > { %658 = vst [vmem:[%s2383_s10 + $0x100] sm:%s1583_s2] %v657_v26 }
  0x5b PF: > { %p1584_p7 = scmp.ge.u32.totalorder %s2325_s21, 8 }
  0x5c   : > { %s2233_s24 = smov (!%p1584_p7), 1  }
  0x5d   : > { %171 = sbr.rel (%p1584_p7) target bundleno = 108 (0x6c), region = 40  ;;  %s172_s30 = sshll.u32 (!%p1584_p7), %s2233_s24, %s2325_s21 }
  0x5e   : > { %s1585_s10 = sadd.s32 (!%p1584_p7), 4294967295, %s172_s30 }
  0x62   : > { %v182_v27 = vld [vmem:[%s2323_s11] sm:%s1585_s10]  ;;  %v184_v28 = vld [vmem:[%s2323_s11 + $0x70] sm:%s1585_s10] }
  0x63   : > { %183 = vst [vmem:[%s2327_s22] sm:%s1585_s10] %v182_v27  ;;  %185 = vst [vmem:[%s2327_s22 + $0x20] sm:%s1585_s10] %v184_v28 }
  0x64   : > { %v186_v29 = vld [vmem:[%s2323_s11 + $0xe0] sm:%s1585_s10]  ;;  %v188_v30 = vld [vmem:[%s2323_s11 + $0x150] sm:%s1585_s10] }
  0x65   : > { %187 = vst [vmem:[%s2327_s22 + $0x40] sm:%s1585_s10] %v186_v29  ;;  %189 = vst [vmem:[%s2327_s22 + $0x60] sm:%s1585_s10] %v188_v30 }
  0x66   : > { %v190_v31 = vld [vmem:[%s2323_s11 + $0x1c0] sm:%s1585_s10]  ;;  %v192_v32 = vld [vmem:[%s2323_s11 + $0x230] sm:%s1585_s10] }
  0x67   : > { %191 = vst [vmem:[%s2327_s22 + $0x80] sm:%s1585_s10] %v190_v31  ;;  %193 = vst [vmem:[%s2327_s22 + $0xa0] sm:%s1585_s10] %v192_v32 }
  0x68   : > { %v194_v33 = vld [vmem:[%s2323_s11 + $0x2a0] sm:%s1585_s10]  ;;  %v196_v34 = vld [vmem:[%s2323_s11 + $0x310] sm:%s1585_s10] }
  0x69   : > { %195 = vst [vmem:[%s2327_s22 + $0xc0] sm:%s1585_s10] %v194_v33  ;;  %197 = vst [vmem:[%s2327_s22 + $0xe0] sm:%s1585_s10] %v196_v34 }
  0x6a   : > { %v198_v35 = vld [vmem:[%s2323_s11 + $0x380] sm:%s1585_s10] }
  0x6b   : > { %199 = vst [vmem:[%s2327_s22 + $0x100] sm:%s1585_s10] %v198_v35 }
  0x6c PF: > { %p1586_p8 = scmp.ge.s32.totalorder %s2134_s18, 1  ;;  %p661_p9 = scmp.lt.s32.totalorder %s2134_s18, 9 }
  0x6e   : > { %p662_p10 = pnand %p1586_p8, %p661_p9 }
  0x6f   : > { %s668_s21 = sand.u32 (!%p662_p10), 1, %s2110_s12  }
  0x70   : > { %665 = sbr.rel (%p662_p10) target bundleno = 484 (0x1e4), region = 94  ;;  %s1587_s8 = sshll.u32 (!%p662_p10), %s668_s21, 5 }
  0x71   : > { %s1631_s11 = smul.u32 (!%p662_p10), 288, %s668_s21  ;;  %s2513_s26 = scalar_lea.vmem (!%p662_p10), [#allocation3], %s1587_s8  }
  0x73   : > { %s2470_s22 = scalar_lea.vmem (!%p662_p10), [#allocation2], %s1631_s11 }
  0x75   : > { %v737_v36 = vld [vmem:[%s2953_s1] sm:$0xff]  ;;  %v2234_v37 = vmov 0.0   ;;  %v2235_v38 = vmov 0   ;;  %v734_v39 = vld [vmem:[%s2470_s22 + $0x108] sm:$0xff]  ;;  %v736_v40 = vld [vmem:[%s2470_s22 + $0x118] sm:$0xff]  ;;  %vm743_vm0 = vcmask 588800  }
  0x76   : > { %811 = vmatprep.mubr.f32.mxu0 %v2234_v37  ;;  %882 = vmatprep.mubr.f32.mxu1 %v2234_v37  ;;  %v733_v41 = vld [vmem:[%s2470_s22 + $0x100] sm:$0xff]  ;;  %v735_v42 = vld [vmem:[%s2470_s22 + $0x110] sm:$0xff]  ;;  %v730_v43 = vld [vmem:[%s2470_s22 + $0xe8] sm:$0xff]  ;;  %s1591_s12 = sshll.u32 (%p2306_p6), %s2118_s14, 2  ;;  %s1632_s29 = smul.u32 (%p2306_p6), 14, %s2122_s15 }
  0x77   : > { %1951 = vset.pattern.permute.xlu0 %v2235_v38  ;;  %761 = vmatprep.subr.mxu0 %v734_v39  ;;  %v732_v44 = vld [vmem:[%s2470_s22 + $0xf8] sm:$0xff]  ;;  %v729_v45 = vld [vmem:[%s2470_s22 + $0xe0] sm:$0xff]  ;;  %v731_v46 = vld [vmem:[%s2470_s22 + $0xf0] sm:$0xff]  ;;  %s905_s9 = ssub.s32 (%p2306_p6), 14, %s1591_s12 }
  0x78   : > { %740 = vperm.xlu0 %1951, %v737_v36   ;;  %832 = vmatprep.subr.mxu1 %v736_v40  ;;  %v726_v47 = vld [vmem:[%s2470_s22 + $0xc8] sm:$0xff]  ;;  %v728_v48 = vld [vmem:[%s2470_s22 + $0xd8] sm:$0xff]  ;;  %v725_v49 = vld [vmem:[%s2470_s22 + $0xc0] sm:$0xff]  ;;  %p906_p11 = scmp.lt.s32.totalorder (%p2306_p6), %s905_s9, 4  ;;  %s911_s28 = sadd.s32 (%p2306_p6), %s1632_s29, %s1591_s12 }
  0x79   : > { %762 = vmatpush1.msra.mxu0 %v733_v41  ;;  %833 = vmatpush1.msra.mxu1 %v735_v42  ;;  %v727_v50 = vld [vmem:[%s2470_s22 + $0xd0] sm:$0xff]  ;;  %v722_v51 = vld [vmem:[%s2470_s22 + $0xa8] sm:$0xff]  ;;  %v724_v52 = vld [vmem:[%s2470_s22 + $0xb8] sm:$0xff]  ;;  %s1594_s4 = sshll.u32 (%p2306_p6), %s911_s28, 3 }
  0x7a   : > { %763 = vmatprep.subr.mxu0 %v730_v43  ;;  %834 = vmatprep.subr.mxu1 %v732_v44  ;;  %v721_v53 = vld [vmem:[%s2470_s22 + $0xa0] sm:$0xff]  ;;  %v723_v54 = vld [vmem:[%s2470_s22 + $0xb0] sm:$0xff]  ;;  %v718_v55 = vld [vmem:[%s2470_s22 + $0x88] sm:$0xff]  ;;  %s2526_s30 = scalar_lea.vmem (%p2306_p6), %s2955_s3, %s1594_s4  }
  0x7b   : > { %764 = vmatpush1.msra.mxu0 %v729_v45  ;;  %835 = vmatpush1.msra.mxu1 %v731_v46  ;;  %v720_v56 = vld [vmem:[%s2470_s22 + $0x98] sm:$0xff]  ;;  %v717_v57 = vld [vmem:[%s2470_s22 + $0x80] sm:$0xff]  ;;  %v719_v58 = vld [vmem:[%s2470_s22 + $0x90] sm:$0xff] }
  0x7c   : > { %765 = vmatprep.subr.mxu0 %v726_v47  ;;  %836 = vmatprep.subr.mxu1 %v728_v48  ;;  %v714_v59 = vld [vmem:[%s2470_s22 + $0x68] sm:$0xff]  ;;  %v716_v60 = vld [vmem:[%s2470_s22 + $0x78] sm:$0xff]  ;;  %v713_v61 = vld [vmem:[%s2470_s22 + $0x60] sm:$0xff] }
  0x7d   : > { %766 = vmatpush1.msra.mxu0 %v725_v49  ;;  %837 = vmatpush1.msra.mxu1 %v727_v50  ;;  %v715_v62 = vld [vmem:[%s2470_s22 + $0x70] sm:$0xff]  ;;  %v710_v63 = vld [vmem:[%s2470_s22 + $0x48] sm:$0xff]  ;;  %v712_v0 = vld [vmem:[%s2470_s22 + $0x58] sm:$0xff] }
  0x7e   : > { %767 = vmatprep.subr.mxu0 %v722_v51  ;;  %838 = vmatprep.subr.mxu1 %v724_v52  ;;  %v709_v1 = vld [vmem:[%s2470_s22 + $0x40] sm:$0xff]  ;;  %v711_v2 = vld [vmem:[%s2470_s22 + $0x50] sm:$0xff]  ;;  %v706_v3 = vld [vmem:[%s2470_s22 + $0x28] sm:$0xff] }
  0x7f   : > { %768 = vmatpush1.msra.mxu0 %v721_v53  ;;  %839 = vmatpush1.msra.mxu1 %v723_v54  ;;  %v708_v4 = vld [vmem:[%s2470_s22 + $0x38] sm:$0xff]  ;;  %v705_v5 = vld [vmem:[%s2470_s22 + $0x20] sm:$0xff]  ;;  %v707_v6 = vld [vmem:[%s2470_s22 + $0x30] sm:$0xff] }
  0x80   : > { %769 = vmatprep.subr.mxu0 %v718_v55  ;;  %840 = vmatprep.subr.mxu1 %v720_v56  ;;  %v702_v7 = vld [vmem:[%s2470_s22 + $0x8] sm:$0xff]  ;;  %v704_v8 = vld [vmem:[%s2470_s22 + $0x18] sm:$0xff]  ;;  %v701_v9 = vld [vmem:[%s2470_s22] sm:$0xff] }
  0x81   : > { %770 = vmatpush1.msra.mxu0 %v717_v57  ;;  %841 = vmatpush1.msra.mxu1 %v719_v58  ;;  %v703_v10 = vld [vmem:[%s2470_s22 + $0x10] sm:$0xff]  ;;  %v700_v11 = vld [vmem:[%s2952_s0] sm:$0xff] }
  0x82   : > { %771 = vmatprep.subr.mxu0 %v714_v59  ;;  %842 = vmatprep.subr.mxu1 %v716_v60 }
  0x83   : > { %772 = vmatpush1.msra.mxu0 %v713_v61  ;;  %843 = vmatpush1.msra.mxu1 %v715_v62 }
  0x84   : > { %773 = vmatprep.subr.mxu0 %v710_v63  ;;  %844 = vmatprep.subr.mxu1 %v712_v0 }
  0x85   : > { %774 = vmatpush1.msra.mxu0 %v709_v1  ;;  %845 = vmatpush1.msra.mxu1 %v711_v2 }
  0x86   : > { %775 = vmatprep.subr.mxu0 %v706_v3  ;;  %846 = vmatprep.subr.mxu1 %v708_v4 }
  0x87   : > { %776 = vmatpush1.msra.mxu0 %v705_v5  ;;  %847 = vmatpush1.msra.mxu1 %v707_v6 }
  0x88   : > { %777 = vmatprep.subr.mxu0 %v702_v7  ;;  %848 = vmatprep.subr.mxu1 %v704_v8 }
  0x89   : > { %778 = vmatpush1.msra.mxu0 %v701_v9  ;;  %849 = vmatpush1.msra.mxu1 %v703_v10 }
  0x8a   : > { %1588 = vmatmul.mubr.msk.f32.vlgmr.msra.gmra.mxu0 %vm743_vm0, %v700_v11  ;;  %1589 = vmatmul.mubr.msk.f32.vlgmr.msra.gmra.mxu1 %vm743_vm0, %v700_v11 }
  0xf3   : > { %v741_v12 = vpop.permute.xlu0 %740 }
 0x14a   : > { %v813_v13 = vpop.f32.mrf.mxu0  ;;  %v884_v14 = vpop.f32.mrf.mxu1 }
 0x14b   : > { %v814_v15 = vadd.f32 %v813_v13, %v741_v12  ;;  %v885_v16 = vadd.f32 %v884_v14, %v741_v12 }
 0x14c   : > { %v815_v17 = vpop.f32.mrf.mxu0  ;;  %v886_v18 = vpop.f32.mrf.mxu1 }
 0x14d   : > { %v889_v19 = vmax.f32 %v814_v15, 0.0  ;;  %v891_v20 = vmax.f32 %v885_v16, 0.0  ;;  %v816_v21 = vadd.f32 %v815_v17, %v741_v12  ;;  %v887_v22 = vadd.f32 %v886_v18, %v741_v12  ;;  %903 = sbr.rel (!%p2306_p6) target bundleno = 484 (0x1e4), region = 102 }
 0x14f   : > { %893 = vst [vmem:[%s2513_s26] sm:$0xff] %v889_v19  ;;  %895 = vst [vmem:[%s2513_s26 + $0x10] sm:$0xff] %v891_v20  ;;  %v890_v23 = vmax.f32 %v816_v21, 0.0  ;;  %v892_v24 = vmax.f32 %v887_v22, 0.0 }
 0x151   : > { %894 = vst [vmem:[%s2513_s26 + $0x8] sm:$0xff] %v890_v23  ;;  %896 = vst [vmem:[%s2513_s26 + $0x18] sm:$0xff] %v892_v24 }
 0x152   : > { %s2994_s9 = smov (!%p906_p11, %s905_s9), 4 }
 0x153   : > { %s1592_s10 = sshll.u32 %s2994_s9, 7  ;;  %s2528_s21 = sshll.u32 %s2994_s9, 3 }
 0x154   : > { %p1596_p12 = scmp.eq.s32.totalorder %s1592_s10, 0 }
 0x155   : > { %p918_p6 = scmp.lt.u32.totalorder (!%p1596_p12), %s2528_s21, 8 }
 0x156   : > { %917 = sbr.rel (%p1596_p12) target bundleno = 484 (0x1e4), region = 106 }
 0x15b   : > { %921 = sbr.rel (%p918_p6) target bundleno = 475 (0x1db), region = 110  ;;  %s2532_s14 = sand.u32 (!%p918_p6), 7, %s2528_s21  }
 0x15c   : > { %p938_p13 = scmp.eq.s32.totalorder (!%p918_p6), %s2532_s14, 0  ;;  %p1597_p0 = scmp.ne.s32.totalorder (!%p918_p6), %s2532_s14, 0 }
 0x160   : > { %941 = sbr.rel (%p1597_p0) target bundleno = 411 (0x19b), region = 125  ;;  %s942_s15 = sshrl.u32 (!%p1597_p0), %s2528_s21, 3 }
 0x161   : > { %s2539_s23 = sshrl.u32 (!%p1597_p0), %s942_s15, 6 }
 0x162   : > { %p1598_p1 = scmp.le.s32.totalorder (!%p1597_p0), %s2539_s23, 0 }
 0x165   : > { %1472 = sbr.rel (%p1598_p1) target bundleno = 395 (0x18b), region = 273  ;;  %s2965_s25 = smov (!%p1598_p1), %s2526_s30 }
 0x166   : > { %s2966_s5 = smov (!%p1598_p1), %s2513_s26  ;;  %s2548_s11 = smov (!%p1598_p1), 0  }
 0x167   : > { %s2550_s22 = smov (!%p1598_p1), 0  }
 0x16a LB: >> { %v955_v25 = vld [vmem:[%s2174_s5] sm:$0xff]  ;;  %v957_v26 = vld [vmem:[%s2174_s5 + $0x8] sm:$0xff]  ;;  %v959_v27 = vld [vmem:[%s2174_s5 + $0x10] sm:$0xff]  ;;  %s1083_s6 = sadd.s32 1, %s2178_s11  ;;  %s949_s22 = sadd.s32 1, %s2182_s22   ;;  %s2182_s22 = sphi %s2550_s22, %s949_s22   ;;  %s2178_s11 = sphi %s2548_s11, %s2969_s11   ;;  %s2174_s5 = sphi %s2966_s5, %s2968_s5   ;;  %s2170_s25 = sphi %s2965_s25, %s2967_s25  }
 0x16b   : >> { %956 = vst [vmem:[%s2170_s25] sm:$0xff] %v955_v25  ;;  %958 = vst [vmem:[%s2170_s25 + $0x8] sm:$0xff] %v957_v26  ;;  %v961_v28 = vld [vmem:[%s2174_s5 + $0x18] sm:$0xff]  ;;  %v963_v29 = vld [vmem:[%s2174_s5 + $0x20] sm:$0xff]  ;;  %p1084_p2 = scmp.ge.s32.totalorder %s1083_s6, %s2539_s23  ;;  %p948_p3 = scmp.ge.s32.totalorder %s949_s22, %s2539_s23 }
 0x16c   : >> { %960 = vst [vmem:[%s2170_s25 + $0x10] sm:$0xff] %v959_v27  ;;  %v965_v30 = vld [vmem:[%s2174_s5 + $0x28] sm:$0xff]  ;;  %962 = vst [vmem:[%s2170_s25 + $0x18] sm:$0xff] %v961_v28  ;;  %v967_v31 = vld [vmem:[%s2174_s5 + $0x30] sm:$0xff] }
 0x16d   : >> { %964 = vst [vmem:[%s2170_s25 + $0x20] sm:$0xff] %v963_v29  ;;  %966 = vst [vmem:[%s2170_s25 + $0x28] sm:$0xff] %v965_v30  ;;  %v969_v32 = vld [vmem:[%s2174_s5 + $0x38] sm:$0xff]  ;;  %v971_v33 = vld [vmem:[%s2174_s5 + $0x40] sm:$0xff]  ;;  %s2996_s6 = smov (%p1084_p2, %s1083_s6), 0 }
 0x16e   : >> { %968 = vst [vmem:[%s2170_s25 + $0x30] sm:$0xff] %v967_v31  ;;  %970 = vst [vmem:[%s2170_s25 + $0x38] sm:$0xff] %v969_v32  ;;  %v973_v34 = vld [vmem:[%s2174_s5 + $0x48] sm:$0xff]  ;;  %v975_v35 = vld [vmem:[%s2174_s5 + $0x50] sm:$0xff]  ;;  %s1599_s7 = sshll.u32 %s2996_s6, 9  ;;  %s2969_s11 = smov %s2996_s6 }
 0x16f   : >> { %972 = vst [vmem:[%s2170_s25 + $0x40] sm:$0xff] %v971_v33  ;;  %v977_v36 = vld [vmem:[%s2174_s5 + $0x58] sm:$0xff]  ;;  %974 = vst [vmem:[%s2170_s25 + $0x48] sm:$0xff] %v973_v34  ;;  %v979_v37 = vld [vmem:[%s2174_s5 + $0x60] sm:$0xff]  ;;  %s2606_s8 = scalar_lea.vmem %s2513_s26, %s1599_s7 [#allocation3]   ;;  %s2609_s12 = scalar_lea.vmem %s2526_s30, %s1599_s7  }
 0x170   : >> { %976 = vst [vmem:[%s2170_s25 + $0x50] sm:$0xff] %v975_v35  ;;  %978 = vst [vmem:[%s2170_s25 + $0x58] sm:$0xff] %v977_v36  ;;  %v981_v38 = vld [vmem:[%s2174_s5 + $0x68] sm:$0xff]  ;;  %v983_v39 = vld [vmem:[%s2174_s5 + $0x70] sm:$0xff] }
 0x171   : >> { %980 = vst [vmem:[%s2170_s25 + $0x60] sm:$0xff] %v979_v37  ;;  %982 = vst [vmem:[%s2170_s25 + $0x68] sm:$0xff] %v981_v38  ;;  %v985_v40 = vld [vmem:[%s2174_s5 + $0x78] sm:$0xff]  ;;  %v987_v41 = vld [vmem:[%s2174_s5 + $0x80] sm:$0xff] }
 0x172   : >> { %984 = vst [vmem:[%s2170_s25 + $0x70] sm:$0xff] %v983_v39  ;;  %v989_v42 = vld [vmem:[%s2174_s5 + $0x88] sm:$0xff]  ;;  %986 = vst [vmem:[%s2170_s25 + $0x78] sm:$0xff] %v985_v40  ;;  %v991_v43 = vld [vmem:[%s2174_s5 + $0x90] sm:$0xff] }
 0x173   : >> { %988 = vst [vmem:[%s2170_s25 + $0x80] sm:$0xff] %v987_v41  ;;  %990 = vst [vmem:[%s2170_s25 + $0x88] sm:$0xff] %v989_v42  ;;  %v993_v44 = vld [vmem:[%s2174_s5 + $0x98] sm:$0xff]  ;;  %v995_v45 = vld [vmem:[%s2174_s5 + $0xa0] sm:$0xff] }
 0x174   : >> { %992 = vst [vmem:[%s2170_s25 + $0x90] sm:$0xff] %v991_v43  ;;  %994 = vst [vmem:[%s2170_s25 + $0x98] sm:$0xff] %v993_v44  ;;  %v997_v46 = vld [vmem:[%s2174_s5 + $0xa8] sm:$0xff]  ;;  %v999_v47 = vld [vmem:[%s2174_s5 + $0xb0] sm:$0xff] }
 0x175   : >> { %996 = vst [vmem:[%s2170_s25 + $0xa0] sm:$0xff] %v995_v45  ;;  %v1001_v48 = vld [vmem:[%s2174_s5 + $0xb8] sm:$0xff]  ;;  %998 = vst [vmem:[%s2170_s25 + $0xa8] sm:$0xff] %v997_v46  ;;  %v1003_v49 = vld [vmem:[%s2174_s5 + $0xc0] sm:$0xff] }
 0x176   : >> { %1000 = vst [vmem:[%s2170_s25 + $0xb0] sm:$0xff] %v999_v47  ;;  %1002 = vst [vmem:[%s2170_s25 + $0xb8] sm:$0xff] %v1001_v48  ;;  %v1005_v50 = vld [vmem:[%s2174_s5 + $0xc8] sm:$0xff]  ;;  %v1007_v51 = vld [vmem:[%s2174_s5 + $0xd0] sm:$0xff] }
 0x177   : >> { %1004 = vst [vmem:[%s2170_s25 + $0xc0] sm:$0xff] %v1003_v49  ;;  %1006 = vst [vmem:[%s2170_s25 + $0xc8] sm:$0xff] %v1005_v50  ;;  %v1009_v52 = vld [vmem:[%s2174_s5 + $0xd8] sm:$0xff]  ;;  %v1011_v53 = vld [vmem:[%s2174_s5 + $0xe0] sm:$0xff] }
 0x178   : >> { %1008 = vst [vmem:[%s2170_s25 + $0xd0] sm:$0xff] %v1007_v51  ;;  %v1013_v54 = vld [vmem:[%s2174_s5 + $0xe8] sm:$0xff]  ;;  %1010 = vst [vmem:[%s2170_s25 + $0xd8] sm:$0xff] %v1009_v52  ;;  %v1015_v55 = vld [vmem:[%s2174_s5 + $0xf0] sm:$0xff] }
 0x179   : >> { %1012 = vst [vmem:[%s2170_s25 + $0xe0] sm:$0xff] %v1011_v53  ;;  %1014 = vst [vmem:[%s2170_s25 + $0xe8] sm:$0xff] %v1013_v54  ;;  %v1017_v56 = vld [vmem:[%s2174_s5 + $0xf8] sm:$0xff]  ;;  %v1019_v57 = vld [vmem:[%s2174_s5 + $0x100] sm:$0xff] }
 0x17a   : >> { %1016 = vst [vmem:[%s2170_s25 + $0xf0] sm:$0xff] %v1015_v55  ;;  %1018 = vst [vmem:[%s2170_s25 + $0xf8] sm:$0xff] %v1017_v56  ;;  %v1021_v58 = vld [vmem:[%s2174_s5 + $0x108] sm:$0xff]  ;;  %v1023_v59 = vld [vmem:[%s2174_s5 + $0x110] sm:$0xff] }
 0x17b   : >> { %1020 = vst [vmem:[%s2170_s25 + $0x100] sm:$0xff] %v1019_v57  ;;  %v1025_v60 = vld [vmem:[%s2174_s5 + $0x118] sm:$0xff]  ;;  %1022 = vst [vmem:[%s2170_s25 + $0x108] sm:$0xff] %v1021_v58  ;;  %v1027_v61 = vld [vmem:[%s2174_s5 + $0x120] sm:$0xff] }
 0x17c   : >> { %1024 = vst [vmem:[%s2170_s25 + $0x110] sm:$0xff] %v1023_v59  ;;  %1026 = vst [vmem:[%s2170_s25 + $0x118] sm:$0xff] %v1025_v60  ;;  %v1029_v62 = vld [vmem:[%s2174_s5 + $0x128] sm:$0xff]  ;;  %v1031_v63 = vld [vmem:[%s2174_s5 + $0x130] sm:$0xff] }
 0x17d   : >> { %1028 = vst [vmem:[%s2170_s25 + $0x120] sm:$0xff] %v1027_v61  ;;  %1030 = vst [vmem:[%s2170_s25 + $0x128] sm:$0xff] %v1029_v62  ;;  %v1033_v0 = vld [vmem:[%s2174_s5 + $0x138] sm:$0xff]  ;;  %v1035_v1 = vld [vmem:[%s2174_s5 + $0x140] sm:$0xff] }
 0x17e   : >> { %1032 = vst [vmem:[%s2170_s25 + $0x130] sm:$0xff] %v1031_v63  ;;  %v1037_v2 = vld [vmem:[%s2174_s5 + $0x148] sm:$0xff]  ;;  %1034 = vst [vmem:[%s2170_s25 + $0x138] sm:$0xff] %v1033_v0  ;;  %v1039_v3 = vld [vmem:[%s2174_s5 + $0x150] sm:$0xff] }
 0x17f   : >> { %1036 = vst [vmem:[%s2170_s25 + $0x140] sm:$0xff] %v1035_v1  ;;  %1038 = vst [vmem:[%s2170_s25 + $0x148] sm:$0xff] %v1037_v2  ;;  %v1041_v4 = vld [vmem:[%s2174_s5 + $0x158] sm:$0xff]  ;;  %v1043_v5 = vld [vmem:[%s2174_s5 + $0x160] sm:$0xff] }
 0x180   : >> { %1040 = vst [vmem:[%s2170_s25 + $0x150] sm:$0xff] %v1039_v3  ;;  %1042 = vst [vmem:[%s2170_s25 + $0x158] sm:$0xff] %v1041_v4  ;;  %v1045_v6 = vld [vmem:[%s2174_s5 + $0x168] sm:$0xff]  ;;  %v1047_v7 = vld [vmem:[%s2174_s5 + $0x170] sm:$0xff] }
 0x181   : >> { %1044 = vst [vmem:[%s2170_s25 + $0x160] sm:$0xff] %v1043_v5  ;;  %v1049_v8 = vld [vmem:[%s2174_s5 + $0x178] sm:$0xff]  ;;  %1046 = vst [vmem:[%s2170_s25 + $0x168] sm:$0xff] %v1045_v6  ;;  %v1051_v9 = vld [vmem:[%s2174_s5 + $0x180] sm:$0xff] }
 0x182   : >> { %1048 = vst [vmem:[%s2170_s25 + $0x170] sm:$0xff] %v1047_v7  ;;  %1050 = vst [vmem:[%s2170_s25 + $0x178] sm:$0xff] %v1049_v8  ;;  %v1053_v10 = vld [vmem:[%s2174_s5 + $0x188] sm:$0xff]  ;;  %v1055_v11 = vld [vmem:[%s2174_s5 + $0x190] sm:$0xff] }
 0x183   : >> { %1052 = vst [vmem:[%s2170_s25 + $0x180] sm:$0xff] %v1051_v9  ;;  %1054 = vst [vmem:[%s2170_s25 + $0x188] sm:$0xff] %v1053_v10  ;;  %v1057_v12 = vld [vmem:[%s2174_s5 + $0x198] sm:$0xff]  ;;  %v1059_v13 = vld [vmem:[%s2174_s5 + $0x1a0] sm:$0xff] }
 0x184   : >> { %1056 = vst [vmem:[%s2170_s25 + $0x190] sm:$0xff] %v1055_v11  ;;  %v1061_v14 = vld [vmem:[%s2174_s5 + $0x1a8] sm:$0xff]  ;;  %1058 = vst [vmem:[%s2170_s25 + $0x198] sm:$0xff] %v1057_v12  ;;  %v1063_v15 = vld [vmem:[%s2174_s5 + $0x1b0] sm:$0xff] }
 0x185   : >> { %1060 = vst [vmem:[%s2170_s25 + $0x1a0] sm:$0xff] %v1059_v13  ;;  %1062 = vst [vmem:[%s2170_s25 + $0x1a8] sm:$0xff] %v1061_v14  ;;  %v1065_v16 = vld [vmem:[%s2174_s5 + $0x1b8] sm:$0xff]  ;;  %v1067_v17 = vld [vmem:[%s2174_s5 + $0x1c0] sm:$0xff] }
 0x186   : >> { %1064 = vst [vmem:[%s2170_s25 + $0x1b0] sm:$0xff] %v1063_v15  ;;  %1066 = vst [vmem:[%s2170_s25 + $0x1b8] sm:$0xff] %v1065_v16  ;;  %v1069_v18 = vld [vmem:[%s2174_s5 + $0x1c8] sm:$0xff]  ;;  %v1071_v19 = vld [vmem:[%s2174_s5 + $0x1d0] sm:$0xff]  ;;  %951 = sbr.rel (!%p948_p3) target bundleno = 362 (0x16a), region = 279 }
 0x187   : >> { %1068 = vst [vmem:[%s2170_s25 + $0x1c0] sm:$0xff] %v1067_v17  ;;  %v1073_v20 = vld [vmem:[%s2174_s5 + $0x1d8] sm:$0xff]  ;;  %1070 = vst [vmem:[%s2170_s25 + $0x1c8] sm:$0xff] %v1069_v18  ;;  %v1075_v21 = vld [vmem:[%s2174_s5 + $0x1e0] sm:$0xff] }
 0x188   : >> { %1072 = vst [vmem:[%s2170_s25 + $0x1d0] sm:$0xff] %v1071_v19  ;;  %1074 = vst [vmem:[%s2170_s25 + $0x1d8] sm:$0xff] %v1073_v20  ;;  %v1077_v22 = vld [vmem:[%s2174_s5 + $0x1e8] sm:$0xff]  ;;  %v1079_v23 = vld [vmem:[%s2174_s5 + $0x1f0] sm:$0xff] }
 0x189   : >> { %1076 = vst [vmem:[%s2170_s25 + $0x1e0] sm:$0xff] %v1075_v21  ;;  %1078 = vst [vmem:[%s2170_s25 + $0x1e8] sm:$0xff] %v1077_v22  ;;  %v1081_v24 = vld [vmem:[%s2174_s5 + $0x1f8] sm:$0xff]  ;;  %s2968_s5 = smov %s2606_s8 }
 0x18a   : >> { %1080 = vst [vmem:[%s2170_s25 + $0x1f0] sm:$0xff] %v1079_v23  ;;  %1082 = vst [vmem:[%s2170_s25 + $0x1f8] sm:$0xff] %v1081_v24  ;;  %s2967_s25 = smov %s2609_s12 }
 0x18b PF: > { %s2715_s29 = sand.u32 63, %s942_s15   ;;  %s1625_s9 = sshll.u32 %s2539_s23, 13 }
 0x18c   : > { %s1094_s28 = sshra.s32 %s1625_s9, 4  ;;  %p1604_p4 = scmp.le.s32.totalorder %s2715_s29, 0 }
 0x18d   : > { %s1095_s4 = scalar_lea.vmem %s2513_s26, %s1094_s28 [#allocation3]   ;;  %s1098_s2 = scalar_lea.vmem %s2526_s30, %s1094_s28  }
 0x18e   : > { %1486 = sbr.rel (%p1604_p4) target bundleno = 411 (0x19b), region = 284  ;;  %s2184_s24 = smov (!%p1604_p4), %s1098_s2  }
 0x18f   : > { %s2188_s10 = smov (!%p1604_p4), %s1095_s4   ;;  %s2192_s6 = smov (!%p1604_p4), 0  }
 0x190   : > { %s2196_s22 = smov (!%p1604_p4), 0  }
 0x193 LB: >> { %v1110_v25 = vld [vmem:[%s2190_s10] sm:$0xff]  ;;  %s1112_s15 = sadd.s32 1, %s2194_s6  ;;  %s1104_s22 = sadd.s32 1, %s2198_s22   ;;  %s2198_s22 = sphi %s2196_s22, %s1104_s22   ;;  %s2194_s6 = sphi %s2192_s6, %s2193_s6   ;;  %s2190_s10 = sphi %s2188_s10, %s1117_s10   ;;  %s2186_s24 = sphi %s2184_s24, %s1118_s24  }
 0x194   : >> { %1111 = vst [vmem:[%s2186_s24] sm:$0xff] %v1110_v25  ;;  %p1113_p5 = scmp.ge.s32.totalorder %s1112_s15, %s2715_s29  ;;  %p1103_p7 = scmp.ge.s32.totalorder %s1104_s22, %s2715_s29 }
 0x196   : >> { %s2998_s15 = smov (%p1113_p5, %s1112_s15), 0  ;;  %1106 = sbr.rel (!%p1103_p7) target bundleno = 403 (0x193), region = 290 }
 0x197   : >> { %s1605_s23 = sshll.u32 %s2998_s15, 3  ;;  %s2193_s6 = smov %s2998_s15  }
 0x198   : >> { %s1117_s10 = scalar_lea.vmem %s1095_s4, %s1605_s23 [#allocation3]   ;;  %s1118_s24 = scalar_lea.vmem %s1098_s2, %s1605_s23  }
 0x19b PF: > { %1121 = sbr.rel (%p938_p13) target bundleno = 475 (0x1db), region = 143  ;;  %s2727_s25 = ssub.s32 (!%p938_p13), %s2528_s21, %s2532_s14 }
 0x19c   : > { %s1127_s5 = sshrl.u32 (!%p938_p13), %s2528_s21, 3  ;;  %s1124_s11 = scalar_lea.vmem (!%p938_p13), %s2513_s26, %s2727_s25 [#allocation3] }
 0x19d   : > { %s1126_s7 = scalar_lea.vmem (!%p938_p13), %s2526_s30, %s2727_s25  ;;  %s2736_s8 = sshrl.u32 (!%p938_p13), %s1127_s5, 6 }
 0x19e   : > { %p1607_p8 = scmp.le.s32.totalorder (!%p938_p13), %s2736_s8, 0 }
 0x1a0   : > { %1500 = sbr.rel (%p1607_p8) target bundleno = 454 (0x1c6), region = 295  ;;  %s2970_s12 = smov (!%p1607_p8), %s2526_s30 }
 0x1a1   : > { %s2971_s29 = smov (!%p1607_p8), %s2513_s26  ;;  %s2745_s9 = smov (!%p1607_p8), 0  }
 0x1a2   : > { %s2747_s28 = smov (!%p1607_p8), 0  }
 0x1a5 LB: >> { %v1140_v26 = vld [vmem:[%s2206_s29] sm:$0xff]  ;;  %v1142_v27 = vld [vmem:[%s2206_s29 + $0x8] sm:$0xff]  ;;  %v1144_v28 = vld [vmem:[%s2206_s29 + $0x10] sm:$0xff]  ;;  %s1268_s4 = sadd.s32 1, %s2210_s9  ;;  %s1134_s28 = sadd.s32 1, %s2214_s28   ;;  %s2214_s28 = sphi %s2747_s28, %s1134_s28   ;;  %s2210_s9 = sphi %s2745_s9, %s2974_s9   ;;  %s2206_s29 = sphi %s2971_s29, %s2973_s29   ;;  %s2202_s12 = sphi %s2970_s12, %s2972_s12  }
 0x1a6   : >> { %1141 = vst [vmem:[%s2202_s12] sm:$0xff] %v1140_v26  ;;  %1143 = vst [vmem:[%s2202_s12 + $0x8] sm:$0xff] %v1142_v27  ;;  %v1146_v29 = vld [vmem:[%s2206_s29 + $0x18] sm:$0xff]  ;;  %v1148_v30 = vld [vmem:[%s2206_s29 + $0x20] sm:$0xff]  ;;  %p1269_p9 = scmp.ge.s32.totalorder %s1268_s4, %s2736_s8  ;;  %p1133_p10 = scmp.ge.s32.totalorder %s1134_s28, %s2736_s8 }
 0x1a7   : >> { %1145 = vst [vmem:[%s2202_s12 + $0x10] sm:$0xff] %v1144_v28  ;;  %v1150_v31 = vld [vmem:[%s2206_s29 + $0x28] sm:$0xff]  ;;  %1147 = vst [vmem:[%s2202_s12 + $0x18] sm:$0xff] %v1146_v29  ;;  %v1152_v32 = vld [vmem:[%s2206_s29 + $0x30] sm:$0xff] }
 0x1a8   : >> { %1149 = vst [vmem:[%s2202_s12 + $0x20] sm:$0xff] %v1148_v30  ;;  %1151 = vst [vmem:[%s2202_s12 + $0x28] sm:$0xff] %v1150_v31  ;;  %v1154_v33 = vld [vmem:[%s2206_s29 + $0x38] sm:$0xff]  ;;  %v1156_v34 = vld [vmem:[%s2206_s29 + $0x40] sm:$0xff]  ;;  %s3000_s4 = smov (%p1269_p9, %s1268_s4), 0 }
 0x1a9   : >> { %1153 = vst [vmem:[%s2202_s12 + $0x30] sm:$0xff] %v1152_v32  ;;  %1155 = vst [vmem:[%s2202_s12 + $0x38] sm:$0xff] %v1154_v33  ;;  %v1158_v35 = vld [vmem:[%s2206_s29 + $0x48] sm:$0xff]  ;;  %v1160_v36 = vld [vmem:[%s2206_s29 + $0x50] sm:$0xff]  ;;  %s1608_s2 = sshll.u32 %s3000_s4, 9  ;;  %s2974_s9 = smov %s3000_s4 }
 0x1aa   : >> { %1157 = vst [vmem:[%s2202_s12 + $0x40] sm:$0xff] %v1156_v34  ;;  %v1162_v37 = vld [vmem:[%s2206_s29 + $0x58] sm:$0xff]  ;;  %1159 = vst [vmem:[%s2202_s12 + $0x48] sm:$0xff] %v1158_v35  ;;  %v1164_v38 = vld [vmem:[%s2206_s29 + $0x60] sm:$0xff]  ;;  %s2803_s24 = scalar_lea.vmem %s2513_s26, %s1608_s2 [#allocation3]   ;;  %s2806_s10 = scalar_lea.vmem %s2526_s30, %s1608_s2  }
 0x1ab   : >> { %1161 = vst [vmem:[%s2202_s12 + $0x50] sm:$0xff] %v1160_v36  ;;  %1163 = vst [vmem:[%s2202_s12 + $0x58] sm:$0xff] %v1162_v37  ;;  %v1166_v39 = vld [vmem:[%s2206_s29 + $0x68] sm:$0xff]  ;;  %v1168_v40 = vld [vmem:[%s2206_s29 + $0x70] sm:$0xff] }
 0x1ac   : >> { %1165 = vst [vmem:[%s2202_s12 + $0x60] sm:$0xff] %v1164_v38  ;;  %1167 = vst [vmem:[%s2202_s12 + $0x68] sm:$0xff] %v1166_v39  ;;  %v1170_v41 = vld [vmem:[%s2206_s29 + $0x78] sm:$0xff]  ;;  %v1172_v42 = vld [vmem:[%s2206_s29 + $0x80] sm:$0xff] }
 0x1ad   : >> { %1169 = vst [vmem:[%s2202_s12 + $0x70] sm:$0xff] %v1168_v40  ;;  %v1174_v43 = vld [vmem:[%s2206_s29 + $0x88] sm:$0xff]  ;;  %1171 = vst [vmem:[%s2202_s12 + $0x78] sm:$0xff] %v1170_v41  ;;  %v1176_v44 = vld [vmem:[%s2206_s29 + $0x90] sm:$0xff] }
 0x1ae   : >> { %1173 = vst [vmem:[%s2202_s12 + $0x80] sm:$0xff] %v1172_v42  ;;  %1175 = vst [vmem:[%s2202_s12 + $0x88] sm:$0xff] %v1174_v43  ;;  %v1178_v45 = vld [vmem:[%s2206_s29 + $0x98] sm:$0xff]  ;;  %v1180_v46 = vld [vmem:[%s2206_s29 + $0xa0] sm:$0xff] }
 0x1af   : >> { %1177 = vst [vmem:[%s2202_s12 + $0x90] sm:$0xff] %v1176_v44  ;;  %1179 = vst [vmem:[%s2202_s12 + $0x98] sm:$0xff] %v1178_v45  ;;  %v1182_v47 = vld [vmem:[%s2206_s29 + $0xa8] sm:$0xff]  ;;  %v1184_v48 = vld [vmem:[%s2206_s29 + $0xb0] sm:$0xff] }
 0x1b0   : >> { %1181 = vst [vmem:[%s2202_s12 + $0xa0] sm:$0xff] %v1180_v46  ;;  %v1186_v49 = vld [vmem:[%s2206_s29 + $0xb8] sm:$0xff]  ;;  %1183 = vst [vmem:[%s2202_s12 + $0xa8] sm:$0xff] %v1182_v47  ;;  %v1188_v50 = vld [vmem:[%s2206_s29 + $0xc0] sm:$0xff] }
 0x1b1   : >> { %1185 = vst [vmem:[%s2202_s12 + $0xb0] sm:$0xff] %v1184_v48  ;;  %1187 = vst [vmem:[%s2202_s12 + $0xb8] sm:$0xff] %v1186_v49  ;;  %v1190_v51 = vld [vmem:[%s2206_s29 + $0xc8] sm:$0xff]  ;;  %v1192_v52 = vld [vmem:[%s2206_s29 + $0xd0] sm:$0xff] }
 0x1b2   : >> { %1189 = vst [vmem:[%s2202_s12 + $0xc0] sm:$0xff] %v1188_v50  ;;  %1191 = vst [vmem:[%s2202_s12 + $0xc8] sm:$0xff] %v1190_v51  ;;  %v1194_v53 = vld [vmem:[%s2206_s29 + $0xd8] sm:$0xff]  ;;  %v1196_v54 = vld [vmem:[%s2206_s29 + $0xe0] sm:$0xff] }
 0x1b3   : >> { %1193 = vst [vmem:[%s2202_s12 + $0xd0] sm:$0xff] %v1192_v52  ;;  %v1198_v55 = vld [vmem:[%s2206_s29 + $0xe8] sm:$0xff]  ;;  %1195 = vst [vmem:[%s2202_s12 + $0xd8] sm:$0xff] %v1194_v53  ;;  %v1200_v56 = vld [vmem:[%s2206_s29 + $0xf0] sm:$0xff] }
 0x1b4   : >> { %1197 = vst [vmem:[%s2202_s12 + $0xe0] sm:$0xff] %v1196_v54  ;;  %1199 = vst [vmem:[%s2202_s12 + $0xe8] sm:$0xff] %v1198_v55  ;;  %v1202_v57 = vld [vmem:[%s2206_s29 + $0xf8] sm:$0xff]  ;;  %v1204_v58 = vld [vmem:[%s2206_s29 + $0x100] sm:$0xff] }
 0x1b5   : >> { %1201 = vst [vmem:[%s2202_s12 + $0xf0] sm:$0xff] %v1200_v56  ;;  %1203 = vst [vmem:[%s2202_s12 + $0xf8] sm:$0xff] %v1202_v57  ;;  %v1206_v59 = vld [vmem:[%s2206_s29 + $0x108] sm:$0xff]  ;;  %v1208_v60 = vld [vmem:[%s2206_s29 + $0x110] sm:$0xff] }
 0x1b6   : >> { %1205 = vst [vmem:[%s2202_s12 + $0x100] sm:$0xff] %v1204_v58  ;;  %v1210_v61 = vld [vmem:[%s2206_s29 + $0x118] sm:$0xff]  ;;  %1207 = vst [vmem:[%s2202_s12 + $0x108] sm:$0xff] %v1206_v59  ;;  %v1212_v62 = vld [vmem:[%s2206_s29 + $0x120] sm:$0xff] }
 0x1b7   : >> { %1209 = vst [vmem:[%s2202_s12 + $0x110] sm:$0xff] %v1208_v60  ;;  %1211 = vst [vmem:[%s2202_s12 + $0x118] sm:$0xff] %v1210_v61  ;;  %v1214_v63 = vld [vmem:[%s2206_s29 + $0x128] sm:$0xff]  ;;  %v1216_v0 = vld [vmem:[%s2206_s29 + $0x130] sm:$0xff] }
 0x1b8   : >> { %1213 = vst [vmem:[%s2202_s12 + $0x120] sm:$0xff] %v1212_v62  ;;  %1215 = vst [vmem:[%s2202_s12 + $0x128] sm:$0xff] %v1214_v63  ;;  %v1218_v1 = vld [vmem:[%s2206_s29 + $0x138] sm:$0xff]  ;;  %v1220_v2 = vld [vmem:[%s2206_s29 + $0x140] sm:$0xff] }
 0x1b9   : >> { %1217 = vst [vmem:[%s2202_s12 + $0x130] sm:$0xff] %v1216_v0  ;;  %v1222_v3 = vld [vmem:[%s2206_s29 + $0x148] sm:$0xff]  ;;  %1219 = vst [vmem:[%s2202_s12 + $0x138] sm:$0xff] %v1218_v1  ;;  %v1224_v4 = vld [vmem:[%s2206_s29 + $0x150] sm:$0xff] }
 0x1ba   : >> { %1221 = vst [vmem:[%s2202_s12 + $0x140] sm:$0xff] %v1220_v2  ;;  %1223 = vst [vmem:[%s2202_s12 + $0x148] sm:$0xff] %v1222_v3  ;;  %v1226_v5 = vld [vmem:[%s2206_s29 + $0x158] sm:$0xff]  ;;  %v1228_v6 = vld [vmem:[%s2206_s29 + $0x160] sm:$0xff] }
 0x1bb   : >> { %1225 = vst [vmem:[%s2202_s12 + $0x150] sm:$0xff] %v1224_v4  ;;  %1227 = vst [vmem:[%s2202_s12 + $0x158] sm:$0xff] %v1226_v5  ;;  %v1230_v7 = vld [vmem:[%s2206_s29 + $0x168] sm:$0xff]  ;;  %v1232_v8 = vld [vmem:[%s2206_s29 + $0x170] sm:$0xff] }
 0x1bc   : >> { %1229 = vst [vmem:[%s2202_s12 + $0x160] sm:$0xff] %v1228_v6  ;;  %v1234_v9 = vld [vmem:[%s2206_s29 + $0x178] sm:$0xff]  ;;  %1231 = vst [vmem:[%s2202_s12 + $0x168] sm:$0xff] %v1230_v7  ;;  %v1236_v10 = vld [vmem:[%s2206_s29 + $0x180] sm:$0xff] }
 0x1bd   : >> { %1233 = vst [vmem:[%s2202_s12 + $0x170] sm:$0xff] %v1232_v8  ;;  %1235 = vst [vmem:[%s2202_s12 + $0x178] sm:$0xff] %v1234_v9  ;;  %v1238_v11 = vld [vmem:[%s2206_s29 + $0x188] sm:$0xff]  ;;  %v1240_v12 = vld [vmem:[%s2206_s29 + $0x190] sm:$0xff] }
 0x1be   : >> { %1237 = vst [vmem:[%s2202_s12 + $0x180] sm:$0xff] %v1236_v10  ;;  %1239 = vst [vmem:[%s2202_s12 + $0x188] sm:$0xff] %v1238_v11  ;;  %v1242_v13 = vld [vmem:[%s2206_s29 + $0x198] sm:$0xff]  ;;  %v1244_v14 = vld [vmem:[%s2206_s29 + $0x1a0] sm:$0xff] }
 0x1bf   : >> { %1241 = vst [vmem:[%s2202_s12 + $0x190] sm:$0xff] %v1240_v12  ;;  %v1246_v15 = vld [vmem:[%s2206_s29 + $0x1a8] sm:$0xff]  ;;  %1243 = vst [vmem:[%s2202_s12 + $0x198] sm:$0xff] %v1242_v13  ;;  %v1248_v16 = vld [vmem:[%s2206_s29 + $0x1b0] sm:$0xff] }
 0x1c0   : >> { %1245 = vst [vmem:[%s2202_s12 + $0x1a0] sm:$0xff] %v1244_v14  ;;  %1247 = vst [vmem:[%s2202_s12 + $0x1a8] sm:$0xff] %v1246_v15  ;;  %v1250_v17 = vld [vmem:[%s2206_s29 + $0x1b8] sm:$0xff]  ;;  %v1252_v18 = vld [vmem:[%s2206_s29 + $0x1c0] sm:$0xff] }
 0x1c1   : >> { %1249 = vst [vmem:[%s2202_s12 + $0x1b0] sm:$0xff] %v1248_v16  ;;  %1251 = vst [vmem:[%s2202_s12 + $0x1b8] sm:$0xff] %v1250_v17  ;;  %v1254_v19 = vld [vmem:[%s2206_s29 + $0x1c8] sm:$0xff]  ;;  %v1256_v20 = vld [vmem:[%s2206_s29 + $0x1d0] sm:$0xff]  ;;  %1136 = sbr.rel (!%p1133_p10) target bundleno = 421 (0x1a5), region = 301 }
 0x1c2   : >> { %1253 = vst [vmem:[%s2202_s12 + $0x1c0] sm:$0xff] %v1252_v18  ;;  %v1258_v21 = vld [vmem:[%s2206_s29 + $0x1d8] sm:$0xff]  ;;  %1255 = vst [vmem:[%s2202_s12 + $0x1c8] sm:$0xff] %v1254_v19  ;;  %v1260_v22 = vld [vmem:[%s2206_s29 + $0x1e0] sm:$0xff] }
 0x1c3   : >> { %1257 = vst [vmem:[%s2202_s12 + $0x1d0] sm:$0xff] %v1256_v20  ;;  %1259 = vst [vmem:[%s2202_s12 + $0x1d8] sm:$0xff] %v1258_v21  ;;  %v1262_v23 = vld [vmem:[%s2206_s29 + $0x1e8] sm:$0xff]  ;;  %v1264_v24 = vld [vmem:[%s2206_s29 + $0x1f0] sm:$0xff] }
 0x1c4   : >> { %1261 = vst [vmem:[%s2202_s12 + $0x1e0] sm:$0xff] %v1260_v22  ;;  %1263 = vst [vmem:[%s2202_s12 + $0x1e8] sm:$0xff] %v1262_v23  ;;  %v1266_v25 = vld [vmem:[%s2206_s29 + $0x1f8] sm:$0xff]  ;;  %s2973_s29 = smov %s2803_s24 }
 0x1c5   : >> { %1265 = vst [vmem:[%s2202_s12 + $0x1f0] sm:$0xff] %v1264_v24  ;;  %1267 = vst [vmem:[%s2202_s12 + $0x1f8] sm:$0xff] %v1266_v25  ;;  %s2972_s12 = smov %s2806_s10 }
 0x1c6 PF: > { %s2912_s6 = sand.u32 63, %s1127_s5   ;;  %s1627_s22 = sshll.u32 %s2736_s8, 13 }
 0x1c7   : > { %s1279_s15 = sshra.s32 %s1627_s22, 4  ;;  %p1613_p11 = scmp.le.s32.totalorder %s2912_s6, 0 }
 0x1c8   : > { %s1280_s23 = scalar_lea.vmem %s2513_s26, %s1279_s15 [#allocation3]   ;;  %s1283_s2 = scalar_lea.vmem %s2526_s30, %s1279_s15  }
 0x1c9   : > { %1514 = sbr.rel (%p1613_p11) target bundleno = 470 (0x1d6), region = 306  ;;  %s2216_s24 = smov (!%p1613_p11), %s1283_s2  }
 0x1ca   : > { %s2220_s4 = smov (!%p1613_p11), %s1280_s23   ;;  %s2224_s10 = smov (!%p1613_p11), 0  }
 0x1cb   : > { %s2228_s28 = smov (!%p1613_p11), 0  }
 0x1ce LB: >> { %v1295_v26 = vld [vmem:[%s2222_s4] sm:$0xff]  ;;  %s1297_s5 = sadd.s32 1, %s2226_s10  ;;  %s1289_s28 = sadd.s32 1, %s2230_s28   ;;  %s2230_s28 = sphi %s2228_s28, %s1289_s28   ;;  %s2226_s10 = sphi %s2224_s10, %s2225_s10   ;;  %s2222_s4 = sphi %s2220_s4, %s1302_s4   ;;  %s2218_s24 = sphi %s2216_s24, %s1303_s24  }
 0x1cf   : >> { %1296 = vst [vmem:[%s2218_s24] sm:$0xff] %v1295_v26  ;;  %p1298_p12 = scmp.ge.s32.totalorder %s1297_s5, %s2912_s6  ;;  %p1288_p6 = scmp.ge.s32.totalorder %s1289_s28, %s2912_s6 }
 0x1d1   : >> { %s3002_s5 = smov (%p1298_p12, %s1297_s5), 0  ;;  %1291 = sbr.rel (!%p1288_p6) target bundleno = 462 (0x1ce), region = 312 }
 0x1d2   : >> { %s1614_s8 = sshll.u32 %s3002_s5, 3  ;;  %s2225_s10 = smov %s3002_s5  }
 0x1d3   : >> { %s1302_s4 = scalar_lea.vmem %s1280_s23, %s1614_s8 [#allocation3]   ;;  %s1303_s24 = scalar_lea.vmem %s1283_s2, %s1614_s8  }
 0x1d6 PF: > { %s2236_s12 = smov 1  }
 0x1d7   : > { %s1304_s29 = sshll.u32 %s2236_s12, %s2532_s14 }
 0x1d8   : > { %s1616_s9 = sadd.s32 4294967295, %s1304_s29 }
 0x1d9   : > { %v1314_v27 = vld [vmem:[%s1124_s11] sm:%s1616_s9] }
 0x1da   : > { %1315 = vst [vmem:[%s1126_s7] sm:%s1616_s9] %v1314_v27 }
 0x1db PF: > { %p1617_p13 = scmp.ge.u32.totalorder %s2528_s21, 8 }
 0x1dc   : > { %s2237_s22 = smov (!%p1617_p13), 1  }
 0x1dd   : > { %924 = sbr.rel (%p1617_p13) target bundleno = 484 (0x1e4), region = 114  ;;  %s925_s6 = sshll.u32 (!%p1617_p13), %s2237_s22, %s2528_s21 }
 0x1de   : > { %s1618_s15 = sadd.s32 (!%p1617_p13), 4294967295, %s925_s6 }
 0x1e2   : > { %v935_v28 = vld [vmem:[%s2513_s26] sm:%s1618_s15] }
 0x1e3   : > { %936 = vst [vmem:[%s2526_s30] sm:%s1618_s15] %v935_v28 }
 0x1e4 PF: > { %s13_s18 = sadd.s32 1, %s2134_s18   ;;  %s2975_s12 = smov %s2114_s13 }
 0x1e5   : > { %p10_p0 = scmp.ge.s32.totalorder %s13_s18, 10   ;;  %s2976_s13 = smov %s2314_s27 }
 0x1e6   : > { %s2977_s14 = smov %s2126_s16  ;;  %s2978_s15 = smov %s2130_s17 }
 0x1e7   : > { %s2979_s16 = smov %s2982_s19  ;;  %s2980_s17 = smov %s2986_s20 }
 0x1e8   :  { %12 = sbr.rel (!%p10_p0) target bundleno = 6 (0x6), region = 323 }

// kernel: pixel_decoder_forward.9
= control target key start
LH: loop header
LB: loop body
LE: loop exit
PB: predicated region body
PF: predicated region fallthrough
CT: control target
= control target key end

     0   :  { %s2770_s0 = inlined_call_operand.vmem [shape: f32[12,32], index: 0, kind: input, shape index: {}]   ;;  %s2771_s1 = inlined_call_operand.vmem [shape: f32[12,1], index: 1, kind: input, shape index: {}]   ;;  %s2772_s2 = inlined_call_operand.vmem [shape: f32[2,32,1764], index: 2, kind: input, shape index: {}]   ;;  %s2773_s3 = inlined_call_operand.vmem [shape: f32[2,12,1764], index: 3, kind: output, shape index: {}]  }
   0x1   :  { %2774 = sst [smem:[#allocation4_spill]] %s2772_s2 }
   0x2   :  { %s2223_s12 = smov 0   ;;  %s2225_s13 = smov 0  }
   0x3   :  { %s2227_s14 = smov 0   ;;  %s2229_s15 = smov 0  }
   0x4   :  { %s2231_s16 = smov 0   ;;  %s2233_s17 = smov 0  }
   0x5   :  { %s2235_s18 = smov 0  }
   0x6 LB: > { %s22_s19 = sadd.s32 1, %s2091_s16  ;;  %s25_s20 = sadd.s32 1, %s2095_s17  ;;  %s2099_s18 = sphi %s2235_s18, %s13_s18   ;;  %s2095_s17 = sphi %s2233_s17, %s2799_s17   ;;  %s2091_s16 = sphi %s2231_s16, %s2798_s16   ;;  %s2087_s15 = sphi %s2229_s15, %s2797_s15   ;;  %s2083_s14 = sphi %s2227_s14, %s2796_s14   ;;  %s2079_s13 = sphi %s2225_s13, %s2795_s13   ;;  %s2075_s12 = sphi %s2223_s12, %s2794_s12  }
   0x7   : > { %p23_p0 = scmp.ge.s32.totalorder %s22_s19, 4  ;;  %s1501_s21 = sadd.s32 4294967295, %s2099_s18  }
   0x8   : > { %p83_p1 = scmp.ne.s32.totalorder %s2079_s13, %s2075_s12  ;;  %p84_p2 = scmp.eq.s32.totalorder %s2099_s18, 0 }
   0x9   : > { %s2801_s19 = smov (%p23_p0, %s22_s19), 0  ;;  %s2803_s20 = smov (!%p23_p0, %s25_s20), %s2095_s17 }
   0xa   : > { %p27_p3 = scmp.ge.s32.totalorder %s2803_s20, 2  ;;  %p115_p4 = scmp.eq.s32.totalorder %s1501_s21, 7 }
   0xb   : > { %s72_s22 = ssub.s32 %s2091_s16, %s2801_s19  ;;  %p85_p5 = por %p84_p2, %p83_p1 }
   0xc   : > { %s2805_s20 = smov (%p27_p3, %s2803_s20), 0  ;;  %p2271_p6 = por %p115_p4, %p83_p1 }
   0xd   : > { %s71_s24 = ssub.s32 %s2095_s17, %s2805_s20  ;;  %s76_s26 = sadd.s32 1, %s2079_s13 }
   0xe   : > { %s73_s25 = sor.u32 %s72_s22, %s71_s24  ;;  %p1504_p8 = scmp.ge.s32.totalorder %s2099_s18, 8 }
   0xf   : > { %p74_p7 = scmp.eq.s32.totalorder %s73_s25, 0 }
  0x10   : > { %143 = sbr.rel (%p1504_p8) target bundleno = 95 (0x5f), region = 24 }
  0x11   : > { %s2279_s27 = scalar_select %p74_p7, %s2079_s13, %s76_s26  }
  0x15   : > { %146 = sbr.rel (!%p85_p5) target bundleno = 95 (0x5f), region = 28  ;;  %s148_s28 = sand.u32 (%p85_p5), 1, %s2079_s13  }
  0x16   : > { %s1506_s29 = sshll.u32 (%p85_p5), %s2091_s16, 2  ;;  %s1505_s30 = sshll.u32 (%p85_p5), %s148_s28, 7 }
  0x17   : > { %s152_s4 = ssub.s32 (%p85_p5), 14, %s1506_s29  ;;  %s1580_s5 = smul.u32 (%p85_p5), 56, %s2095_s17 }
  0x18   : > { %p153_p9 = scmp.lt.s32.totalorder (%p85_p5), %s152_s4, 4  ;;  %s2776_s2 = sld [smem:[#allocation4_spill]] (%p85_p5) }
  0x19   : > { %s158_s6 = sadd.s32 (%p85_p5), %s1580_s5, %s1506_s29  ;;  %s2292_s22 = scalar_lea.vmem (%p85_p5), [#allocation2], %s1505_s30  }
  0x1a   : > { %s2807_s4 = smov (!%p153_p9, %s152_s4), 4  ;;  %s1509_s8 = sshll.u32 %s158_s6, 3 }
  0x1b   : > { %s1507_s7 = sshll.u32 %s2807_s4, 9  ;;  %s2290_s21 = sshll.u32 %s2807_s4, 3 }
  0x1c   : > { %p1511_p10 = scmp.eq.s32.totalorder %s1507_s7, 0 }
  0x1d   : > { %p165_p11 = scmp.lt.u32.totalorder (!%p1511_p10), %s2290_s21, 8 }
  0x1e   : > { %s2288_s11 = scalar_lea.vmem %s2776_s2, %s1509_s8   ;;  %164 = sbr.rel (%p1511_p10) target bundleno = 95 (0x5f), region = 32 }
  0x23   : > { %168 = sbr.rel (%p165_p11) target bundleno = 84 (0x54), region = 36  ;;  %s2296_s24 = sand.u32 (!%p165_p11), 7, %s2290_s21  }
  0x24   : > { %p191_p12 = scmp.eq.s32.totalorder (!%p165_p11), %s2296_s24, 0  ;;  %p1512_p13 = scmp.ne.s32.totalorder (!%p165_p11), %s2296_s24, 0 }
  0x28   : > { %194 = sbr.rel (%p1512_p13) target bundleno = 58 (0x3a), region = 51  ;;  %s195_s25 = sshrl.u32 (!%p1512_p13), %s2290_s21, 3 }
  0x29   : > { %s196_s26 = sshrl.u32 (!%p1512_p13), %s195_s25, 4  ;;  %s2301_s28 = sand.u32 (!%p1512_p13), 15, %s195_s25  }
  0x2a   : > { %s1572_s29 = sshll.u32 (!%p1512_p13), %s196_s26, 11  ;;  %p1519_p0 = scmp.le.s32.totalorder (!%p1512_p13), %s2301_s28, 0 }
  0x2b   : > { %s347_s30 = sshra.s32 (!%p1512_p13), %s1572_s29, 4 }
  0x2c   : > { %s2304_s4 = scalar_lea.vmem (!%p1512_p13), %s2288_s11, %s347_s30   ;;  %s2307_s5 = scalar_lea.vmem (!%p1512_p13), %s2292_s22, %s347_s30 [#allocation2]  }
  0x2d   : > { %1376 = sbr.rel (%p1519_p0) target bundleno = 58 (0x3a), region = 240  ;;  %s2777_s6 = smov (!%p1519_p0), %s2307_s5 }
  0x2e   : > { %s2778_s7 = smov (!%p1519_p0), %s2304_s4  ;;  %s2316_s8 = smov (!%p1519_p0), 0  }
  0x2f   : > { %s2113_s9 = smov (!%p1519_p0), 0  }
  0x32 LB: >> { %v363_v0 = vld [vmem:[%s2107_s7] sm:$0xff]  ;;  %v365_v1 = vld [vmem:[%s2107_s7 + $0x70] sm:$0xff]  ;;  %s371_s10 = sadd.s32 1, %s2111_s8  ;;  %s357_s9 = sadd.s32 1, %s2115_s9   ;;  %s2115_s9 = sphi %s2113_s9, %s357_s9   ;;  %s2111_s8 = sphi %s2316_s8, %s2779_s8   ;;  %s2107_s7 = sphi %s2778_s7, %s376_s7   ;;  %s2103_s6 = sphi %s2777_s6, %s377_s6  }
  0x33   : >> { %v367_v2 = vld [vmem:[%s2107_s7 + $0xe0] sm:$0xff]  ;;  %364 = vst [vmem:[%s2103_s6] sm:$0xff] %v363_v0  ;;  %366 = vst [vmem:[%s2103_s6 + $0x20] sm:$0xff] %v365_v1  ;;  %v369_v3 = vld [vmem:[%s2107_s7 + $0x150] sm:$0xff]  ;;  %p372_p1 = scmp.ge.s32.totalorder %s371_s10, %s2301_s28  ;;  %p356_p2 = scmp.ge.s32.totalorder %s357_s9, %s2301_s28 }
  0x34   : >> { %368 = vst [vmem:[%s2103_s6 + $0x40] sm:$0xff] %v367_v2  ;;  %370 = vst [vmem:[%s2103_s6 + $0x60] sm:$0xff] %v369_v3 }
  0x35   : >> { %s2809_s10 = smov (%p372_p1, %s371_s10), 0  ;;  %359 = sbr.rel (!%p356_p2) target bundleno = 50 (0x32), region = 246 }
  0x36   : >> { %s1520_s25 = sshll.u32 %s2809_s10, 3  ;;  %s2779_s8 = smov %s2809_s10 }
  0x37   : >> { %s376_s7 = scalar_lea.vmem %s2304_s4, %s1520_s25   ;;  %s377_s6 = scalar_lea.vmem %s2307_s5, %s1520_s25 [#allocation2]  }
  0x3a PF: > { %380 = sbr.rel (%p191_p12) target bundleno = 84 (0x54), region = 69  ;;  %s382_s26 = ssub.s32 (!%p191_p12), %s2290_s21, %s2296_s24 }
  0x3b   : > { %s386_s29 = sshrl.u32 (!%p191_p12), %s2290_s21, 3  ;;  %s2337_s30 = scalar_lea.vmem (!%p191_p12), %s2288_s11, %s382_s26 }
  0x3c   : > { %s2340_s8 = scalar_lea.vmem (!%p191_p12), %s2292_s22, %s382_s26 [#allocation2]  ;;  %s387_s9 = sshrl.u32 (!%p191_p12), %s386_s29, 4 }
  0x3d   : > { %s2342_s10 = sand.u32 (!%p191_p12), 15, %s386_s29   ;;  %s1574_s28 = sshll.u32 (!%p191_p12), %s387_s9, 11 }
  0x3e   : > { %s538_s4 = sshra.s32 (!%p191_p12), %s1574_s28, 4  ;;  %p1528_p3 = scmp.le.s32.totalorder (!%p191_p12), %s2342_s10, 0 }
  0x3f   : > { %s2345_s5 = scalar_lea.vmem %s2288_s11, %s538_s4   ;;  %s2348_s6 = scalar_lea.vmem %s2292_s22, %s538_s4 [#allocation2]  }
  0x40   : > { %1404 = sbr.rel (%p1528_p3) target bundleno = 77 (0x4d), region = 262  ;;  %s2780_s7 = smov (!%p1528_p3), %s2348_s6 }
  0x41   : > { %s2781_s25 = smov (!%p1528_p3), %s2345_s5  ;;  %s2125_s26 = smov (!%p1528_p3), 0  }
  0x42   : > { %s2129_s2 = smov (!%p1528_p3), 0  }
  0x45 LB: >> { %v554_v4 = vld [vmem:[%s2123_s25] sm:$0xff]  ;;  %v556_v5 = vld [vmem:[%s2123_s25 + $0x70] sm:$0xff]  ;;  %s562_s29 = sadd.s32 1, %s2127_s26  ;;  %s548_s2 = sadd.s32 1, %s2131_s2   ;;  %s2131_s2 = sphi %s2129_s2, %s548_s2   ;;  %s2127_s26 = sphi %s2125_s26, %s2126_s26   ;;  %s2123_s25 = sphi %s2781_s25, %s567_s25   ;;  %s2119_s7 = sphi %s2780_s7, %s568_s7  }
  0x46   : >> { %v558_v6 = vld [vmem:[%s2123_s25 + $0xe0] sm:$0xff]  ;;  %555 = vst [vmem:[%s2119_s7] sm:$0xff] %v554_v4  ;;  %557 = vst [vmem:[%s2119_s7 + $0x20] sm:$0xff] %v556_v5  ;;  %v560_v7 = vld [vmem:[%s2123_s25 + $0x150] sm:$0xff]  ;;  %p563_p4 = scmp.ge.s32.totalorder %s562_s29, %s2342_s10  ;;  %p547_p5 = scmp.ge.s32.totalorder %s548_s2, %s2342_s10 }
  0x47   : >> { %559 = vst [vmem:[%s2119_s7 + $0x40] sm:$0xff] %v558_v6  ;;  %561 = vst [vmem:[%s2119_s7 + $0x60] sm:$0xff] %v560_v7 }
  0x48   : >> { %s2811_s29 = smov (%p563_p4, %s562_s29), 0  ;;  %550 = sbr.rel (!%p547_p5) target bundleno = 69 (0x45), region = 268 }
  0x49   : >> { %s1529_s9 = sshll.u32 %s2811_s29, 3  ;;  %s2126_s26 = smov %s2811_s29  }
  0x4a   : >> { %s567_s25 = scalar_lea.vmem %s2345_s5, %s1529_s9   ;;  %s568_s7 = scalar_lea.vmem %s2348_s6, %s1529_s9 [#allocation2]  }
  0x4d PF: > { %s2197_s28 = smov 1  }
  0x4e   : > { %s569_s4 = sshll.u32 %s2197_s28, %s2296_s24 }
  0x4f   : > { %s1531_s26 = sadd.s32 4294967295, %s569_s4 }
  0x50   : > { %v579_v8 = vld [vmem:[%s2337_s30] sm:%s1531_s26]  ;;  %v581_v9 = vld [vmem:[%s2337_s30 + $0x70] sm:%s1531_s26] }
  0x51   : > { %580 = vst [vmem:[%s2340_s8] sm:%s1531_s26] %v579_v8  ;;  %582 = vst [vmem:[%s2340_s8 + $0x20] sm:%s1531_s26] %v581_v9 }
  0x52   : > { %v583_v10 = vld [vmem:[%s2337_s30 + $0xe0] sm:%s1531_s26]  ;;  %v585_v11 = vld [vmem:[%s2337_s30 + $0x150] sm:%s1531_s26] }
  0x53   : > { %584 = vst [vmem:[%s2340_s8 + $0x40] sm:%s1531_s26] %v583_v10  ;;  %586 = vst [vmem:[%s2340_s8 + $0x60] sm:%s1531_s26] %v585_v11 }
  0x54 PF: > { %p1532_p7 = scmp.ge.u32.totalorder %s2290_s21, 8 }
  0x55   : > { %s2198_s2 = smov (!%p1532_p7), 1  }
  0x56   : > { %171 = sbr.rel (%p1532_p7) target bundleno = 95 (0x5f), region = 40  ;;  %s172_s24 = sshll.u32 (!%p1532_p7), %s2198_s2, %s2290_s21 }
  0x57   : > { %s1533_s10 = sadd.s32 (!%p1532_p7), 4294967295, %s172_s24 }
  0x5b   : > { %v182_v12 = vld [vmem:[%s2288_s11] sm:%s1533_s10]  ;;  %v184_v13 = vld [vmem:[%s2288_s11 + $0x70] sm:%s1533_s10] }
  0x5c   : > { %183 = vst [vmem:[%s2292_s22] sm:%s1533_s10] %v182_v12  ;;  %185 = vst [vmem:[%s2292_s22 + $0x20] sm:%s1533_s10] %v184_v13 }
  0x5d   : > { %v186_v14 = vld [vmem:[%s2288_s11 + $0xe0] sm:%s1533_s10]  ;;  %v188_v15 = vld [vmem:[%s2288_s11 + $0x150] sm:%s1533_s10] }
  0x5e   : > { %187 = vst [vmem:[%s2292_s22 + $0x40] sm:%s1533_s10] %v186_v14  ;;  %189 = vst [vmem:[%s2292_s22 + $0x60] sm:%s1533_s10] %v188_v15 }
  0x5f PF: > { %p1534_p8 = scmp.ge.s32.totalorder %s2099_s18, 1  ;;  %p589_p9 = scmp.lt.s32.totalorder %s2099_s18, 9 }
  0x61   : > { %p590_p10 = pnand %p1534_p8, %p589_p9 }
  0x62   : > { %s596_s21 = sand.u32 (!%p590_p10), 1, %s2075_s12  }
  0x63   : > { %593 = sbr.rel (%p590_p10) target bundleno = 462 (0x1ce), region = 94  ;;  %s1535_s30 = sshll.u32 (!%p590_p10), %s596_s21, 7 }
  0x64   : > { %s598_s8 = scalar_lea.vmem (!%p590_p10), [#allocation2], %s1535_s30  ;;  %s1536_s28 = sshll.u32 (!%p590_p10), %s596_s21, 6 }
  0x65   : > { %s2405_s4 = scalar_lea.vmem (!%p590_p10), [#allocation3], %s1536_s28  }
  0x68   : > { %v2199_v16 = vmov 0.0   ;;  %v646_v17 = vld [vmem:[%s2771_s1] sm:$0xff]  ;;  %v2200_v18 = vmov 0   ;;  %v643_v19 = vld [vmem:[%s598_s8 + $0x68] sm:$0xff]  ;;  %v645_v20 = vld [vmem:[%s598_s8 + $0x78] sm:$0xff]  ;;  %vm658_vm0 = vcmask 261120  }
  0x69   : > { %729 = vmatprep.mubr.f32.mxu0 %v2199_v16  ;;  %806 = vmatprep.mubr.f32.mxu1 %v2199_v16  ;;  %v642_v21 = vld [vmem:[%s598_s8 + $0x60] sm:$0xff]  ;;  %v644_v22 = vld [vmem:[%s598_s8 + $0x70] sm:$0xff]  ;;  %v639_v23 = vld [vmem:[%s598_s8 + $0x48] sm:$0xff]  ;;  %s1542_s12 = sshll.u32 (%p2271_p6), %s2083_s14, 2  ;;  %s1581_s26 = smul.u32 (%p2271_p6), 28, %s2087_s15 }
  0x6a   : > { %1900 = vset.pattern.permute.xlu0 %v2200_v18  ;;  %689 = vmatprep.subr.mxu0 %v643_v19  ;;  %v641_v24 = vld [vmem:[%s598_s8 + $0x58] sm:$0xff]  ;;  %v638_v25 = vld [vmem:[%s598_s8 + $0x40] sm:$0xff]  ;;  %v640_v26 = vld [vmem:[%s598_s8 + $0x50] sm:$0xff]  ;;  %s843_s2 = ssub.s32 (%p2271_p6), 14, %s1542_s12 }
  0x6b   : > { %650 = vperm.xlu0 %1900, %v646_v17   ;;  %766 = vmatprep.subr.mxu1 %v645_v20  ;;  %v635_v27 = vld [vmem:[%s598_s8 + $0x28] sm:$0xff]  ;;  %v637_v28 = vld [vmem:[%s598_s8 + $0x38] sm:$0xff]  ;;  %v634_v29 = vld [vmem:[%s598_s8 + $0x20] sm:$0xff]  ;;  %p844_p11 = scmp.lt.s32.totalorder (%p2271_p6), %s843_s2, 4  ;;  %s849_s24 = sadd.s32 (%p2271_p6), %s1581_s26, %s1542_s12 }
  0x6c   : > { %690 = vmatpush1.msra.mxu0 %v642_v21  ;;  %767 = vmatpush1.msra.mxu1 %v644_v22  ;;  %v636_v30 = vld [vmem:[%s598_s8 + $0x30] sm:$0xff]  ;;  %v631_v31 = vld [vmem:[%s598_s8 + $0x8] sm:$0xff]  ;;  %v633_v32 = vld [vmem:[%s598_s8 + $0x18] sm:$0xff]  ;;  %s1545_s10 = sshll.u32 (%p2271_p6), %s849_s24, 3 }
  0x6d   : > { %691 = vmatprep.subr.mxu0 %v639_v23  ;;  %768 = vmatprep.subr.mxu1 %v641_v24  ;;  %v630_v33 = vld [vmem:[%s598_s8] sm:$0xff]  ;;  %v632_v34 = vld [vmem:[%s598_s8 + $0x10] sm:$0xff]  ;;  %v647_v36 = vld [vmem:[%s2771_s1 + $0x8] sm:$0xf]  ;;  %s2422_s11 = scalar_lea.vmem (%p2271_p6), %s2773_s3, %s1545_s10  }
  0x6e   : > { %692 = vmatpush1.msra.mxu0 %v638_v25  ;;  %769 = vmatpush1.msra.mxu1 %v640_v26  ;;  %v628_v35 = vld [vmem:[%s2770_s0] sm:$0xff]  ;;  %v629_v37 = vld [vmem:[%s2770_s0 + $0x8] sm:$0xf] }
  0x6f   : > { %693 = vmatprep.subr.mxu0 %v635_v27  ;;  %770 = vmatprep.subr.mxu1 %v637_v28 }
  0x70   : > { %694 = vmatpush1.msra.mxu0 %v634_v29  ;;  %771 = vmatpush1.msra.mxu1 %v636_v30 }
  0x71   : > { %695 = vmatprep.subr.mxu0 %v631_v31  ;;  %772 = vmatprep.subr.mxu1 %v633_v32 }
  0x72   : > { %696 = vmatpush1.msra.mxu0 %v630_v33  ;;  %773 = vmatpush1.msra.mxu1 %v632_v34 }
  0x73   : > { %1537 = vmatmul.mubr.msk.f32.vlgmr.msra.gmra.mxu0 %vm658_vm0, %v628_v35  ;;  %1539 = vmatmul.mubr.msk.f32.vlgmr.msra.gmra.mxu1 %vm658_vm0, %v628_v35 }
  0x74   : > { %735 = vmatprep.mubr.f32.mxu0 %v2199_v16  ;;  %812 = vmatprep.mubr.f32.mxu1 %v2199_v16 }
  0x75   : > { %655 = vperm.xlu0 %1900, %v647_v36  }
  0x77   : > { %1538 = vmatmul.mubr.msk.f32.gmra.mxu0 %vm658_vm0, %v629_v37  ;;  %1540 = vmatmul.mubr.msk.f32.gmra.mxu1 %vm658_vm0, %v629_v37 }
  0xe6   : > { %v651_v38 = vpop.permute.xlu0 %650 }
  0xf0   : > { %v656_v45 = vpop.permute.xlu0 %655 }
 0x133   : > { %v731_v39 = vpop.f32.mrf.mxu0  ;;  %v808_v40 = vpop.f32.mrf.mxu1 }
 0x134   : > { %v732_v41 = vadd.f32 %v731_v39, %v651_v38  ;;  %v809_v42 = vadd.f32 %v808_v40, %v651_v38 }
 0x135   : > { %v733_v43 = vpop.f32.mrf.mxu0  ;;  %v810_v44 = vpop.f32.mrf.mxu1 }
 0x136   : > { %1901 = vtanh.f32 %v732_v41  ;;  %v734_v46 = vadd.f32 %v733_v43, %v651_v38  ;;  %v811_v47 = vadd.f32 %v810_v44, %v651_v38 }
 0x137   : > { %1903 = vtanh.f32 %v809_v42  ;;  %v737_v48 = vpop.f32.mrf.mxu0  ;;  %v814_v49 = vpop.f32.mrf.mxu1 }
 0x138   : > { %1905 = vtanh.f32 %v734_v46  ;;  %v738_v50 = vadd.f32 %v737_v48, %v656_v45  ;;  %v815_v51 = vadd.f32 %v814_v49, %v656_v45 }
 0x139   : > { %1907 = vtanh.f32 %v811_v47  ;;  %v739_v52 = vpop.f32.mrf.mxu0  ;;  %v816_v53 = vpop.f32.mrf.mxu1 }
 0x13a   : > { %1909 = vtanh.f32 %v738_v50  ;;  %v740_v54 = vadd.f32 %v739_v52, %v656_v45  ;;  %v817_v55 = vadd.f32 %v816_v53, %v656_v45 }
 0x13b   : > { %1911 = vtanh.f32 %v815_v51 }
 0x13c   : > { %1913 = vtanh.f32 %v740_v54 }
 0x13d   : > { %1915 = vtanh.f32 %v817_v55 }
 0x143   : > { %v1902_v56 = vpop.eup %1901 }
 0x144   : > { %v1904_v57 = vpop.eup %1903  ;;  %827 = vst [vmem:[%s2405_s4] sm:$0xff] %v1902_v56 }
 0x145   : > { %v1906_v58 = vpop.eup %1905  ;;  %829 = vst [vmem:[%s2405_s4 + $0x10] sm:$0xff] %v1904_v57 }
 0x146   : > { %v1908_v59 = vpop.eup %1907  ;;  %828 = vst [vmem:[%s2405_s4 + $0x8] sm:$0xff] %v1906_v58 }
 0x147   : > { %v1910_v60 = vpop.eup %1909  ;;  %830 = vst [vmem:[%s2405_s4 + $0x18] sm:$0xff] %v1908_v59  ;;  %841 = sbr.rel (!%p2271_p6) target bundleno = 462 (0x1ce), region = 102 }
 0x148   : > { %v1912_v61 = vpop.eup %1911  ;;  %831 = vst [vmem:[%s2405_s4 + $0x20] sm:$0xf] %v1910_v60 }
 0x149   : > { %v1914_v62 = vpop.eup %1913  ;;  %833 = vst [vmem:[%s2405_s4 + $0x30] sm:$0xf] %v1912_v61 }
 0x14a   : > { %v1916_v63 = vpop.eup %1915  ;;  %832 = vst [vmem:[%s2405_s4 + $0x28] sm:$0xf] %v1914_v62 }
 0x14b   : > { %834 = vst [vmem:[%s2405_s4 + $0x38] sm:$0xf] %v1916_v63 }
 0x14c   : > { %s2813_s2 = smov (!%p844_p11, %s843_s2), 4 }
 0x14d   : > { %s1543_s22 = sshll.u32 %s2813_s2, 8  ;;  %s2424_s8 = sshll.u32 %s2813_s2, 3 }
 0x14e   : > { %p1547_p12 = scmp.eq.s32.totalorder %s1543_s22, 0 }
 0x14f   : > { %p856_p6 = scmp.lt.u32.totalorder (!%p1547_p12), %s2424_s8, 8 }
 0x150   : > { %855 = sbr.rel (%p1547_p12) target bundleno = 462 (0x1ce), region = 106 }
 0x155   : > { %859 = sbr.rel (%p856_p6) target bundleno = 452 (0x1c4), region = 110  ;;  %s2428_s14 = sand.u32 (!%p856_p6), 7, %s2424_s8  }
 0x156   : > { %p878_p13 = scmp.eq.s32.totalorder (!%p856_p6), %s2428_s14, 0  ;;  %p1548_p0 = scmp.ne.s32.totalorder (!%p856_p6), %s2428_s14, 0 }
 0x15a   : > { %881 = sbr.rel (%p1548_p0) target bundleno = 396 (0x18c), region = 125  ;;  %s882_s15 = sshrl.u32 (!%p1548_p0), %s2424_s8, 3 }
 0x15b   : > { %s2435_s23 = sshrl.u32 (!%p1548_p0), %s882_s15, 5 }
 0x15c   : > { %p1549_p1 = scmp.le.s32.totalorder (!%p1548_p0), %s2435_s23, 0 }
 0x15f   : > { %1418 = sbr.rel (%p1549_p1) target bundleno = 380 (0x17c), region = 273  ;;  %s2782_s5 = smov (!%p1549_p1), %s2422_s11 }
 0x160   : > { %s2783_s6 = smov (!%p1549_p1), %s2405_s4  ;;  %s2444_s7 = smov (!%p1549_p1), 0  }
 0x161   : > { %s2446_s25 = smov (!%p1549_p1), 0  }
 0x164 LB: >> { %v895_v0 = vld [vmem:[%s2139_s6] sm:$0xff]  ;;  %v897_v1 = vld [vmem:[%s2139_s6 + $0x8] sm:$0xff]  ;;  %v899_v2 = vld [vmem:[%s2139_s6 + $0x10] sm:$0xff]  ;;  %s1023_s29 = sadd.s32 1, %s2143_s7  ;;  %s889_s25 = sadd.s32 1, %s2147_s25   ;;  %s2147_s25 = sphi %s2446_s25, %s889_s25   ;;  %s2143_s7 = sphi %s2444_s7, %s2787_s7   ;;  %s2139_s6 = sphi %s2783_s6, %s2786_s6   ;;  %s2135_s5 = sphi %s2782_s5, %s2785_s5  }
 0x165   : >> { %896 = vst [vmem:[%s2135_s5] sm:$0xff] %v895_v0  ;;  %898 = vst [vmem:[%s2135_s5 + $0x8] sm:$0xff] %v897_v1  ;;  %v901_v3 = vld [vmem:[%s2139_s6 + $0x18] sm:$0xff]  ;;  %v903_v4 = vld [vmem:[%s2139_s6 + $0x20] sm:$0xff]  ;;  %p2488_p2 = scmp.ge.s32.totalorder %s1023_s29, %s2435_s23  ;;  %p888_p3 = scmp.ge.s32.totalorder %s889_s25, %s2435_s23 }
 0x166   : >> { %900 = vst [vmem:[%s2135_s5 + $0x10] sm:$0xff] %v899_v2  ;;  %v905_v5 = vld [vmem:[%s2139_s6 + $0x28] sm:$0xff]  ;;  %902 = vst [vmem:[%s2135_s5 + $0x18] sm:$0xff] %v901_v3  ;;  %v907_v6 = vld [vmem:[%s2139_s6 + $0x30] sm:$0xff] }
 0x167   : >> { %904 = vst [vmem:[%s2135_s5 + $0x20] sm:$0xff] %v903_v4  ;;  %906 = vst [vmem:[%s2135_s5 + $0x28] sm:$0xff] %v905_v5  ;;  %v909_v7 = vld [vmem:[%s2139_s6 + $0x38] sm:$0xff]  ;;  %v911_v8 = vld [vmem:[%s2139_s6 + $0x40] sm:$0xff]  ;;  %s2815_s29 = smov (%p2488_p2, %s1023_s29), 0 }
 0x168   : >> { %960 = vst [vmem:[%s2135_s5 + $0x70] sm:$0xff] %v903_v4  ;;  %962 = vst [vmem:[%s2135_s5 + $0x78] sm:$0xff] %v905_v5  ;;  %v913_v9 = vld [vmem:[%s2139_s6 + $0x48] sm:$0xff]  ;;  %v915_v10 = vld [vmem:[%s2139_s6 + $0x50] sm:$0xff]  ;;  %s1550_s28 = sshll.u32 %s2815_s29, 8  ;;  %s2787_s7 = smov %s2815_s29 }
 0x169   : >> { %908 = vst [vmem:[%s2135_s5 + $0x30] sm:$0xff] %v907_v6  ;;  %910 = vst [vmem:[%s2135_s5 + $0x38] sm:$0xff] %v909_v7  ;;  %v917_v11 = vld [vmem:[%s2139_s6 + $0x58] sm:$0xff]  ;;  %v919_v12 = vld [vmem:[%s2139_s6 + $0x60] sm:$0xff]  ;;  %s1028_s12 = scalar_lea.vmem %s2405_s4, %s1550_s28 [#allocation3]   ;;  %s1029_s26 = scalar_lea.vmem %s2422_s11, %s1550_s28  }
 0x16a   : >> { %912 = vst [vmem:[%s2135_s5 + $0x40] sm:$0xff] %v911_v8  ;;  %964 = vst [vmem:[%s2135_s5 + $0x80] sm:$0xff] %v907_v6  ;;  %v921_v13 = vld [vmem:[%s2139_s6 + $0x68] sm:$0xff]  ;;  %v979_v14 = vld [vmem:[%s2139_s6 + $0x70] sm:$0xff] }
 0x16b   : >> { %966 = vst [vmem:[%s2135_s5 + $0x88] sm:$0xff] %v909_v7  ;;  %968 = vst [vmem:[%s2135_s5 + $0x90] sm:$0xff] %v911_v8  ;;  %v981_v15 = vld [vmem:[%s2139_s6 + $0x78] sm:$0xff]  ;;  %v983_v16 = vld [vmem:[%s2139_s6 + $0x80] sm:$0xff] }
 0x16c   : >> { %914 = vst [vmem:[%s2135_s5 + $0x48] sm:$0xff] %v913_v9  ;;  %916 = vst [vmem:[%s2135_s5 + $0x50] sm:$0xff] %v915_v10  ;;  %v985_v17 = vld [vmem:[%s2139_s6 + $0x88] sm:$0xff]  ;;  %v987_v18 = vld [vmem:[%s2139_s6 + $0x90] sm:$0xff] }
 0x16d   : >> { %918 = vst [vmem:[%s2135_s5 + $0x58] sm:$0xff] %v917_v11  ;;  %970 = vst [vmem:[%s2135_s5 + $0x98] sm:$0xff] %v913_v9  ;;  %v989_v19 = vld [vmem:[%s2139_s6 + $0x98] sm:$0xff]  ;;  %v991_v20 = vld [vmem:[%s2139_s6 + $0xa0] sm:$0xff] }
 0x16e   : >> { %972 = vst [vmem:[%s2135_s5 + $0xa0] sm:$0xff] %v915_v10  ;;  %974 = vst [vmem:[%s2135_s5 + $0xa8] sm:$0xff] %v917_v11  ;;  %v993_v21 = vld [vmem:[%s2139_s6 + $0xa8] sm:$0xff]  ;;  %v995_v22 = vld [vmem:[%s2139_s6 + $0xb0] sm:$0xff] }
 0x16f   : >> { %920 = vst [vmem:[%s2135_s5 + $0x60] sm:$0xff] %v919_v12  ;;  %922 = vst [vmem:[%s2135_s5 + $0x68] sm:$0xff] %v921_v13  ;;  %v997_v23 = vld [vmem:[%s2139_s6 + $0xb8] sm:$0xff]  ;;  %v999_v24 = vld [vmem:[%s2139_s6 + $0xc0] sm:$0xff] }
 0x170   : >> { %976 = vst [vmem:[%s2135_s5 + $0xb0] sm:$0xff] %v919_v12  ;;  %978 = vst [vmem:[%s2135_s5 + $0xb8] sm:$0xff] %v921_v13  ;;  %v1001_v25 = vld [vmem:[%s2139_s6 + $0xc8] sm:$0xff]  ;;  %v1003_v26 = vld [vmem:[%s2139_s6 + $0xd0] sm:$0xff] }
 0x171   : >> { %980 = vst [vmem:[%s2135_s5 + $0xc0] sm:$0xff] %v979_v14  ;;  %982 = vst [vmem:[%s2135_s5 + $0xc8] sm:$0xff] %v981_v15  ;;  %v1005_v27 = vld [vmem:[%s2139_s6 + $0xd8] sm:$0xff]  ;;  %v1007_v28 = vld [vmem:[%s2139_s6 + $0xe0] sm:$0xff] }
 0x172   : >> { %984 = vst [vmem:[%s2135_s5 + $0xd0] sm:$0xff] %v983_v16  ;;  %986 = vst [vmem:[%s2135_s5 + $0xd8] sm:$0xff] %v985_v17  ;;  %v1009_v29 = vld [vmem:[%s2139_s6 + $0xe8] sm:$0xff]  ;;  %v1011_v30 = vld [vmem:[%s2139_s6 + $0xf0] sm:$0xff] }
 0x173   : >> { %988 = vst [vmem:[%s2135_s5 + $0xe0] sm:$0xff] %v987_v18  ;;  %990 = vst [vmem:[%s2135_s5 + $0xe8] sm:$0xff] %v989_v19  ;;  %v1013_v31 = vld [vmem:[%s2139_s6 + $0xf8] sm:$0xff]  ;;  %v1015_v32 = vld [vmem:[%s2139_s6 + $0x100] sm:$0xff] }
 0x174   : >> { %992 = vst [vmem:[%s2135_s5 + $0xf0] sm:$0xff] %v991_v20  ;;  %994 = vst [vmem:[%s2135_s5 + $0xf8] sm:$0xff] %v993_v21  ;;  %v1017_v33 = vld [vmem:[%s2139_s6 + $0x108] sm:$0xff]  ;;  %v1019_v34 = vld [vmem:[%s2139_s6 + $0x110] sm:$0xff] }
 0x175   : >> { %996 = vst [vmem:[%s2135_s5 + $0x100] sm:$0xff] %v995_v22  ;;  %998 = vst [vmem:[%s2135_s5 + $0x108] sm:$0xff] %v997_v23  ;;  %v1021_v35 = vld [vmem:[%s2139_s6 + $0x118] sm:$0xff]  ;;  %s2786_s6 = smov %s1028_s12 }
 0x176   : >> { %1000 = vst [vmem:[%s2135_s5 + $0x110] sm:$0xff] %v999_v24  ;;  %1002 = vst [vmem:[%s2135_s5 + $0x118] sm:$0xff] %v1001_v25 }
 0x177   : >> { %1004 = vst [vmem:[%s2135_s5 + $0x120] sm:$0xff] %v1003_v26  ;;  %1006 = vst [vmem:[%s2135_s5 + $0x128] sm:$0xff] %v1005_v27  ;;  %891 = sbr.rel (!%p888_p3) target bundleno = 356 (0x164), region = 279 }
 0x178   : >> { %1008 = vst [vmem:[%s2135_s5 + $0x130] sm:$0xff] %v1007_v28  ;;  %1010 = vst [vmem:[%s2135_s5 + $0x138] sm:$0xff] %v1009_v29 }
 0x179   : >> { %1012 = vst [vmem:[%s2135_s5 + $0x140] sm:$0xff] %v1011_v30  ;;  %1014 = vst [vmem:[%s2135_s5 + $0x148] sm:$0xff] %v1013_v31 }
 0x17a   : >> { %1016 = vst [vmem:[%s2135_s5 + $0x150] sm:$0xff] %v1015_v32  ;;  %1018 = vst [vmem:[%s2135_s5 + $0x158] sm:$0xff] %v1017_v33 }
 0x17b   : >> { %1020 = vst [vmem:[%s2135_s5 + $0x160] sm:$0xff] %v1019_v34  ;;  %1022 = vst [vmem:[%s2135_s5 + $0x168] sm:$0xff] %v1021_v35  ;;  %s2785_s5 = smov %s1029_s26 }
 0x17c PF: > { %s2568_s2 = sand.u32 31, %s882_s15   ;;  %s1576_s24 = sshll.u32 %s2435_s23, 12 }
 0x17d   : > { %s1034_s10 = sshra.s32 %s1576_s24, 4  ;;  %p1555_p4 = scmp.le.s32.totalorder %s2568_s2, 0 }
 0x17e   : > { %s2572_s21 = scalar_lea.vmem %s2405_s4, %s1034_s10 [#allocation3]   ;;  %s1038_s30 = scalar_lea.vmem %s2422_s11, %s1034_s10  }
 0x17f   : > { %1432 = sbr.rel (%p1555_p4) target bundleno = 396 (0x18c), region = 284  ;;  %s2149_s22 = smov (!%p1555_p4), %s1038_s30  }
 0x180   : > { %s2153_s25 = smov (!%p1555_p4), %s2572_s21   ;;  %s2157_s29 = smov (!%p1555_p4), 0  }
 0x181   : > { %s2161_s5 = smov (!%p1555_p4), 0  }
 0x184 LB: >> { %v1050_v36 = vld [vmem:[%s2155_s25] sm:$0xff]  ;;  %s1054_s15 = sadd.s32 1, %s2159_s29  ;;  %s1044_s5 = sadd.s32 1, %s2163_s5   ;;  %s2163_s5 = sphi %s2161_s5, %s1044_s5   ;;  %s2159_s29 = sphi %s2157_s29, %s2158_s29   ;;  %s2155_s25 = sphi %s2153_s25, %s1059_s25   ;;  %s2151_s22 = sphi %s2149_s22, %s1060_s22  }
 0x185   : >> { %v1052_v37 = vld [vmem:[%s2155_s25 + $0x20] sm:$0xff]  ;;  %1051 = vst [vmem:[%s2151_s22] sm:$0xff] %v1050_v36  ;;  %p1055_p5 = scmp.ge.s32.totalorder %s1054_s15, %s2568_s2  ;;  %p1043_p7 = scmp.ge.s32.totalorder %s1044_s5, %s2568_s2 }
 0x186   : >> { %1053 = vst [vmem:[%s2151_s22 + $0x70] sm:$0xff] %v1052_v37 }
 0x187   : >> { %s2817_s15 = smov (%p1055_p5, %s1054_s15), 0  ;;  %1046 = sbr.rel (!%p1043_p7) target bundleno = 388 (0x184), region = 290 }
 0x188   : >> { %s1556_s23 = sshll.u32 %s2817_s15, 3  ;;  %s2158_s29 = smov %s2817_s15  }
 0x189   : >> { %s1059_s25 = scalar_lea.vmem %s2572_s21, %s1556_s23 [#allocation3]   ;;  %s1060_s22 = scalar_lea.vmem %s1038_s30, %s1556_s23  }
 0x18c PF: > { %1063 = sbr.rel (%p878_p13) target bundleno = 452 (0x1c4), region = 143  ;;  %s1065_s6 = ssub.s32 (!%p878_p13), %s2424_s8, %s2428_s14 }
 0x18d   : > { %s1069_s7 = sshrl.u32 (!%p878_p13), %s2424_s8, 3  ;;  %s2586_s9 = scalar_lea.vmem (!%p878_p13), %s2405_s4, %s1065_s6 [#allocation3] }
 0x18e   : > { %s2589_s28 = scalar_lea.vmem (!%p878_p13), %s2422_s11, %s1065_s6  ;;  %s2593_s12 = sshrl.u32 (!%p878_p13), %s1069_s7, 5 }
 0x18f   : > { %p1558_p8 = scmp.le.s32.totalorder (!%p878_p13), %s2593_s12, 0 }
 0x191   : > { %1446 = sbr.rel (%p1558_p8) target bundleno = 430 (0x1ae), region = 295  ;;  %s2788_s26 = smov (!%p1558_p8), %s2422_s11 }
 0x192   : > { %s2789_s2 = smov (!%p1558_p8), %s2405_s4  ;;  %s2602_s24 = smov (!%p1558_p8), 0  }
 0x193   : > { %s2604_s10 = smov (!%p1558_p8), 0  }
 0x196 LB: >> { %v1082_v38 = vld [vmem:[%s2171_s2] sm:$0xff]  ;;  %v1084_v39 = vld [vmem:[%s2171_s2 + $0x8] sm:$0xff]  ;;  %v1086_v40 = vld [vmem:[%s2171_s2 + $0x10] sm:$0xff]  ;;  %s1210_s21 = sadd.s32 1, %s2175_s24  ;;  %s1076_s10 = sadd.s32 1, %s2179_s10   ;;  %s2179_s10 = sphi %s2604_s10, %s1076_s10   ;;  %s2175_s24 = sphi %s2602_s24, %s2793_s24   ;;  %s2171_s2 = sphi %s2789_s2, %s2792_s2   ;;  %s2167_s26 = sphi %s2788_s26, %s2791_s26  }
 0x197   : >> { %1083 = vst [vmem:[%s2167_s26] sm:$0xff] %v1082_v38  ;;  %1085 = vst [vmem:[%s2167_s26 + $0x8] sm:$0xff] %v1084_v39  ;;  %v1088_v41 = vld [vmem:[%s2171_s2 + $0x18] sm:$0xff]  ;;  %v1090_v42 = vld [vmem:[%s2171_s2 + $0x20] sm:$0xff]  ;;  %p2646_p9 = scmp.ge.s32.totalorder %s1210_s21, %s2593_s12  ;;  %p1075_p10 = scmp.ge.s32.totalorder %s1076_s10, %s2593_s12 }
 0x198   : >> { %1087 = vst [vmem:[%s2167_s26 + $0x10] sm:$0xff] %v1086_v40  ;;  %v1092_v43 = vld [vmem:[%s2171_s2 + $0x28] sm:$0xff]  ;;  %1089 = vst [vmem:[%s2167_s26 + $0x18] sm:$0xff] %v1088_v41  ;;  %v1094_v44 = vld [vmem:[%s2171_s2 + $0x30] sm:$0xff] }
 0x199   : >> { %1091 = vst [vmem:[%s2167_s26 + $0x20] sm:$0xff] %v1090_v42  ;;  %1093 = vst [vmem:[%s2167_s26 + $0x28] sm:$0xff] %v1092_v43  ;;  %v1096_v45 = vld [vmem:[%s2171_s2 + $0x38] sm:$0xff]  ;;  %v1098_v46 = vld [vmem:[%s2171_s2 + $0x40] sm:$0xff]  ;;  %s2819_s21 = smov (%p2646_p9, %s1210_s21), 0 }
 0x19a   : >> { %1147 = vst [vmem:[%s2167_s26 + $0x70] sm:$0xff] %v1090_v42  ;;  %1149 = vst [vmem:[%s2167_s26 + $0x78] sm:$0xff] %v1092_v43  ;;  %v1100_v47 = vld [vmem:[%s2171_s2 + $0x48] sm:$0xff]  ;;  %v1102_v48 = vld [vmem:[%s2171_s2 + $0x50] sm:$0xff]  ;;  %s1559_s22 = sshll.u32 %s2819_s21, 8  ;;  %s2793_s24 = smov %s2819_s21 }
 0x19b   : >> { %1095 = vst [vmem:[%s2167_s26 + $0x30] sm:$0xff] %v1094_v44  ;;  %1097 = vst [vmem:[%s2167_s26 + $0x38] sm:$0xff] %v1096_v45  ;;  %v1104_v49 = vld [vmem:[%s2171_s2 + $0x58] sm:$0xff]  ;;  %v1106_v50 = vld [vmem:[%s2171_s2 + $0x60] sm:$0xff]  ;;  %s1215_s25 = scalar_lea.vmem %s2405_s4, %s1559_s22 [#allocation3]   ;;  %s1216_s29 = scalar_lea.vmem %s2422_s11, %s1559_s22  }
 0x19c   : >> { %1099 = vst [vmem:[%s2167_s26 + $0x40] sm:$0xff] %v1098_v46  ;;  %1151 = vst [vmem:[%s2167_s26 + $0x80] sm:$0xff] %v1094_v44  ;;  %v1108_v51 = vld [vmem:[%s2171_s2 + $0x68] sm:$0xff]  ;;  %v1166_v52 = vld [vmem:[%s2171_s2 + $0x70] sm:$0xff] }
 0x19d   : >> { %1153 = vst [vmem:[%s2167_s26 + $0x88] sm:$0xff] %v1096_v45  ;;  %1155 = vst [vmem:[%s2167_s26 + $0x90] sm:$0xff] %v1098_v46  ;;  %v1168_v53 = vld [vmem:[%s2171_s2 + $0x78] sm:$0xff]  ;;  %v1170_v54 = vld [vmem:[%s2171_s2 + $0x80] sm:$0xff] }
 0x19e   : >> { %1101 = vst [vmem:[%s2167_s26 + $0x48] sm:$0xff] %v1100_v47  ;;  %1103 = vst [vmem:[%s2167_s26 + $0x50] sm:$0xff] %v1102_v48  ;;  %v1172_v55 = vld [vmem:[%s2171_s2 + $0x88] sm:$0xff]  ;;  %v1174_v56 = vld [vmem:[%s2171_s2 + $0x90] sm:$0xff] }
 0x19f   : >> { %1105 = vst [vmem:[%s2167_s26 + $0x58] sm:$0xff] %v1104_v49  ;;  %1157 = vst [vmem:[%s2167_s26 + $0x98] sm:$0xff] %v1100_v47  ;;  %v1176_v57 = vld [vmem:[%s2171_s2 + $0x98] sm:$0xff]  ;;  %v1178_v58 = vld [vmem:[%s2171_s2 + $0xa0] sm:$0xff] }
 0x1a0   : >> { %1159 = vst [vmem:[%s2167_s26 + $0xa0] sm:$0xff] %v1102_v48  ;;  %1161 = vst [vmem:[%s2167_s26 + $0xa8] sm:$0xff] %v1104_v49  ;;  %v1180_v59 = vld [vmem:[%s2171_s2 + $0xa8] sm:$0xff]  ;;  %v1182_v60 = vld [vmem:[%s2171_s2 + $0xb0] sm:$0xff] }
 0x1a1   : >> { %1107 = vst [vmem:[%s2167_s26 + $0x60] sm:$0xff] %v1106_v50  ;;  %1109 = vst [vmem:[%s2167_s26 + $0x68] sm:$0xff] %v1108_v51  ;;  %v1184_v61 = vld [vmem:[%s2171_s2 + $0xb8] sm:$0xff]  ;;  %v1186_v62 = vld [vmem:[%s2171_s2 + $0xc0] sm:$0xff] }
 0x1a2   : >> { %1163 = vst [vmem:[%s2167_s26 + $0xb0] sm:$0xff] %v1106_v50  ;;  %1165 = vst [vmem:[%s2167_s26 + $0xb8] sm:$0xff] %v1108_v51  ;;  %v1188_v63 = vld [vmem:[%s2171_s2 + $0xc8] sm:$0xff]  ;;  %v1190_v0 = vld [vmem:[%s2171_s2 + $0xd0] sm:$0xff] }
 0x1a3   : >> { %1167 = vst [vmem:[%s2167_s26 + $0xc0] sm:$0xff] %v1166_v52  ;;  %1169 = vst [vmem:[%s2167_s26 + $0xc8] sm:$0xff] %v1168_v53  ;;  %v1192_v1 = vld [vmem:[%s2171_s2 + $0xd8] sm:$0xff]  ;;  %v1194_v2 = vld [vmem:[%s2171_s2 + $0xe0] sm:$0xff] }
 0x1a4   : >> { %1171 = vst [vmem:[%s2167_s26 + $0xd0] sm:$0xff] %v1170_v54  ;;  %1173 = vst [vmem:[%s2167_s26 + $0xd8] sm:$0xff] %v1172_v55  ;;  %v1196_v3 = vld [vmem:[%s2171_s2 + $0xe8] sm:$0xff]  ;;  %v1198_v4 = vld [vmem:[%s2171_s2 + $0xf0] sm:$0xff] }
 0x1a5   : >> { %1175 = vst [vmem:[%s2167_s26 + $0xe0] sm:$0xff] %v1174_v56  ;;  %1177 = vst [vmem:[%s2167_s26 + $0xe8] sm:$0xff] %v1176_v57  ;;  %v1200_v5 = vld [vmem:[%s2171_s2 + $0xf8] sm:$0xff]  ;;  %v1202_v6 = vld [vmem:[%s2171_s2 + $0x100] sm:$0xff] }
 0x1a6   : >> { %1179 = vst [vmem:[%s2167_s26 + $0xf0] sm:$0xff] %v1178_v58  ;;  %1181 = vst [vmem:[%s2167_s26 + $0xf8] sm:$0xff] %v1180_v59  ;;  %v1204_v7 = vld [vmem:[%s2171_s2 + $0x108] sm:$0xff]  ;;  %v1206_v8 = vld [vmem:[%s2171_s2 + $0x110] sm:$0xff] }
 0x1a7   : >> { %1183 = vst [vmem:[%s2167_s26 + $0x100] sm:$0xff] %v1182_v60  ;;  %1185 = vst [vmem:[%s2167_s26 + $0x108] sm:$0xff] %v1184_v61  ;;  %v1208_v9 = vld [vmem:[%s2171_s2 + $0x118] sm:$0xff]  ;;  %s2792_s2 = smov %s1215_s25 }
 0x1a8   : >> { %1187 = vst [vmem:[%s2167_s26 + $0x110] sm:$0xff] %v1186_v62  ;;  %1189 = vst [vmem:[%s2167_s26 + $0x118] sm:$0xff] %v1188_v63 }
 0x1a9   : >> { %1191 = vst [vmem:[%s2167_s26 + $0x120] sm:$0xff] %v1190_v0  ;;  %1193 = vst [vmem:[%s2167_s26 + $0x128] sm:$0xff] %v1192_v1  ;;  %1078 = sbr.rel (!%p1075_p10) target bundleno = 406 (0x196), region = 301 }
 0x1aa   : >> { %1195 = vst [vmem:[%s2167_s26 + $0x130] sm:$0xff] %v1194_v2  ;;  %1197 = vst [vmem:[%s2167_s26 + $0x138] sm:$0xff] %v1196_v3 }
 0x1ab   : >> { %1199 = vst [vmem:[%s2167_s26 + $0x140] sm:$0xff] %v1198_v4  ;;  %1201 = vst [vmem:[%s2167_s26 + $0x148] sm:$0xff] %v1200_v5 }
 0x1ac   : >> { %1203 = vst [vmem:[%s2167_s26 + $0x150] sm:$0xff] %v1202_v6  ;;  %1205 = vst [vmem:[%s2167_s26 + $0x158] sm:$0xff] %v1204_v7 }
 0x1ad   : >> { %1207 = vst [vmem:[%s2167_s26 + $0x160] sm:$0xff] %v1206_v8  ;;  %1209 = vst [vmem:[%s2167_s26 + $0x168] sm:$0xff] %v1208_v9  ;;  %s2791_s26 = smov %s1216_s29 }
 0x1ae PF: > { %s2726_s5 = sand.u32 31, %s1069_s7   ;;  %s1578_s15 = sshll.u32 %s2593_s12, 12 }
 0x1af   : > { %s1221_s23 = sshra.s32 %s1578_s15, 4  ;;  %p1564_p11 = scmp.le.s32.totalorder %s2726_s5, 0 }
 0x1b0   : > { %s2730_s6 = scalar_lea.vmem %s2405_s4, %s1221_s23 [#allocation3]   ;;  %s1225_s30 = scalar_lea.vmem %s2422_s11, %s1221_s23  }
 0x1b1   : > { %1460 = sbr.rel (%p1564_p11) target bundleno = 446 (0x1be), region = 306  ;;  %s2181_s21 = smov (!%p1564_p11), %s1225_s30  }
 0x1b2   : > { %s2185_s10 = smov (!%p1564_p11), %s2730_s6   ;;  %s2189_s22 = smov (!%p1564_p11), 0  }
 0x1b3   : > { %s2193_s26 = smov (!%p1564_p11), 0  }
 0x1b6 LB: >> { %v1237_v10 = vld [vmem:[%s2187_s10] sm:$0xff]  ;;  %s1241_s7 = sadd.s32 1, %s2191_s22  ;;  %s1231_s26 = sadd.s32 1, %s2195_s26   ;;  %s2195_s26 = sphi %s2193_s26, %s1231_s26   ;;  %s2191_s22 = sphi %s2189_s22, %s2190_s22   ;;  %s2187_s10 = sphi %s2185_s10, %s1246_s10   ;;  %s2183_s21 = sphi %s2181_s21, %s1247_s21  }
 0x1b7   : >> { %v1239_v11 = vld [vmem:[%s2187_s10 + $0x20] sm:$0xff]  ;;  %1238 = vst [vmem:[%s2183_s21] sm:$0xff] %v1237_v10  ;;  %p1242_p12 = scmp.ge.s32.totalorder %s1241_s7, %s2726_s5  ;;  %p1230_p6 = scmp.ge.s32.totalorder %s1231_s26, %s2726_s5 }
 0x1b8   : >> { %1240 = vst [vmem:[%s2183_s21 + $0x70] sm:$0xff] %v1239_v11 }
 0x1b9   : >> { %s2821_s7 = smov (%p1242_p12, %s1241_s7), 0  ;;  %1233 = sbr.rel (!%p1230_p6) target bundleno = 438 (0x1b6), region = 312 }
 0x1ba   : >> { %s1565_s12 = sshll.u32 %s2821_s7, 3  ;;  %s2190_s22 = smov %s2821_s7  }
 0x1bb   : >> { %s1246_s10 = scalar_lea.vmem %s2730_s6, %s1565_s12 [#allocation3]   ;;  %s1247_s21 = scalar_lea.vmem %s1225_s30, %s1565_s12  }
 0x1be PF: > { %s2201_s2 = smov 1  }
 0x1bf   : > { %s1248_s24 = sshll.u32 %s2201_s2, %s2428_s14 }
 0x1c0   : > { %s1567_s25 = sadd.s32 4294967295, %s1248_s24 }
 0x1c1   : > { %v1258_v12 = vld [vmem:[%s2586_s9] sm:%s1567_s25] }
 0x1c2   : > { %v1260_v13 = vld [vmem:[%s2586_s9 + $0x20] sm:%s1567_s25]  ;;  %1259 = vst [vmem:[%s2589_s28] sm:%s1567_s25] %v1258_v12 }
 0x1c3   : > { %1261 = vst [vmem:[%s2589_s28 + $0x70] sm:%s1567_s25] %v1260_v13 }
 0x1c4 PF: > { %p1568_p13 = scmp.ge.u32.totalorder %s2424_s8, 8 }
 0x1c5   : > { %s2202_s29 = smov (!%p1568_p13), 1  }
 0x1c6   : > { %862 = sbr.rel (%p1568_p13) target bundleno = 462 (0x1ce), region = 114  ;;  %s863_s5 = sshll.u32 (!%p1568_p13), %s2202_s29, %s2424_s8 }
 0x1c7   : > { %s1569_s15 = sadd.s32 (!%p1568_p13), 4294967295, %s863_s5 }
 0x1cb   : > { %v873_v14 = vld [vmem:[%s2405_s4] sm:%s1569_s15] }
 0x1cc   : > { %v875_v15 = vld [vmem:[%s2405_s4 + $0x20] sm:%s1569_s15]  ;;  %874 = vst [vmem:[%s2422_s11] sm:%s1569_s15] %v873_v14 }
 0x1cd   : > { %876 = vst [vmem:[%s2422_s11 + $0x70] sm:%s1569_s15] %v875_v15 }
 0x1ce PF: > { %s13_s18 = sadd.s32 1, %s2099_s18   ;;  %s2794_s12 = smov %s2079_s13 }
 0x1cf   : > { %p10_p0 = scmp.ge.s32.totalorder %s13_s18, 10   ;;  %s2795_s13 = smov %s2279_s27 }
 0x1d0   : > { %s2796_s14 = smov %s2091_s16  ;;  %s2797_s15 = smov %s2095_s17 }
 0x1d1   : > { %s2798_s16 = smov %s2801_s19  ;;  %s2799_s17 = smov %s2805_s20 }
 0x1d2   :  { %12 = sbr.rel (!%p10_p0) target bundleno = 6 (0x6), region = 323 }

</bundles_post_ra>
